<compile_context>
chip_gen: v7x
topology: tpu7x:2x2x1
jax: 0.10.0
libtpu: 0.0.40
codegen_flags: <defaults>
</compile_context>

<pallas_src>
import math
from functools import partial

import jax
import jax.numpy as jnp
from jax import lax
from jax.experimental import pallas as pl
from jax.experimental.pallas import tpu as pltpu


SFP_SCALES = (4.0, 2.0, 1.0, 0.5)


# ---------------------------------------------------------------------------
# small helpers
# ---------------------------------------------------------------------------
def _round_up(x, m):
    return (x + m - 1) // m * m


def _pick_tile(size, candidates, align):
    padded = _round_up(size, align)
    for c in candidates:
        if padded % c == 0:
            return c, padded
    return padded, padded


def _pick_row_tile(m, pref):
    if m > pref:
        return pref, _round_up(m, pref)
    t = _round_up(m, 8)
    return t, t


def _gelu(x):  # exact (erf) GELU == torch.nn.GELU default, f32
    return 0.5 * x * (1.0 + lax.erf(x * (1.0 / math.sqrt(2.0))))


# ---------------------------------------------------------------------------
# Kernel 1: tiled matmul (+bias, +GELU, +fused residual) with f32 accumulator
# ---------------------------------------------------------------------------
def _mm_kernel(*refs, activation, has_bias, has_residual):
    x_ref, w_ref = refs[0], refs[1]
    idx = 2
    b_ref = None
    r_ref = None
    if has_bias:
        b_ref = refs[idx]
        idx += 1
    if has_residual:
        r_ref = refs[idx]
        idx += 1
    o_ref = refs[idx]
    acc_ref = refs[idx + 1]

    k = pl.program_id(2)

    @pl.when(k == 0)
    def _():
        acc_ref[...] = jnp.zeros_like(acc_ref)

    acc_ref[...] += jnp.dot(x_ref[...], w_ref[...],
                            preferred_element_type=jnp.float32)

    @pl.when(k == pl.num_programs(2) - 1)
    def _():
        acc = acc_ref[...]
        if has_bias:
            acc = acc + b_ref[...].astype(jnp.float32)
        if activation == "gelu":
            acc = _gelu(acc)
        if has_residual:
            acc = acc + r_ref[...].astype(jnp.float32)
        o_ref[...] = acc.astype(o_ref.dtype)


def matmul_bias(x, w, b=None, activation=None, residual=None,
                out_dtype=jnp.bfloat16, tm=256):
    """(M,K)@(K,N) [+ bias] [+ GELU] [+ residual], bf16 MXU feeds, f32 accumulate."""
    M, K = x.shape
    K2, N = w.shape
    assert K == K2
    tm_, Mp = _pick_row_tile(M, tm)
    tn_, Np = _pick_tile(N, (256, 128), 128)
    tk_, Kp = _pick_tile(K, (512, 384, 256, 128), 128)

    xb = x.astype(jnp.bfloat16)
    wb = w.astype(jnp.bfloat16)
    if (Mp, Kp) != (M, K):
        xb = jnp.pad(xb, ((0, Mp - M), (0, Kp - K)))
    if (Kp, Np) != (K, N):
        wb = jnp.pad(wb, ((0, Kp - K), (0, Np - N)))

    inputs = [xb, wb]
    in_specs = [pl.BlockSpec((tm_, tk_), lambda i, j, k: (i, k)),
                pl.BlockSpec((tk_, tn_), lambda i, j, k: (k, j))]

    has_bias = b is not None
    if has_bias:
        bp = b.reshape(1, N).astype(jnp.float32)
        if Np != N:
            bp = jnp.pad(bp, ((0, 0), (0, Np - N)))
        inputs.append(bp)
        in_specs.append(pl.BlockSpec((1, tn_), lambda i, j, k: (0, j)))

    has_res = residual is not None
    if has_res:
        rp = residual
        if rp.shape != (Mp, Np):
            rp = jnp.pad(rp, ((0, Mp - M), (0, Np - N)))
        inputs.append(rp)
        in_specs.append(pl.BlockSpec((tm_, tn_), lambda i, j, k: (i, j)))

    out = pl.pallas_call(
        partial(_mm_kernel, activation=activation, has_bias=has_bias,
                has_residual=has_res),
        grid=(Mp // tm_, Np // tn_, Kp // tk_),
        in_specs=in_specs,
        out_specs=pl.BlockSpec((tm_, tn_), lambda i, j, k: (i, j)),
        out_shape=jax.ShapeDtypeStruct((Mp, Np), out_dtype),
        scratch_shapes=[pltpu.VMEM((tm_, tn_), jnp.float32)],
        compiler_params=pltpu.CompilerParams(
            dimension_semantics=("parallel", "parallel", "arbitrary")),
    )(*inputs)
    if (Mp, Np) != (M, N):
        out = out[:M, :N]
    return out


# ---------------------------------------------------------------------------
# Kernel 2: fused LayerNorm(input) -> matmul (+bias, +GELU).  K is not tiled.
# ---------------------------------------------------------------------------
def _ln_mm_kernel(*refs, eps, activation, has_bias):
    x_ref, g_ref, bn_ref, w_ref = refs[:4]
    b_ref = refs[4] if has_bias else None
    o_ref = refs[4 + int(has_bias)]

    x = x_ref[...].astype(jnp.float32)
    mu = jnp.mean(x, axis=-1, keepdims=True)
    xc = x - mu
    var = jnp.mean(xc * xc, axis=-1, keepdims=True)
    y = xc * lax.rsqrt(var + eps) * g_ref[...] + bn_ref[...]
    acc = jnp.dot(y.astype(jnp.bfloat16), w_ref[...],
                  preferred_element_type=jnp.float32)
    if has_bias:
        acc = acc + b_ref[...].astype(jnp.float32)
    if activation == "gelu":
        acc = _gelu(acc)
    o_ref[...] = acc.astype(o_ref.dtype)


def ln_matmul_bias(x, g, bln, w, b=None, activation=None, eps=1e-6,
                   out_dtype=jnp.bfloat16, tm=256):
    """LayerNorm over last dim of x (f32 stats), then (M,K)@(K,N)+bias (+GELU)."""
    M, K = x.shape
    K2, N = w.shape
    assert K == K2
    tm_, Mp = _pick_row_tile(M, tm)
    tn_, Np = _pick_tile(N, (256, 128), 128)

    xp = x if Mp == M else jnp.pad(x, ((0, Mp - M), (0, 0)))
    wb = w.astype(jnp.bfloat16)
    if Np != N:
        wb = jnp.pad(wb, ((0, 0), (0, Np - N)))

    inputs = [xp,
              g.reshape(1, K).astype(jnp.float32),
              bln.reshape(1, K).astype(jnp.float32),
              wb]
    in_specs = [pl.BlockSpec((tm_, K), lambda i, j: (i, 0)),
                pl.BlockSpec((1, K), lambda i, j: (0, 0)),
                pl.BlockSpec((1, K), lambda i, j: (0, 0)),
                pl.BlockSpec((K, tn_), lambda i, j: (0, j))]

    has_bias = b is not None
    if has_bias:
        bp = b.reshape(1, N).astype(jnp.float32)
        if Np != N:
            bp = jnp.pad(bp, ((0, 0), (0, Np - N)))
        inputs.append(bp)
        in_specs.append(pl.BlockSpec((1, tn_), lambda i, j: (0, j)))

    out = pl.pallas_call(
        partial(_ln_mm_kernel, eps=eps, activation=activation, has_bias=has_bias),
        grid=(Mp // tm_, Np // tn_),
        in_specs=in_specs,
        out_specs=pl.BlockSpec((tm_, tn_), lambda i, j: (i, j)),
        out_shape=jax.ShapeDtypeStruct((Mp, Np), out_dtype),
        compiler_params=pltpu.CompilerParams(
            dimension_semantics=("parallel", "parallel")),
    )(*inputs)
    if (Mp, Np) != (M, N):
        out = out[:M, :N]
    return out


# ---------------------------------------------------------------------------
# Kernel 3: matmul -> LayerNorm(output)  (1x1 conv + channel LN fusion)
# ---------------------------------------------------------------------------
def _mm_lnout_kernel(x_ref, w_ref, g_ref, b_ref, o_ref, *, eps):
    acc = jnp.dot(x_ref[...], w_ref[...], preferred_element_type=jnp.float32)
    mu = jnp.mean(acc, axis=-1, keepdims=True)
    xc = acc - mu
    var = jnp.mean(xc * xc, axis=-1, keepdims=True)
    y = xc * lax.rsqrt(var + eps) * g_ref[...] + b_ref[...]
    o_ref[...] = y.astype(o_ref.dtype)


def matmul_ln_out(x, w, g, bln, eps=1e-6, out_dtype=jnp.bfloat16, tm=256):
    M, K = x.shape
    _, N = w.shape
    tm_, Mp = _pick_row_tile(M, tm)
    xb = x.astype(jnp.bfloat16)
    if Mp != M:
        xb = jnp.pad(xb, ((0, Mp - M), (0, 0)))
    out = pl.pallas_call(
        partial(_mm_lnout_kernel, eps=eps),
        grid=(Mp // tm_,),
        in_specs=[pl.BlockSpec((tm_, K), lambda i: (i, 0)),
                  pl.BlockSpec((K, N), lambda i: (0, 0)),
                  pl.BlockSpec((1, N), lambda i: (0, 0)),
                  pl.BlockSpec((1, N), lambda i: (0, 0))],
        out_specs=pl.BlockSpec((tm_, N), lambda i: (i, 0)),
        out_shape=jax.ShapeDtypeStruct((Mp, N), out_dtype),
        compiler_params=pltpu.CompilerParams(dimension_semantics=("parallel",)),
    )(xb, w.astype(jnp.bfloat16),
      g.reshape(1, N).astype(jnp.float32), bln.reshape(1, N).astype(jnp.float32))
    return out[:M] if Mp != M else out


# ---------------------------------------------------------------------------
# Kernel 4: standalone LayerNorm (optional GELU)
# ---------------------------------------------------------------------------
def _ln_kernel(x_ref, g_ref, b_ref, o_ref, *, eps, activation):
    x = x_ref[...].astype(jnp.float32)
    mu = jnp.mean(x, axis=-1, keepdims=True)
    xc = x - mu
    var = jnp.mean(xc * xc, axis=-1, keepdims=True)
    y = xc * lax.rsqrt(var + eps) * g_ref[...] + b_ref[...]
    if activation == "gelu":
        y = _gelu(y)
    o_ref[...] = y.astype(o_ref.dtype)


def layernorm(x, g, b, eps=1e-6, activation=None, out_dtype=jnp.float32, tm=512):
    M, C = x.shape
    tm_, Mp = _pick_row_tile(M, tm)
    xp = x if Mp == M else jnp.pad(x, ((0, Mp - M), (0, 0)))
    out = pl.pallas_call(
        partial(_ln_kernel, eps=eps, activation=activation),
        grid=(Mp // tm_,),
        in_specs=[pl.BlockSpec((tm_, C), lambda i: (i, 0)),
                  pl.BlockSpec((1, C), lambda i: (0, 0)),
                  pl.BlockSpec((1, C), lambda i: (0, 0))],
        out_specs=pl.BlockSpec((tm_, C), lambda i: (i, 0)),
        out_shape=jax.ShapeDtypeStruct((Mp, C), out_dtype),
        compiler_params=pltpu.CompilerParams(dimension_semantics=("parallel",)),
    )(xp, g.reshape(1, C).astype(jnp.float32), b.reshape(1, C).astype(jnp.float32))
    return out[:M] if Mp != M else out


# ---------------------------------------------------------------------------
# Kernel 5: flash-style attention (online softmax, kv axis "arbitrary")
# ---------------------------------------------------------------------------
def _flash_attn_kernel(q_ref, k_ref, v_ref, o_ref, m_sc, l_sc, acc_sc, *, scale):
    j = pl.program_id(2)

    @pl.when(j == 0)
    def _():
        m_sc[...] = jnp.full_like(m_sc, -jnp.inf)
        l_sc[...] = jnp.zeros_like(l_sc)
        acc_sc[...] = jnp.zeros_like(acc_sc)

    q = q_ref[0]                                    # (tq, hd) bf16
    k = k_ref[0]                                    # (tk, hd) bf16
    s = lax.dot_general(q, k, (((1,), (1,)), ((), ())),
                        preferred_element_type=jnp.float32) * scale   # (tq, tk) f32
    m_prev = m_sc[...]
    m_new = jnp.maximum(m_prev, jnp.max(s, axis=-1, keepdims=True))
    alpha = jnp.exp(m_prev - m_new)
    p = jnp.exp(s - m_new)
    l_sc[...] = alpha * l_sc[...] + jnp.sum(p, axis=-1, keepdims=True)
    acc_sc[...] = alpha * acc_sc[...] + jnp.dot(
        p.astype(v_ref.dtype), v_ref[0], preferred_element_type=jnp.float32)
    m_sc[...] = m_new

    @pl.when(j == pl.num_programs(2) - 1)
    def _():
        o_ref[0] = (acc_sc[...] * pl.reciprocal(l_sc[...], approx=True)
                    ).astype(o_ref.dtype)


def flash_attention(q, k, v, scale, out_dtype=jnp.bfloat16):
    """softmax(q @ k^T * scale) @ v over a (batch*heads, Nq-tiles, Nk-tiles) grid."""
    BH, N, hd = q.shape
    tq = 128 if (N > 128 and N % 128 == 0) else N
    tk = tq
    q_spec = pl.BlockSpec((1, tq, hd), lambda b, i, j: (b, i, 0))
    kv_spec = pl.BlockSpec((1, tk, hd), lambda b, i, j: (b, j, 0))
    return pl.pallas_call(
        partial(_flash_attn_kernel, scale=scale),
        grid=(BH, N // tq, N // tk),
        in_specs=[q_spec, kv_spec, kv_spec],
        out_specs=pl.BlockSpec((1, tq, hd), lambda b, i, j: (b, i, 0)),
        out_shape=jax.ShapeDtypeStruct((BH, N, hd), out_dtype),
        scratch_shapes=[pltpu.VMEM((tq, 1), jnp.float32),
                        pltpu.VMEM((tq, 1), jnp.float32),
                        pltpu.VMEM((tq, hd), jnp.float32)],
        compiler_params=pltpu.CompilerParams(
            dimension_semantics=("parallel", "parallel", "arbitrary")),
    )(q.astype(jnp.bfloat16), k.astype(jnp.bfloat16), v.astype(jnp.bfloat16))


# ---------------------------------------------------------------------------
# Kernel 6: 3x3 conv (pad=1, no bias) + channel LayerNorm.
# Accumulates the 9 taps as shifted (rows, Cin)@(Cin, Cout) matmuls in VMEM:
# no 9x im2col slab ever hits HBM.  Rows are the flattened padded image; the
# (W, W+2) over-computed columns are sliced away afterwards in XLA.
# ---------------------------------------------------------------------------
def _conv3x3_ln_kernel(x_ref, w_ref, g_ref, b_ref, o_ref, *, taps, L, eps):
    cout = w_ref.shape[2]
    acc = jnp.zeros((L, cout), jnp.float32)
    for t, off in enumerate(taps):
        xs = x_ref[0, off:off + L, :]                       # (L, Cin) bf16
        acc = acc + jnp.dot(xs, w_ref[t], preferred_element_type=jnp.float32)
    mu = jnp.mean(acc, axis=-1, keepdims=True)
    xc = acc - mu
    var = jnp.mean(xc * xc, axis=-1, keepdims=True)
    y = xc * lax.rsqrt(var + eps) * g_ref[...] + b_ref[...]
    o_ref[0] = y.astype(o_ref.dtype)


def conv3x3_ln(x, w, g, b, eps=1e-6, out_dtype=jnp.float32, strip=16):
    """x NHWC; torch weight (Cout, Cin, 3, 3); bias-free conv + channel LN."""
    B, H, W, Cin = x.shape
    Cout = w.shape[0]
    Hs = strip if (H > strip and H % strip == 0) else H       # row-strip tiling
    nS = H // Hs
    Wp2 = W + 2
    L = Hs * Wp2
    Lp = (Hs + 2) * Wp2 + 2

    xpad = jnp.pad(x.astype(jnp.bfloat16), ((0, 0), (1, 1), (1, 1), (0, 0)))
    strips = jnp.stack([xpad[:, i * Hs:i * Hs + Hs + 2] for i in range(nS)], axis=1)
    xs = strips.reshape(B * nS, (Hs + 2) * Wp2, Cin)
    xs = jnp.pad(xs, ((0, 0), (0, 2), (0, 0)))                # slack for the (2,2) tap

    w9 = jnp.transpose(w, (2, 3, 1, 0)).reshape(9, Cin, Cout).astype(jnp.bfloat16)
    taps = tuple(kh * Wp2 + kw for kh in range(3) for kw in range(3))

    out = pl.pallas_call(
        partial(_conv3x3_ln_kernel, taps=taps, L=L, eps=eps),
        grid=(B * nS,),
        in_specs=[pl.BlockSpec((1, Lp, Cin), lambda i: (i, 0, 0)),
                  pl.BlockSpec((9, Cin, Cout), lambda i: (0, 0, 0)),
                  pl.BlockSpec((1, Cout), lambda i: (0, 0)),
                  pl.BlockSpec((1, Cout), lambda i: (0, 0))],
        out_specs=pl.BlockSpec((1, L, Cout), lambda i: (i, 0, 0)),
        out_shape=jax.ShapeDtypeStruct((B * nS, L, Cout), out_dtype),
        compiler_params=pltpu.CompilerParams(dimension_semantics=("parallel",)),
    )(xs, w9, g.reshape(1, Cout).astype(jnp.float32),
      b.reshape(1, Cout).astype(jnp.float32))

    out = out.reshape(B, nS, Hs, Wp2, Cout)[:, :, :, :W, :]
    return out.reshape(B, H, W, Cout)


# ---------------------------------------------------------------------------
# ViT pieces (glue in JAX, compute in the kernels above)
# ---------------------------------------------------------------------------
def patch_embed(x, w, b, ps):
    """x NCHW.  Conv(k=ps, s=ps) as patch-extract + tiled Pallas matmul."""
    B, C, H, W = x.shape
    Hp, Wp = H // ps, W // ps
    xr = x.reshape(B, C, Hp, ps, Wp, ps)
    xr = jnp.transpose(xr, (0, 2, 4, 1, 3, 5)).reshape(B * Hp * Wp, C * ps * ps)
    w2 = w.reshape(w.shape[0], C * ps * ps).T         # torch OIHW -> (C*ps*ps, D)
    tok = matmul_bias(xr, w2, b, out_dtype=jnp.float32)
    return tok, (Hp, Wp)


def block_forward(tok, blk, num_heads, B, N):
    """tok: (B*N, D) f32 residual stream."""
    D = tok.shape[-1]
    hd = D // num_heads
    # fused LN -> qkv projection, bf16 output
    qkv = ln_matmul_bias(tok, blk["ln1_g"], blk["ln1_b"],
                         blk["qkv_w"].T, blk["qkv_b"], out_dtype=jnp.bfloat16)
    qkv = qkv.reshape(B, N, 3, num_heads, hd)
    qkv = jnp.transpose(qkv, (2, 0, 3, 1, 4)).reshape(3, B * num_heads, N, hd)
    o = flash_attention(qkv[0], qkv[1], qkv[2], hd ** (-0.5))
    o = o.reshape(B, num_heads, N, hd).transpose(0, 2, 1, 3).reshape(B * N, D)
    # proj with fused residual add
    tok = matmul_bias(o, blk["proj_w"].T, blk["proj_b"],
                      residual=tok, out_dtype=jnp.float32)
    # fused LN -> fc1 (+GELU), then fc2 with fused residual add
    h = ln_matmul_bias(tok, blk["ln2_g"], blk["ln2_b"],
                       blk["fc1_w"].T, blk["fc1_b"], activation="gelu",
                       out_dtype=jnp.bfloat16)
    tok = matmul_bias(h, blk["fc2_w"].T, blk["fc2_b"],
                      residual=tok, out_dtype=jnp.float32)
    return tok


# ---------------------------------------------------------------------------
# SimpleFeaturePyramid pieces (NHWC internally)
# ---------------------------------------------------------------------------
def conv_transpose2x2(x, w, b):
    """ConvTranspose2d(k=2, s=2).  x NHWC, torch weight layout (Cin, Cout, 2, 2)."""
    B, H, W, Cin = x.shape
    Cout = w.shape[1]
    w2 = jnp.transpose(w, (0, 2, 3, 1)).reshape(Cin, 4 * Cout)   # (Cin, di*dj*Cout)
    b2 = jnp.tile(b, 4)
    y = matmul_bias(x.reshape(B * H * W, Cin), w2, b2, out_dtype=jnp.bfloat16)
    y = y.reshape(B, H, W, 2, 2, Cout).transpose(0, 1, 3, 2, 4, 5)
    return y.reshape(B, 2 * H, 2 * W, Cout)


def conv1x1_ln(x, w, g, b, eps=1e-6):
    """Conv2d 1x1 (no bias) + channel LayerNorm, fused in one kernel."""
    B, H, W, Cin = x.shape
    Cout = w.shape[0]
    w2 = w.reshape(Cout, Cin).T
    y = matmul_ln_out(x.reshape(B * H * W, Cin), w2, g, b, eps=eps,
                      out_dtype=jnp.bfloat16)
    return y.reshape(B, H, W, Cout)


# ---------------------------------------------------------------------------
# Parameter initialization (deterministic, synthetic)
# ---------------------------------------------------------------------------
def init_vit_params(key, *, in_chans, patch_size, embed_dim, depth, mlp_ratio, num_pos):
    keys = iter(jax.random.split(key, 16 + depth * 8))
    nrm = lambda shape, std=0.02: std * jax.random.normal(next(keys), shape, jnp.float32)
    D = embed_dim
    Hdim = int(D * mlp_ratio)
    p = {
        "patch_w": nrm((D, in_chans, patch_size, patch_size)),   # torch conv OIHW
        "patch_b": jnp.zeros((D,), jnp.float32),
        "pos_embed": nrm((1, num_pos, D)),
        "lnp_g": jnp.ones((D,), jnp.float32),
        "lnp_b": jnp.zeros((D,), jnp.float32),
        "blocks": [],
    }
    for _ in range(depth):
        p["blocks"].append({
            "ln1_g": jnp.ones((D,), jnp.float32), "ln1_b": jnp.zeros((D,), jnp.float32),
            "qkv_w": nrm((3 * D, D)), "qkv_b": jnp.zeros((3 * D,), jnp.float32),
            "proj_w": nrm((D, D)), "proj_b": jnp.zeros((D,), jnp.float32),
            "ln2_g": jnp.ones((D,), jnp.float32), "ln2_b": jnp.zeros((D,), jnp.float32),
            "fc1_w": nrm((Hdim, D)), "fc1_b": jnp.zeros((Hdim,), jnp.float32),
            "fc2_w": nrm((D, Hdim)), "fc2_b": jnp.zeros((D,), jnp.float32),
        })
    return p


def init_sfp_params(key, embed_dim, sfp_dim, scales=SFP_SCALES):
    keys = iter(jax.random.split(key, 8 * len(scales)))
    nrm = lambda shape, std=0.02: std * jax.random.normal(next(keys), shape, jnp.float32)
    D = embed_dim
    stages = []
    for scale in scales:
        st = {}
        if scale == 4.0:
            st["deconv1_w"] = nrm((D, D // 2, 2, 2))     # torch ConvTranspose2d (in,out,kH,kW)
            st["deconv1_b"] = jnp.zeros((D // 2,), jnp.float32)
            st["ln_mid_g"] = jnp.ones((D // 2,), jnp.float32)
            st["ln_mid_b"] = jnp.zeros((D // 2,), jnp.float32)
            st["deconv2_w"] = nrm((D // 2, D // 4, 2, 2))
            st["deconv2_b"] = jnp.zeros((D // 4,), jnp.float32)
            out_dim = D // 4
        elif scale == 2.0:
            st["deconv1_w"] = nrm((D, D // 2, 2, 2))
            st["deconv1_b"] = jnp.zeros((D // 2,), jnp.float32)
            out_dim = D // 2
        else:
            out_dim = D
        st["conv1_w"] = nrm((sfp_dim, out_dim, 1, 1))    # Conv2d OIHW, bias=False
        st["ln1_g"] = jnp.ones((sfp_dim,), jnp.float32)
        st["ln1_b"] = jnp.zeros((sfp_dim,), jnp.float32)
        st["conv2_w"] = nrm((sfp_dim, sfp_dim, 3, 3))
        st["ln2_g"] = jnp.ones((sfp_dim,), jnp.float32)
        st["ln2_b"] = jnp.zeros((sfp_dim,), jnp.float32)
        stages.append(st)
    return stages


# ---------------------------------------------------------------------------
# Full forward
# ---------------------------------------------------------------------------
def vitsfp_forward(x, vit_p, sfp_stages, *, patch_size, num_heads,
                   scales=SFP_SCALES):
    B = x.shape[0]
    tok, (Hp, Wp) = patch_embed(x, vit_p["patch_w"], vit_p["patch_b"], patch_size)
    Ntok = Hp * Wp
    D = tok.shape[-1]
    # TODO(synk): bicubic resize_pos_embed when pretrain grid != feature grid;
    # here pretrain grid == feature grid so it reduces to dropping the cls token.
    pos = vit_p["pos_embed"][:, 1:, :]
    tok = (tok.reshape(B, Ntok, D) + pos).reshape(B * Ntok, D)

    for blk in vit_p["blocks"]:
        tok = block_forward(tok, blk, num_heads, B, Ntok)

    feat = layernorm(tok, vit_p["lnp_g"], vit_p["lnp_b"],
                     out_dtype=jnp.bfloat16).reshape(B, Hp, Wp, D)

    names = ["res2", "res3", "res4", "res5"]
    outs = {}
    for name, st, scale in zip(names, sfp_stages, scales):
        y = feat
        if scale == 4.0:
            y = conv_transpose2x2(y, st["deconv1_w"], st["deconv1_b"])
            Bh, Hh, Wh, Ch = y.shape
            y = layernorm(y.reshape(-1, Ch), st["ln_mid_g"], st["ln_mid_b"],
                          activation="gelu",
                          out_dtype=jnp.bfloat16).reshape(Bh, Hh, Wh, Ch)
            y = conv_transpose2x2(y, st["deconv2_w"], st["deconv2_b"])
        elif scale == 2.0:
            y = conv_transpose2x2(y, st["deconv1_w"], st["deconv1_b"])
        elif scale == 0.5:
            Bh, Hh, Wh, Ch = y.shape
            y = y.reshape(Bh, Hh // 2, 2, Wh // 2, 2, Ch).max(axis=(2, 4))
        y = conv1x1_ln(y, st["conv1_w"], st["ln1_g"], st["ln1_b"])
        y = conv3x3_ln(y, st["conv2_w"], st["ln2_g"], st["ln2_b"])
        outs[name] = jnp.transpose(y, (0, 3, 1, 2)).astype(jnp.float32)   # NCHW
    return outs


# ---------------------------------------------------------------------------
if __name__ == "__main__":
    B, in_chans = 2, 3
    img_size, patch_size = 32, 16
    embed_dim, depth, num_heads, mlp_ratio = 32, 2, 4, 4.0
    sfp_dim = 16
    pretrain_img_size = 32                      # pretrain grid == feature grid (2x2)
    num_pos = (pretrain_img_size // patch_size) ** 2 + 1   # +1 cls token

    key = jax.random.PRNGKey(0)
    kx, kvit, ksfp = jax.random.split(key, 3)
    x = jax.random.normal(kx, (B, in_chans, img_size, img_size), jnp.float32)

    vit_p = init_vit_params(kvit, in_chans=in_chans, patch_size=patch_size,
                            embed_dim=embed_dim, depth=depth,
                            mlp_ratio=mlp_ratio, num_pos=num_pos)
    sfp_p = init_sfp_params(ksfp, embed_dim, sfp_dim)

    fwd = jax.jit(partial(vitsfp_forward, patch_size=patch_size, num_heads=num_heads))
    outs = fwd(x, vit_p, sfp_p)
    jax.block_until_ready(outs)

    # sanity: expected strides 4/8/16/32 -> spatial 8/4/2/1 with sfp_dim channels
    assert outs["res2"].shape == (B, sfp_dim, 8, 8)
    assert outs["res3"].shape == (B, sfp_dim, 4, 4)
    assert outs["res4"].shape == (B, sfp_dim, 2, 2)
    assert outs["res5"].shape == (B, sfp_dim, 1, 1)
    assert all(bool(jnp.isfinite(v).all()) for v in outs.values())
    print("KERNEL_OK")
</pallas_src>

<mosaic_0001>
module attributes {stable_mosaic.version = 11 : i64} {
  func.func @_mm_kernel(%arg0: i32, %arg1: i32, %arg2: i32, %arg3: memref<8x384xbf16, #tpu.memory_space<vmem>>, %arg4: memref<384x128xbf16, #tpu.memory_space<vmem>>, %arg5: memref<1x128xf32, #tpu.memory_space<vmem>>, %arg6: memref<8x128xf32, #tpu.memory_space<vmem>>, %arg7: memref<8x128xf32, #tpu.memory_space<vmem>>) attributes {dimension_semantics = [#tpu.dimension_semantics<parallel>, #tpu.dimension_semantics<parallel>, #tpu.dimension_semantics<arbitrary>], iteration_bounds = array<i64: 1, 1, 2>, scalar_prefetch = 0 : i64, scratch_operands = 1 : i64, tpu.core_type = #tpu.core_type<tc>, window_params = [{transform_indices = @transform_0, window_bounds = array<i64: 8, 384>}, {transform_indices = @transform_1, window_bounds = array<i64: 384, 128>}, {transform_indices = @transform_2, window_bounds = array<i64: 1, 128>}, {transform_indices = @transform_3, window_bounds = array<i64: 8, 128>}]} {
    %c0_i32 = arith.constant 0 : i32
    %0 = arith.cmpi eq, %arg2, %c0_i32 : i32
    %1 = arith.extui %0 : i1 to i32
    %c0_i32_0 = arith.constant 0 : i32
    %2 = arith.cmpi ne, %1, %c0_i32_0 : i32
    scf.if %2 {
      %cst_9 = arith.constant 0.000000e+00 : f32
      %12 = vector.broadcast %cst_9 : f32 to vector<8x128xf32>
      %c0_10 = arith.constant 0 : index
      %c0_11 = arith.constant 0 : index
      %13 = vector.load %arg7[%c0_10, %c0_11] : memref<8x128xf32, #tpu.memory_space<vmem>>, vector<8x128xf32>
      tpu.vector_store %arg7[%c0_10, %c0_11], %12 {strides = array<i32>} : memref<8x128xf32, #tpu.memory_space<vmem>>, vector<8x128xf32>,
    } else {
    }
    %c0 = arith.constant 0 : index
    %c0_1 = arith.constant 0 : index
    %3 = vector.load %arg7[%c0, %c0_1] : memref<8x128xf32, #tpu.memory_space<vmem>>, vector<8x128xf32>
    %c0_2 = arith.constant 0 : index
    %c0_3 = arith.constant 0 : index
    %4 = vector.load %arg3[%c0_2, %c0_3] : memref<8x384xbf16, #tpu.memory_space<vmem>>, vector<8x384xbf16>
    %c0_4 = arith.constant 0 : index
    %c0_5 = arith.constant 0 : index
    %5 = vector.load %arg4[%c0_4, %c0_5] : memref<384x128xbf16, #tpu.memory_space<vmem>>, vector<384x128xbf16>
    %cst = arith.constant dense<0.000000e+00> : vector<8x128xf32>
    %6 = tpu.matmul %4, %5, %cst {dimension_numbers = #tpu.dot_dimension_numbers<[1], [0], [0], [1], [0, 0, 1, 1], [], []>} : vector<8x384xbf16>, vector<384x128xbf16>, vector<8x128xf32> -> vector<8x128xf32>
    %7 = arith.addf %3, %6 : vector<8x128xf32>
    %c0_6 = arith.constant 0 : index
    %c0_7 = arith.constant 0 : index
    %8 = vector.load %arg7[%c0_6, %c0_7] : memref<8x128xf32, #tpu.memory_space<vmem>>, vector<8x128xf32>
    tpu.vector_store %arg7[%c0_6, %c0_7], %7 {strides = array<i32>} : memref<8x128xf32, #tpu.memory_space<vmem>>, vector<8x128xf32>,
    %c1_i32 = arith.constant 1 : i32
    %9 = arith.cmpi eq, %arg2, %c1_i32 : i32
    %10 = arith.extui %9 : i1 to i32
    %c0_i32_8 = arith.constant 0 : i32
    %11 = arith.cmpi ne, %10, %c0_i32_8 : i32
    scf.if %11 {
      %c0_9 = arith.constant 0 : index
      %c0_10 = arith.constant 0 : index
      %12 = vector.load %arg7[%c0_9, %c0_10] : memref<8x128xf32, #tpu.memory_space<vmem>>, vector<8x128xf32>
      %c0_11 = arith.constant 0 : index
      %c0_12 = arith.constant 0 : index
      %13 = vector.load %arg5[%c0_11, %c0_12] : memref<1x128xf32, #tpu.memory_space<vmem>>, vector<1x128xf32>
      %14 = vector.broadcast %13 : vector<1x128xf32> to vector<8x128xf32>
      %15 = arith.addf %12, %14 : vector<8x128xf32>
      %c0_13 = arith.constant 0 : index
      %c0_14 = arith.constant 0 : index
      %16 = vector.load %arg6[%c0_13, %c0_14] : memref<8x128xf32, #tpu.memory_space<vmem>>, vector<8x128xf32>
      tpu.vector_store %arg6[%c0_13, %c0_14], %15 {strides = array<i32>} : memref<8x128xf32, #tpu.memory_space<vmem>>, vector<8x128xf32>,
    } else {
    }
    return
  }
  func.func @transform_0(%arg0: i32, %arg1: i32, %arg2: i32) -> (i32, i32) {
    %c0_i32 = arith.constant 0 : i32
    return %arg0, %arg2 : i32, i32
  }
  func.func @transform_1(%arg0: i32, %arg1: i32, %arg2: i32) -> (i32, i32) {
    %c0_i32 = arith.constant 0 : i32
    return %arg2, %arg1 : i32, i32
  }
  func.func @transform_2(%arg0: i32, %arg1: i32, %arg2: i32) -> (i32, i32) {
    %c0_i32 = arith.constant 0 : i32
    %c0_i32_0 = arith.constant 0 : i32
    return %c0_i32, %arg1 : i32, i32
  }
  func.func @transform_3(%arg0: i32, %arg1: i32, %arg2: i32) -> (i32, i32) {
    %c0_i32 = arith.constant 0 : i32
    return %arg0, %arg1 : i32, i32
  }
}

module attributes {stable_mosaic.version = 11 : i64} {
  func.func @_ln_mm_kernel(%arg0: i32, %arg1: i32, %arg2: memref<8x32xf32, #tpu.memory_space<vmem>>, %arg3: memref<1x32xf32, #tpu.memory_space<vmem>>, %arg4: memref<1x32xf32, #tpu.memory_space<vmem>>, %arg5: memref<32x128xbf16, #tpu.memory_space<vmem>>, %arg6: memref<1x128xf32, #tpu.memory_space<vmem>>, %arg7: memref<8x128xbf16, #tpu.memory_space<vmem>>) attributes {dimension_semantics = [#tpu.dimension_semantics<parallel>, #tpu.dimension_semantics<parallel>], iteration_bounds = array<i64: 1, 1>, scalar_prefetch = 0 : i64, scratch_operands = 0 : i64, tpu.core_type = #tpu.core_type<tc>, window_params = [{transform_indices = @transform_0, window_bounds = array<i64: 8, 32>}, {pipeline_mode = #tpu.pipeline_mode<synchronous>, transform_indices = @transform_1, window_bounds = array<i64: 1, 32>}, {pipeline_mode = #tpu.pipeline_mode<synchronous>, transform_indices = @transform_2, window_bounds = array<i64: 1, 32>}, {transform_indices = @transform_3, window_bounds = array<i64: 32, 128>}, {transform_indices = @transform_4, window_bounds = array<i64: 1, 128>}, {transform_indices = @transform_5, window_bounds = array<i64: 8, 128>}]} {
    %c0 = arith.constant 0 : index
    %c0_0 = arith.constant 0 : index
    %0 = vector.load %arg2[%c0, %c0_0] : memref<8x32xf32, #tpu.memory_space<vmem>>, vector<8x32xf32>
    %cst = arith.constant dense<0.000000e+00> : vector<8xf32>
    %1 = vector.multi_reduction <add>, %0, %cst [1] : vector<8x32xf32> to vector<8xf32>
    %2 = vector.shape_cast %1 : vector<8xf32> to vector<8x1xf32>
    %cst_1 = arith.constant 3.200000e+01 : f32
    %3 = vector.broadcast %cst_1 : f32 to vector<8x1xf32>
    %4 = arith.divf %2, %3 : vector<8x1xf32>
    %5 = vector.broadcast %4 : vector<8x1xf32> to vector<8x32xf32>
    %6 = arith.subf %0, %5 : vector<8x32xf32>
    %7 = arith.mulf %6, %6 : vector<8x32xf32>
    %cst_2 = arith.constant dense<0.000000e+00> : vector<8xf32>
    %8 = vector.multi_reduction <add>, %7, %cst_2 [1] : vector<8x32xf32> to vector<8xf32>
    %9 = vector.shape_cast %8 : vector<8xf32> to vector<8x1xf32>
    %cst_3 = arith.constant 3.200000e+01 : f32
    %10 = vector.broadcast %cst_3 : f32 to vector<8x1xf32>
    %11 = arith.divf %9, %10 : vector<8x1xf32>
    %cst_4 = arith.constant 9.99999997E-7 : f32
    %12 = vector.broadcast %cst_4 : f32 to vector<8x1xf32>
    %13 = arith.addf %11, %12 : vector<8x1xf32>
    %14 = math.rsqrt %13 : vector<8x1xf32>
    %15 = vector.broadcast %14 : vector<8x1xf32> to vector<8x32xf32>
    %16 = arith.mulf %6, %15 : vector<8x32xf32>
    %c0_5 = arith.constant 0 : index
    %c0_6 = arith.constant 0 : index
    %17 = vector.load %arg3[%c0_5, %c0_6] : memref<1x32xf32, #tpu.memory_space<vmem>>, vector<1x32xf32>
    %18 = vector.broadcast %17 : vector<1x32xf32> to vector<8x32xf32>
    %19 = arith.mulf %16, %18 : vector<8x32xf32>
    %c0_7 = arith.constant 0 : index
    %c0_8 = arith.constant 0 : index
    %20 = vector.load %arg4[%c0_7, %c0_8] : memref<1x32xf32, #tpu.memory_space<vmem>>, vector<1x32xf32>
    %21 = vector.broadcast %20 : vector<1x32xf32> to vector<8x32xf32>
    %22 = arith.addf %19, %21 : vector<8x32xf32>
    %23 = arith.truncf %22 : vector<8x32xf32> to vector<8x32xbf16>
    %c0_9 = arith.constant 0 : index
    %c0_10 = arith.constant 0 : index
    %24 = vector.load %arg5[%c0_9, %c0_10] : memref<32x128xbf16, #tpu.memory_space<vmem>>, vector<32x128xbf16>
    %cst_11 = arith.constant dense<0.000000e+00> : vector<8x128xf32>
    %25 = tpu.matmul %23, %24, %cst_11 {dimension_numbers = #tpu.dot_dimension_numbers<[1], [0], [0], [1], [0, 0, 1, 1], [], []>} : vector<8x32xbf16>, vector<32x128xbf16>, vector<8x128xf32> -> vector<8x128xf32>
    %c0_12 = arith.constant 0 : index
    %c0_13 = arith.constant 0 : index
    %26 = vector.load %arg6[%c0_12, %c0_13] : memref<1x128xf32, #tpu.memory_space<vmem>>, vector<1x128xf32>
    %27 = vector.broadcast %26 : vector<1x128xf32> to vector<8x128xf32>
    %28 = arith.addf %25, %27 : vector<8x128xf32>
    %29 = arith.truncf %28 : vector<8x128xf32> to vector<8x128xbf16>
    %c0_14 = arith.constant 0 : index
    %c0_15 = arith.constant 0 : index
    %30 = vector.load %arg7[%c0_14, %c0_15] : memref<8x128xbf16, #tpu.memory_space<vmem>>, vector<8x128xbf16>
    tpu.vector_store %arg7[%c0_14, %c0_15], %29 {strides = array<i32>} : memref<8x128xbf16, #tpu.memory_space<vmem>>, vector<8x128xbf16>,
    return
  }
  func.func @transform_0(%arg0: i32, %arg1: i32) -> (i32, i32) {
    %c0_i32 = arith.constant 0 : i32
    %c0_i32_0 = arith.constant 0 : i32
    return %arg0, %c0_i32 : i32, i32
  }
  func.func @transform_1(%arg0: i32, %arg1: i32) -> (i32, i32) {
    %c0_i32 = arith.constant 0 : i32
    %c0_i32_0 = arith.constant 0 : i32
    %c0_i32_1 = arith.constant 0 : i32
    return %c0_i32, %c0_i32_0 : i32, i32
  }
  func.func @transform_2(%arg0: i32, %arg1: i32) -> (i32, i32) {
    %c0_i32 = arith.constant 0 : i32
    %c0_i32_0 = arith.constant 0 : i32
    %c0_i32_1 = arith.constant 0 : i32
    return %c0_i32, %c0_i32_0 : i32, i32
  }
  func.func @transform_3(%arg0: i32, %arg1: i32) -> (i32, i32) {
    %c0_i32 = arith.constant 0 : i32
    %c0_i32_0 = arith.constant 0 : i32
    return %c0_i32, %arg1 : i32, i32
  }
  func.func @transform_4(%arg0: i32, %arg1: i32) -> (i32, i32) {
    %c0_i32 = arith.constant 0 : i32
    %c0_i32_0 = arith.constant 0 : i32
    return %c0_i32, %arg1 : i32, i32
  }
  func.func @transform_5(%arg0: i32, %arg1: i32) -> (i32, i32) {
    %c0_i32 = arith.constant 0 : i32
    return %arg0, %arg1 : i32, i32
  }
}

module attributes {stable_mosaic.version = 11 : i64} {
  func.func @_flash_attn_kernel(%arg0: i32, %arg1: i32, %arg2: i32, %arg3: memref<1x4x8xbf16, #tpu.memory_space<vmem>>, %arg4: memref<1x4x8xbf16, #tpu.memory_space<vmem>>, %arg5: memref<1x4x8xbf16, #tpu.memory_space<vmem>>, %arg6: memref<1x4x8xbf16, #tpu.memory_space<vmem>>, %arg7: memref<4x1xf32, #tpu.memory_space<vmem>>, %arg8: memref<4x1xf32, #tpu.memory_space<vmem>>, %arg9: memref<4x8xf32, #tpu.memory_space<vmem>>) attributes {dimension_semantics = [#tpu.dimension_semantics<parallel>, #tpu.dimension_semantics<parallel>, #tpu.dimension_semantics<arbitrary>], iteration_bounds = array<i64: 8, 1, 1>, scalar_prefetch = 0 : i64, scratch_operands = 3 : i64, tpu.core_type = #tpu.core_type<tc>, window_params = [{transform_indices = @transform_0, window_bounds = array<i64: 1, 4, 8>}, {transform_indices = @transform_1, window_bounds = array<i64: 1, 4, 8>}, {transform_indices = @transform_2, window_bounds = array<i64: 1, 4, 8>}, {transform_indices = @transform_3, window_bounds = array<i64: 1, 4, 8>}]} {
    %c0_i32 = arith.constant 0 : i32
    %0 = arith.cmpi eq, %arg2, %c0_i32 : i32
    %1 = arith.extui %0 : i1 to i32
    %c0_i32_0 = arith.constant 0 : i32
    %2 = arith.cmpi ne, %1, %c0_i32_0 : i32
    scf.if %2 {
      %cst_27 = arith.constant 0xFF800000 : f32
      %38 = vector.broadcast %cst_27 : f32 to vector<4x1xf32>
      %c0_28 = arith.constant 0 : index
      %c0_29 = arith.constant 0 : index
      %39 = vector.load %arg7[%c0_28, %c0_29] : memref<4x1xf32, #tpu.memory_space<vmem>>, vector<4x1xf32>
      tpu.vector_store %arg7[%c0_28, %c0_29], %38 {strides = array<i32>} : memref<4x1xf32, #tpu.memory_space<vmem>>, vector<4x1xf32>,
      %cst_30 = arith.constant 0.000000e+00 : f32
      %40 = vector.broadcast %cst_30 : f32 to vector<4x1xf32>
      %c0_31 = arith.constant 0 : index
      %c0_32 = arith.constant 0 : index
      %41 = vector.load %arg8[%c0_31, %c0_32] : memref<4x1xf32, #tpu.memory_space<vmem>>, vector<4x1xf32>
      tpu.vector_store %arg8[%c0_31, %c0_32], %40 {strides = array<i32>} : memref<4x1xf32, #tpu.memory_space<vmem>>, vector<4x1xf32>,
      %cst_33 = arith.constant 0.000000e+00 : f32
      %42 = vector.broadcast %cst_33 : f32 to vector<4x8xf32>
      %c0_34 = arith.constant 0 : index
      %c0_35 = arith.constant 0 : index
      %43 = vector.load %arg9[%c0_34, %c0_35] : memref<4x8xf32, #tpu.memory_space<vmem>>, vector<4x8xf32>
      tpu.vector_store %arg9[%c0_34, %c0_35], %42 {strides = array<i32>} : memref<4x8xf32, #tpu.memory_space<vmem>>, vector<4x8xf32>,
    } else {
    }
    %c0 = arith.constant 0 : index
    %c0_1 = arith.constant 0 : index
    %c0_2 = arith.constant 0 : index
    %3 = vector.load %arg3[%c0, %c0_1, %c0_2] : memref<1x4x8xbf16, #tpu.memory_space<vmem>>, vector<1x4x8xbf16>
    %4 = vector.shape_cast %3 : vector<1x4x8xbf16> to vector<4x8xbf16>
    %c0_3 = arith.constant 0 : index
    %c0_4 = arith.constant 0 : index
    %c0_5 = arith.constant 0 : index
    %5 = vector.load %arg4[%c0_3, %c0_4, %c0_5] : memref<1x4x8xbf16, #tpu.memory_space<vmem>>, vector<1x4x8xbf16>
    %6 = vector.shape_cast %5 : vector<1x4x8xbf16> to vector<4x8xbf16>
    %cst = arith.constant dense<0.000000e+00> : vector<4x4xf32>
    %7 = tpu.matmul %4, %6, %cst {dimension_numbers = #tpu.dot_dimension_numbers<[1], [1], [0], [0], [0, 0, 1, 0], [], []>} : vector<4x8xbf16>, vector<4x8xbf16>, vector<4x4xf32> -> vector<4x4xf32>
    %cst_6 = arith.constant 0.353553385 : f32
    %8 = vector.broadcast %cst_6 : f32 to vector<4x4xf32>
    %9 = arith.mulf %7, %8 : vector<4x4xf32>
    %c0_7 = arith.constant 0 : index
    %c0_8 = arith.constant 0 : index
    %10 = vector.load %arg7[%c0_7, %c0_8] : memref<4x1xf32, #tpu.memory_space<vmem>>, vector<4x1xf32>
    %cst_9 = arith.constant dense<0xFF800000> : vector<4xf32>
    %11 = vector.multi_reduction <maximumf>, %9, %cst_9 [1] : vector<4x4xf32> to vector<4xf32>
    %12 = vector.shape_cast %11 : vector<4xf32> to vector<4x1xf32>
    %13 = arith.maximumf %10, %12 : vector<4x1xf32>
    %14 = arith.subf %10, %13 : vector<4x1xf32>
    %15 = math.exp %14 : vector<4x1xf32>
    %16 = vector.broadcast %13 : vector<4x1xf32> to vector<4x4xf32>
    %17 = arith.subf %9, %16 : vector<4x4xf32>
    %18 = math.exp %17 : vector<4x4xf32>
    %c0_10 = arith.constant 0 : index
    %c0_11 = arith.constant 0 : index
    %19 = vector.load %arg8[%c0_10, %c0_11] : memref<4x1xf32, #tpu.memory_space<vmem>>, vector<4x1xf32>
    %20 = arith.mulf %15, %19 : vector<4x1xf32>
    %cst_12 = arith.constant dense<0.000000e+00> : vector<4xf32>
    %21 = vector.multi_reduction <add>, %18, %cst_12 [1] : vector<4x4xf32> to vector<4xf32>
    %22 = vector.shape_cast %21 : vector<4xf32> to vector<4x1xf32>
    %23 = arith.addf %20, %22 : vector<4x1xf32>
    %c0_13 = arith.constant 0 : index
    %c0_14 = arith.constant 0 : index
    %24 = vector.load %arg8[%c0_13, %c0_14] : memref<4x1xf32, #tpu.memory_space<vmem>>, vector<4x1xf32>
    tpu.vector_store %arg8[%c0_13, %c0_14], %23 {strides = array<i32>} : memref<4x1xf32, #tpu.memory_space<vmem>>, vector<4x1xf32>,
    %c0_15 = arith.constant 0 : index
    %c0_16 = arith.constant 0 : index
    %25 = vector.load %arg9[%c0_15, %c0_16] : memref<4x8xf32, #tpu.memory_space<vmem>>, vector<4x8xf32>
    %26 = vector.broadcast %15 : vector<4x1xf32> to vector<4x8xf32>
    %27 = arith.mulf %26, %25 : vector<4x8xf32>
    %28 = arith.truncf %18 : vector<4x4xf32> to vector<4x4xbf16>
    %c0_17 = arith.constant 0 : index
    %c0_18 = arith.constant 0 : index
    %c0_19 = arith.constant 0 : index
    %29 = vector.load %arg5[%c0_17, %c0_18, %c0_19] : memref<1x4x8xbf16, #tpu.memory_space<vmem>>, vector<1x4x8xbf16>
    %30 = vector.shape_cast %29 : vector<1x4x8xbf16> to vector<4x8xbf16>
    %cst_20 = arith.constant dense<0.000000e+00> : vector<4x8xf32>
    %31 = tpu.matmul %28, %30, %cst_20 {dimension_numbers = #tpu.dot_dimension_numbers<[1], [0], [0], [1], [0, 0, 1, 1], [], []>} : vector<4x4xbf16>, vector<4x8xbf16>, vector<4x8xf32> -> vector<4x8xf32>
    %32 = arith.addf %27, %31 : vector<4x8xf32>
    %c0_21 = arith.constant 0 : index
    %c0_22 = arith.constant 0 : index
    %33 = vector.load %arg9[%c0_21, %c0_22] : memref<4x8xf32, #tpu.memory_space<vmem>>, vector<4x8xf32>
    tpu.vector_store %arg9[%c0_21, %c0_22], %32 {strides = array<i32>} : memref<4x8xf32, #tpu.memory_space<vmem>>, vector<4x8xf32>,
    %c0_23 = arith.constant 0 : index
    %c0_24 = arith.constant 0 : index
    %34 = vector.load %arg7[%c0_23, %c0_24] : memref<4x1xf32, #tpu.memory_space<vmem>>, vector<4x1xf32>
    tpu.vector_store %arg7[%c0_23, %c0_24], %13 {strides = array<i32>} : memref<4x1xf32, #tpu.memory_space<vmem>>, vector<4x1xf32>,
    %c0_i32_25 = arith.constant 0 : i32
    %35 = arith.cmpi eq, %arg2, %c0_i32_25 : i32
    %36 = arith.extui %35 : i1 to i32
    %c0_i32_26 = arith.constant 0 : i32
    %37 = arith.cmpi ne, %36, %c0_i32_26 : i32
    scf.if %37 {
      %c0_27 = arith.constant 0 : index
      %c0_28 = arith.constant 0 : index
      %38 = vector.load %arg9[%c0_27, %c0_28] : memref<4x8xf32, #tpu.memory_space<vmem>>, vector<4x8xf32>
      %c0_29 = arith.constant 0 : index
      %c0_30 = arith.constant 0 : index
      %39 = vector.load %arg8[%c0_29, %c0_30] : memref<4x1xf32, #tpu.memory_space<vmem>>, vector<4x1xf32>
      %40 = tpu.reciprocal %39 {approx = true} : vector<4x1xf32> -> vector<4x1xf32>
      %41 = vector.broadcast %40 : vector<4x1xf32> to vector<4x8xf32>
      %42 = arith.mulf %38, %41 : vector<4x8xf32>
      %43 = arith.truncf %42 : vector<4x8xf32> to vector<4x8xbf16>
      %c0_31 = arith.constant 0 : index
      %c0_32 = arith.constant 0 : index
      %c0_33 = arith.constant 0 : index
      %44 = vector.load %arg6[%c0_31, %c0_32, %c0_33] : memref<1x4x8xbf16, #tpu.memory_space<vmem>>, vector<1x4x8xbf16>
      %45 = vector.shape_cast %44 : vector<1x4x8xbf16> to vector<4x8xbf16>
      %46 = vector.shape_cast %43 : vector<4x8xbf16> to vector<1x4x8xbf16>
      tpu.vector_store %arg6[%c0_31, %c0_32, %c0_33], %46 {strides = array<i32>} : memref<1x4x8xbf16, #tpu.memory_space<vmem>>, vector<1x4x8xbf16>,
    } else {
    }
    return
  }
  func.func @transform_0(%arg0: i32, %arg1: i32, %arg2: i32) -> (i32, i32, i32) {
    %c0_i32 = arith.constant 0 : i32
    %c0_i32_0 = arith.constant 0 : i32
    return %arg0, %arg1, %c0_i32 : i32, i32, i32
  }
  func.func @transform_1(%arg0: i32, %arg1: i32, %arg2: i32) -> (i32, i32, i32) {
    %c0_i32 = arith.constant 0 : i32
    %c0_i32_0 = arith.constant 0 : i32
    return %arg0, %arg2, %c0_i32 : i32, i32, i32
  }
  func.func @transform_2(%arg0: i32, %arg1: i32, %arg2: i32) -> (i32, i32, i32) {
    %c0_i32 = arith.constant 0 : i32
    %c0_i32_0 = arith.constant 0 : i32
    return %arg0, %arg2, %c0_i32 : i32, i32, i32
  }
  func.func @transform_3(%arg0: i32, %arg1: i32, %arg2: i32) -> (i32, i32, i32) {
    %c0_i32 = arith.constant 0 : i32
    %c0_i32_0 = arith.constant 0 : i32
    return %arg0, %arg1, %c0_i32 : i32, i32, i32
  }
}

module attributes {stable_mosaic.version = 11 : i64} {
  func.func @_mm_kernel(%arg0: i32, %arg1: i32, %arg2: i32, %arg3: memref<8x128xbf16, #tpu.memory_space<vmem>>, %arg4: memref<128x128xbf16, #tpu.memory_space<vmem>>, %arg5: memref<1x128xf32, #tpu.memory_space<vmem>>, %arg6: memref<8x128xf32, #tpu.memory_space<vmem>>, %arg7: memref<8x128xf32, #tpu.memory_space<vmem>>, %arg8: memref<8x128xf32, #tpu.memory_space<vmem>>) attributes {dimension_semantics = [#tpu.dimension_semantics<parallel>, #tpu.dimension_semantics<parallel>, #tpu.dimension_semantics<arbitrary>], iteration_bounds = array<i64: 1, 1, 1>, scalar_prefetch = 0 : i64, scratch_operands = 1 : i64, tpu.core_type = #tpu.core_type<tc>, window_params = [{transform_indices = @transform_0, window_bounds = array<i64: 8, 128>}, {transform_indices = @transform_1, window_bounds = array<i64: 128, 128>}, {transform_indices = @transform_2, window_bounds = array<i64: 1, 128>}, {transform_indices = @transform_3, window_bounds = array<i64: 8, 128>}, {transform_indices = @transform_4, window_bounds = array<i64: 8, 128>}]} {
    %c0_i32 = arith.constant 0 : i32
    %0 = arith.cmpi eq, %arg2, %c0_i32 : i32
    %1 = arith.extui %0 : i1 to i32
    %c0_i32_0 = arith.constant 0 : i32
    %2 = arith.cmpi ne, %1, %c0_i32_0 : i32
    scf.if %2 {
      %cst_10 = arith.constant 0.000000e+00 : f32
      %12 = vector.broadcast %cst_10 : f32 to vector<8x128xf32>
      %c0_11 = arith.constant 0 : index
      %c0_12 = arith.constant 0 : index
      %13 = vector.load %arg8[%c0_11, %c0_12] : memref<8x128xf32, #tpu.memory_space<vmem>>, vector<8x128xf32>
      tpu.vector_store %arg8[%c0_11, %c0_12], %12 {strides = array<i32>} : memref<8x128xf32, #tpu.memory_space<vmem>>, vector<8x128xf32>,
    } else {
    }
    %c0 = arith.constant 0 : index
    %c0_1 = arith.constant 0 : index
    %3 = vector.load %arg8[%c0, %c0_1] : memref<8x128xf32, #tpu.memory_space<vmem>>, vector<8x128xf32>
    %c0_2 = arith.constant 0 : index
    %c0_3 = arith.constant 0 : index
    %4 = vector.load %arg3[%c0_2, %c0_3] : memref<8x128xbf16, #tpu.memory_space<vmem>>, vector<8x128xbf16>
    %c0_4 = arith.constant 0 : index
    %c0_5 = arith.constant 0 : index
    %5 = vector.load %arg4[%c0_4, %c0_5] : memref<128x128xbf16, #tpu.memory_space<vmem>>, vector<128x128xbf16>
    %cst = arith.constant dense<0.000000e+00> : vector<8x128xf32>
    %6 = tpu.matmul %4, %5, %cst {dimension_numbers = #tpu.dot_dimension_numbers<[1], [0], [0], [1], [0, 0, 1, 1], [], []>} : vector<8x128xbf16>, vector<128x128xbf16>, vector<8x128xf32> -> vector<8x128xf32>
    %7 = arith.addf %3, %6 : vector<8x128xf32>
    %c0_6 = arith.constant 0 : index
    %c0_7 = arith.constant 0 : index
    %8 = vector.load %arg8[%c0_6, %c0_7] : memref<8x128xf32, #tpu.memory_space<vmem>>, vector<8x128xf32>
    tpu.vector_store %arg8[%c0_6, %c0_7], %7 {strides = array<i32>} : memref<8x128xf32, #tpu.memory_space<vmem>>, vector<8x128xf32>,
    %c0_i32_8 = arith.constant 0 : i32
    %9 = arith.cmpi eq, %arg2, %c0_i32_8 : i32
    %10 = arith.extui %9 : i1 to i32
    %c0_i32_9 = arith.constant 0 : i32
    %11 = arith.cmpi ne, %10, %c0_i32_9 : i32
    scf.if %11 {
      %c0_10 = arith.constant 0 : index
      %c0_11 = arith.constant 0 : index
      %12 = vector.load %arg8[%c0_10, %c0_11] : memref<8x128xf32, #tpu.memory_space<vmem>>, vector<8x128xf32>
      %c0_12 = arith.constant 0 : index
      %c0_13 = arith.constant 0 : index
      %13 = vector.load %arg5[%c0_12, %c0_13] : memref<1x128xf32, #tpu.memory_space<vmem>>, vector<1x128xf32>
      %14 = vector.broadcast %13 : vector<1x128xf32> to vector<8x128xf32>
      %15 = arith.addf %12, %14 : vector<8x128xf32>
      %c0_14 = arith.constant 0 : index
      %c0_15 = arith.constant 0 : index
      %16 = vector.load %arg6[%c0_14, %c0_15] : memref<8x128xf32, #tpu.memory_space<vmem>>, vector<8x128xf32>
      %17 = arith.addf %15, %16 : vector<8x128xf32>
      %c0_16 = arith.constant 0 : index
      %c0_17 = arith.constant 0 : index
      %18 = vector.load %arg7[%c0_16, %c0_17] : memref<8x128xf32, #tpu.memory_space<vmem>>, vector<8x128xf32>
      tpu.vector_store %arg7[%c0_16, %c0_17], %17 {strides = array<i32>} : memref<8x128xf32, #tpu.memory_space<vmem>>, vector<8x128xf32>,
    } else {
    }
    return
  }
  func.func @transform_0(%arg0: i32, %arg1: i32, %arg2: i32) -> (i32, i32) {
    %c0_i32 = arith.constant 0 : i32
    return %arg0, %arg2 : i32, i32
  }
  func.func @transform_1(%arg0: i32, %arg1: i32, %arg2: i32) -> (i32, i32) {
    %c0_i32 = arith.constant 0 : i32
    return %arg2, %arg1 : i32, i32
  }
  func.func @transform_2(%arg0: i32, %arg1: i32, %arg2: i32) -> (i32, i32) {
    %c0_i32 = arith.constant 0 : i32
    %c0_i32_0 = arith.constant 0 : i32
    return %c0_i32, %arg1 : i32, i32
  }
  func.func @transform_3(%arg0: i32, %arg1: i32, %arg2: i32) -> (i32, i32) {
    %c0_i32 = arith.constant 0 : i32
    return %arg0, %arg1 : i32, i32
  }
  func.func @transform_4(%arg0: i32, %arg1: i32, %arg2: i32) -> (i32, i32) {
    %c0_i32 = arith.constant 0 : i32
    return %arg0, %arg1 : i32, i32
  }
}

module attributes {stable_mosaic.version = 11 : i64} {
  func.func @_ln_mm_kernel(%arg0: i32, %arg1: i32, %arg2: memref<8x32xf32, #tpu.memory_space<vmem>>, %arg3: memref<1x32xf32, #tpu.memory_space<vmem>>, %arg4: memref<1x32xf32, #tpu.memory_space<vmem>>, %arg5: memref<32x128xbf16, #tpu.memory_space<vmem>>, %arg6: memref<1x128xf32, #tpu.memory_space<vmem>>, %arg7: memref<8x128xbf16, #tpu.memory_space<vmem>>) attributes {dimension_semantics = [#tpu.dimension_semantics<parallel>, #tpu.dimension_semantics<parallel>], iteration_bounds = array<i64: 1, 1>, scalar_prefetch = 0 : i64, scratch_operands = 0 : i64, tpu.core_type = #tpu.core_type<tc>, window_params = [{transform_indices = @transform_0, window_bounds = array<i64: 8, 32>}, {pipeline_mode = #tpu.pipeline_mode<synchronous>, transform_indices = @transform_1, window_bounds = array<i64: 1, 32>}, {pipeline_mode = #tpu.pipeline_mode<synchronous>, transform_indices = @transform_2, window_bounds = array<i64: 1, 32>}, {transform_indices = @transform_3, window_bounds = array<i64: 32, 128>}, {transform_indices = @transform_4, window_bounds = array<i64: 1, 128>}, {transform_indices = @transform_5, window_bounds = array<i64: 8, 128>}]} {
    %c0 = arith.constant 0 : index
    %c0_0 = arith.constant 0 : index
    %0 = vector.load %arg2[%c0, %c0_0] : memref<8x32xf32, #tpu.memory_space<vmem>>, vector<8x32xf32>
    %cst = arith.constant dense<0.000000e+00> : vector<8xf32>
    %1 = vector.multi_reduction <add>, %0, %cst [1] : vector<8x32xf32> to vector<8xf32>
    %2 = vector.shape_cast %1 : vector<8xf32> to vector<8x1xf32>
    %cst_1 = arith.constant 3.200000e+01 : f32
    %3 = vector.broadcast %cst_1 : f32 to vector<8x1xf32>
    %4 = arith.divf %2, %3 : vector<8x1xf32>
    %5 = vector.broadcast %4 : vector<8x1xf32> to vector<8x32xf32>
    %6 = arith.subf %0, %5 : vector<8x32xf32>
    %7 = arith.mulf %6, %6 : vector<8x32xf32>
    %cst_2 = arith.constant dense<0.000000e+00> : vector<8xf32>
    %8 = vector.multi_reduction <add>, %7, %cst_2 [1] : vector<8x32xf32> to vector<8xf32>
    %9 = vector.shape_cast %8 : vector<8xf32> to vector<8x1xf32>
    %cst_3 = arith.constant 3.200000e+01 : f32
    %10 = vector.broadcast %cst_3 : f32 to vector<8x1xf32>
    %11 = arith.divf %9, %10 : vector<8x1xf32>
    %cst_4 = arith.constant 9.99999997E-7 : f32
    %12 = vector.broadcast %cst_4 : f32 to vector<8x1xf32>
    %13 = arith.addf %11, %12 : vector<8x1xf32>
    %14 = math.rsqrt %13 : vector<8x1xf32>
    %15 = vector.broadcast %14 : vector<8x1xf32> to vector<8x32xf32>
    %16 = arith.mulf %6, %15 : vector<8x32xf32>
    %c0_5 = arith.constant 0 : index
    %c0_6 = arith.constant 0 : index
    %17 = vector.load %arg3[%c0_5, %c0_6] : memref<1x32xf32, #tpu.memory_space<vmem>>, vector<1x32xf32>
    %18 = vector.broadcast %17 : vector<1x32xf32> to vector<8x32xf32>
    %19 = arith.mulf %16, %18 : vector<8x32xf32>
    %c0_7 = arith.constant 0 : index
    %c0_8 = arith.constant 0 : index
    %20 = vector.load %arg4[%c0_7, %c0_8] : memref<1x32xf32, #tpu.memory_space<vmem>>, vector<1x32xf32>
    %21 = vector.broadcast %20 : vector<1x32xf32> to vector<8x32xf32>
    %22 = arith.addf %19, %21 : vector<8x32xf32>
    %23 = arith.truncf %22 : vector<8x32xf32> to vector<8x32xbf16>
    %c0_9 = arith.constant 0 : index
    %c0_10 = arith.constant 0 : index
    %24 = vector.load %arg5[%c0_9, %c0_10] : memref<32x128xbf16, #tpu.memory_space<vmem>>, vector<32x128xbf16>
    %cst_11 = arith.constant dense<0.000000e+00> : vector<8x128xf32>
    %25 = tpu.matmul %23, %24, %cst_11 {dimension_numbers = #tpu.dot_dimension_numbers<[1], [0], [0], [1], [0, 0, 1, 1], [], []>} : vector<8x32xbf16>, vector<32x128xbf16>, vector<8x128xf32> -> vector<8x128xf32>
    %c0_12 = arith.constant 0 : index
    %c0_13 = arith.constant 0 : index
    %26 = vector.load %arg6[%c0_12, %c0_13] : memref<1x128xf32, #tpu.memory_space<vmem>>, vector<1x128xf32>
    %27 = vector.broadcast %26 : vector<1x128xf32> to vector<8x128xf32>
    %28 = arith.addf %25, %27 : vector<8x128xf32>
    %cst_14 = arith.constant 5.000000e-01 : f32
    %29 = vector.broadcast %cst_14 : f32 to vector<8x128xf32>
    %30 = arith.mulf %29, %28 : vector<8x128xf32>
    %cst_15 = arith.constant 0.707106769 : f32
    %31 = vector.broadcast %cst_15 : f32 to vector<8x128xf32>
    %32 = arith.mulf %28, %31 : vector<8x128xf32>
    %33 = math.erf %32 : vector<8x128xf32>
    %cst_16 = arith.constant 1.000000e+00 : f32
    %34 = vector.broadcast %cst_16 : f32 to vector<8x128xf32>
    %35 = arith.addf %34, %33 : vector<8x128xf32>
    %36 = arith.mulf %30, %35 : vector<8x128xf32>
    %37 = arith.truncf %36 : vector<8x128xf32> to vector<8x128xbf16>
    %c0_17 = arith.constant 0 : index
    %c0_18 = arith.constant 0 : index
    %38 = vector.load %arg7[%c0_17, %c0_18] : memref<8x128xbf16, #tpu.memory_space<vmem>>, vector<8x128xbf16>
    tpu.vector_store %arg7[%c0_17, %c0_18], %37 {strides = array<i32>} : memref<8x128xbf16, #tpu.memory_space<vmem>>, vector<8x128xbf16>,
    return
  }
  func.func @transform_0(%arg0: i32, %arg1: i32) -> (i32, i32) {
    %c0_i32 = arith.constant 0 : i32
    %c0_i32_0 = arith.constant 0 : i32
    return %arg0, %c0_i32 : i32, i32
  }
  func.func @transform_1(%arg0: i32, %arg1: i32) -> (i32, i32) {
    %c0_i32 = arith.constant 0 : i32
    %c0_i32_0 = arith.constant 0 : i32
    %c0_i32_1 = arith.constant 0 : i32
    return %c0_i32, %c0_i32_0 : i32, i32
  }
  func.func @transform_2(%arg0: i32, %arg1: i32) -> (i32, i32) {
    %c0_i32 = arith.constant 0 : i32
    %c0_i32_0 = arith.constant 0 : i32
    %c0_i32_1 = arith.constant 0 : i32
    return %c0_i32, %c0_i32_0 : i32, i32
  }
  func.func @transform_3(%arg0: i32, %arg1: i32) -> (i32, i32) {
    %c0_i32 = arith.constant 0 : i32
    %c0_i32_0 = arith.constant 0 : i32
    return %c0_i32, %arg1 : i32, i32
  }
  func.func @transform_4(%arg0: i32, %arg1: i32) -> (i32, i32) {
    %c0_i32 = arith.constant 0 : i32
    %c0_i32_0 = arith.constant 0 : i32
    return %c0_i32, %arg1 : i32, i32
  }
  func.func @transform_5(%arg0: i32, %arg1: i32) -> (i32, i32) {
    %c0_i32 = arith.constant 0 : i32
    return %arg0, %arg1 : i32, i32
  }
}

module attributes {stable_mosaic.version = 11 : i64} {
  func.func @_ln_kernel(%arg0: i32, %arg1: memref<8x32xf32, #tpu.memory_space<vmem>>, %arg2: memref<1x32xf32, #tpu.memory_space<vmem>>, %arg3: memref<1x32xf32, #tpu.memory_space<vmem>>, %arg4: memref<8x32xbf16, #tpu.memory_space<vmem>>) attributes {dimension_semantics = [#tpu.dimension_semantics<parallel>], iteration_bounds = array<i64: 1>, scalar_prefetch = 0 : i64, scratch_operands = 0 : i64, tpu.core_type = #tpu.core_type<tc>, window_params = [{transform_indices = @transform_0, window_bounds = array<i64: 8, 32>}, {pipeline_mode = #tpu.pipeline_mode<synchronous>, transform_indices = @transform_1, window_bounds = array<i64: 1, 32>}, {pipeline_mode = #tpu.pipeline_mode<synchronous>, transform_indices = @transform_2, window_bounds = array<i64: 1, 32>}, {transform_indices = @transform_3, window_bounds = array<i64: 8, 32>}]} {
    %c0 = arith.constant 0 : index
    %c0_0 = arith.constant 0 : index
    %0 = vector.load %arg1[%c0, %c0_0] : memref<8x32xf32, #tpu.memory_space<vmem>>, vector<8x32xf32>
    %cst = arith.constant dense<0.000000e+00> : vector<8xf32>
    %1 = vector.multi_reduction <add>, %0, %cst [1] : vector<8x32xf32> to vector<8xf32>
    %2 = vector.shape_cast %1 : vector<8xf32> to vector<8x1xf32>
    %cst_1 = arith.constant 3.200000e+01 : f32
    %3 = vector.broadcast %cst_1 : f32 to vector<8x1xf32>
    %4 = arith.divf %2, %3 : vector<8x1xf32>
    %5 = vector.broadcast %4 : vector<8x1xf32> to vector<8x32xf32>
    %6 = arith.subf %0, %5 : vector<8x32xf32>
    %7 = arith.mulf %6, %6 : vector<8x32xf32>
    %cst_2 = arith.constant dense<0.000000e+00> : vector<8xf32>
    %8 = vector.multi_reduction <add>, %7, %cst_2 [1] : vector<8x32xf32> to vector<8xf32>
    %9 = vector.shape_cast %8 : vector<8xf32> to vector<8x1xf32>
    %cst_3 = arith.constant 3.200000e+01 : f32
    %10 = vector.broadcast %cst_3 : f32 to vector<8x1xf32>
    %11 = arith.divf %9, %10 : vector<8x1xf32>
    %cst_4 = arith.constant 9.99999997E-7 : f32
    %12 = vector.broadcast %cst_4 : f32 to vector<8x1xf32>
    %13 = arith.addf %11, %12 : vector<8x1xf32>
    %14 = math.rsqrt %13 : vector<8x1xf32>
    %15 = vector.broadcast %14 : vector<8x1xf32> to vector<8x32xf32>
    %16 = arith.mulf %6, %15 : vector<8x32xf32>
    %c0_5 = arith.constant 0 : index
    %c0_6 = arith.constant 0 : index
    %17 = vector.load %arg2[%c0_5, %c0_6] : memref<1x32xf32, #tpu.memory_space<vmem>>, vector<1x32xf32>
    %18 = vector.broadcast %17 : vector<1x32xf32> to vector<8x32xf32>
    %19 = arith.mulf %16, %18 : vector<8x32xf32>
    %c0_7 = arith.constant 0 : index
    %c0_8 = arith.constant 0 : index
    %20 = vector.load %arg3[%c0_7, %c0_8] : memref<1x32xf32, #tpu.memory_space<vmem>>, vector<1x32xf32>
    %21 = vector.broadcast %20 : vector<1x32xf32> to vector<8x32xf32>
    %22 = arith.addf %19, %21 : vector<8x32xf32>
    %23 = arith.truncf %22 : vector<8x32xf32> to vector<8x32xbf16>
    %c0_9 = arith.constant 0 : index
    %c0_10 = arith.constant 0 : index
    %24 = vector.load %arg4[%c0_9, %c0_10] : memref<8x32xbf16, #tpu.memory_space<vmem>>, vector<8x32xbf16>
    tpu.vector_store %arg4[%c0_9, %c0_10], %23 {strides = array<i32>} : memref<8x32xbf16, #tpu.memory_space<vmem>>, vector<8x32xbf16>,
    return
  }
  func.func @transform_0(%arg0: i32) -> (i32, i32) {
    %c0_i32 = arith.constant 0 : i32
    %c0_i32_0 = arith.constant 0 : i32
    return %arg0, %c0_i32 : i32, i32
  }
  func.func @transform_1(%arg0: i32) -> (i32, i32) {
    %c0_i32 = arith.constant 0 : i32
    %c0_i32_0 = arith.constant 0 : i32
    %c0_i32_1 = arith.constant 0 : i32
    return %c0_i32, %c0_i32_0 : i32, i32
  }
  func.func @transform_2(%arg0: i32) -> (i32, i32) {
    %c0_i32 = arith.constant 0 : i32
    %c0_i32_0 = arith.constant 0 : i32
    %c0_i32_1 = arith.constant 0 : i32
    return %c0_i32, %c0_i32_0 : i32, i32
  }
  func.func @transform_3(%arg0: i32) -> (i32, i32) {
    %c0_i32 = arith.constant 0 : i32
    %c0_i32_0 = arith.constant 0 : i32
    return %arg0, %c0_i32 : i32, i32
  }
}

module attributes {stable_mosaic.version = 11 : i64} {
  func.func @_mm_kernel(%arg0: i32, %arg1: i32, %arg2: i32, %arg3: memref<8x128xbf16, #tpu.memory_space<vmem>>, %arg4: memref<128x128xbf16, #tpu.memory_space<vmem>>, %arg5: memref<1x128xf32, #tpu.memory_space<vmem>>, %arg6: memref<8x128xbf16, #tpu.memory_space<vmem>>, %arg7: memref<8x128xf32, #tpu.memory_space<vmem>>) attributes {dimension_semantics = [#tpu.dimension_semantics<parallel>, #tpu.dimension_semantics<parallel>, #tpu.dimension_semantics<arbitrary>], iteration_bounds = array<i64: 1, 1, 1>, scalar_prefetch = 0 : i64, scratch_operands = 1 : i64, tpu.core_type = #tpu.core_type<tc>, window_params = [{transform_indices = @transform_0, window_bounds = array<i64: 8, 128>}, {transform_indices = @transform_1, window_bounds = array<i64: 128, 128>}, {transform_indices = @transform_2, window_bounds = array<i64: 1, 128>}, {transform_indices = @transform_3, window_bounds = array<i64: 8, 128>}]} {
    %c0_i32 = arith.constant 0 : i32
    %0 = arith.cmpi eq, %arg2, %c0_i32 : i32
    %1 = arith.extui %0 : i1 to i32
    %c0_i32_0 = arith.constant 0 : i32
    %2 = arith.cmpi ne, %1, %c0_i32_0 : i32
    scf.if %2 {
      %cst_10 = arith.constant 0.000000e+00 : f32
      %12 = vector.broadcast %cst_10 : f32 to vector<8x128xf32>
      %c0_11 = arith.constant 0 : index
      %c0_12 = arith.constant 0 : index
      %13 = vector.load %arg7[%c0_11, %c0_12] : memref<8x128xf32, #tpu.memory_space<vmem>>, vector<8x128xf32>
      tpu.vector_store %arg7[%c0_11, %c0_12], %12 {strides = array<i32>} : memref<8x128xf32, #tpu.memory_space<vmem>>, vector<8x128xf32>,
    } else {
    }
    %c0 = arith.constant 0 : index
    %c0_1 = arith.constant 0 : index
    %3 = vector.load %arg7[%c0, %c0_1] : memref<8x128xf32, #tpu.memory_space<vmem>>, vector<8x128xf32>
    %c0_2 = arith.constant 0 : index
    %c0_3 = arith.constant 0 : index
    %4 = vector.load %arg3[%c0_2, %c0_3] : memref<8x128xbf16, #tpu.memory_space<vmem>>, vector<8x128xbf16>
    %c0_4 = arith.constant 0 : index
    %c0_5 = arith.constant 0 : index
    %5 = vector.load %arg4[%c0_4, %c0_5] : memref<128x128xbf16, #tpu.memory_space<vmem>>, vector<128x128xbf16>
    %cst = arith.constant dense<0.000000e+00> : vector<8x128xf32>
    %6 = tpu.matmul %4, %5, %cst {dimension_numbers = #tpu.dot_dimension_numbers<[1], [0], [0], [1], [0, 0, 1, 1], [], []>} : vector<8x128xbf16>, vector<128x128xbf16>, vector<8x128xf32> -> vector<8x128xf32>
    %7 = arith.addf %3, %6 : vector<8x128xf32>
    %c0_6 = arith.constant 0 : index
    %c0_7 = arith.constant 0 : index
    %8 = vector.load %arg7[%c0_6, %c0_7] : memref<8x128xf32, #tpu.memory_space<vmem>>, vector<8x128xf32>
    tpu.vector_store %arg7[%c0_6, %c0_7], %7 {strides = array<i32>} : memref<8x128xf32, #tpu.memory_space<vmem>>, vector<8x128xf32>,
    %c0_i32_8 = arith.constant 0 : i32
    %9 = arith.cmpi eq, %arg2, %c0_i32_8 : i32
    %10 = arith.extui %9 : i1 to i32
    %c0_i32_9 = arith.constant 0 : i32
    %11 = arith.cmpi ne, %10, %c0_i32_9 : i32
    scf.if %11 {
      %c0_10 = arith.constant 0 : index
      %c0_11 = arith.constant 0 : index
      %12 = vector.load %arg7[%c0_10, %c0_11] : memref<8x128xf32, #tpu.memory_space<vmem>>, vector<8x128xf32>
      %c0_12 = arith.constant 0 : index
      %c0_13 = arith.constant 0 : index
      %13 = vector.load %arg5[%c0_12, %c0_13] : memref<1x128xf32, #tpu.memory_space<vmem>>, vector<1x128xf32>
      %14 = vector.broadcast %13 : vector<1x128xf32> to vector<8x128xf32>
      %15 = arith.addf %12, %14 : vector<8x128xf32>
      %16 = arith.truncf %15 : vector<8x128xf32> to vector<8x128xbf16>
      %c0_14 = arith.constant 0 : index
      %c0_15 = arith.constant 0 : index
      %17 = vector.load %arg6[%c0_14, %c0_15] : memref<8x128xbf16, #tpu.memory_space<vmem>>, vector<8x128xbf16>
      tpu.vector_store %arg6[%c0_14, %c0_15], %16 {strides = array<i32>} : memref<8x128xbf16, #tpu.memory_space<vmem>>, vector<8x128xbf16>,
    } else {
    }
    return
  }
  func.func @transform_0(%arg0: i32, %arg1: i32, %arg2: i32) -> (i32, i32) {
    %c0_i32 = arith.constant 0 : i32
    return %arg0, %arg2 : i32, i32
  }
  func.func @transform_1(%arg0: i32, %arg1: i32, %arg2: i32) -> (i32, i32) {
    %c0_i32 = arith.constant 0 : i32
    return %arg2, %arg1 : i32, i32
  }
  func.func @transform_2(%arg0: i32, %arg1: i32, %arg2: i32) -> (i32, i32) {
    %c0_i32 = arith.constant 0 : i32
    %c0_i32_0 = arith.constant 0 : i32
    return %c0_i32, %arg1 : i32, i32
  }
  func.func @transform_3(%arg0: i32, %arg1: i32, %arg2: i32) -> (i32, i32) {
    %c0_i32 = arith.constant 0 : i32
    return %arg0, %arg1 : i32, i32
  }
}

module attributes {stable_mosaic.version = 11 : i64} {
  func.func @_ln_kernel(%arg0: i32, %arg1: memref<32x16xbf16, #tpu.memory_space<vmem>>, %arg2: memref<1x16xf32, #tpu.memory_space<vmem>>, %arg3: memref<1x16xf32, #tpu.memory_space<vmem>>, %arg4: memref<32x16xbf16, #tpu.memory_space<vmem>>) attributes {dimension_semantics = [#tpu.dimension_semantics<parallel>], iteration_bounds = array<i64: 1>, scalar_prefetch = 0 : i64, scratch_operands = 0 : i64, tpu.core_type = #tpu.core_type<tc>, window_params = [{transform_indices = @transform_0, window_bounds = array<i64: 32, 16>}, {pipeline_mode = #tpu.pipeline_mode<synchronous>, transform_indices = @transform_1, window_bounds = array<i64: 1, 16>}, {pipeline_mode = #tpu.pipeline_mode<synchronous>, transform_indices = @transform_2, window_bounds = array<i64: 1, 16>}, {transform_indices = @transform_3, window_bounds = array<i64: 32, 16>}]} {
    %c0 = arith.constant 0 : index
    %c0_0 = arith.constant 0 : index
    %0 = vector.load %arg1[%c0, %c0_0] : memref<32x16xbf16, #tpu.memory_space<vmem>>, vector<32x16xbf16>
    %1 = arith.extf %0 : vector<32x16xbf16> to vector<32x16xf32>
    %cst = arith.constant dense<0.000000e+00> : vector<32xf32>
    %2 = vector.multi_reduction <add>, %1, %cst [1] : vector<32x16xf32> to vector<32xf32>
    %3 = vector.shape_cast %2 : vector<32xf32> to vector<32x1xf32>
    %cst_1 = arith.constant 1.600000e+01 : f32
    %4 = vector.broadcast %cst_1 : f32 to vector<32x1xf32>
    %5 = arith.divf %3, %4 : vector<32x1xf32>
    %6 = vector.broadcast %5 : vector<32x1xf32> to vector<32x16xf32>
    %7 = arith.subf %1, %6 : vector<32x16xf32>
    %8 = arith.mulf %7, %7 : vector<32x16xf32>
    %cst_2 = arith.constant dense<0.000000e+00> : vector<32xf32>
    %9 = vector.multi_reduction <add>, %8, %cst_2 [1] : vector<32x16xf32> to vector<32xf32>
    %10 = vector.shape_cast %9 : vector<32xf32> to vector<32x1xf32>
    %cst_3 = arith.constant 1.600000e+01 : f32
    %11 = vector.broadcast %cst_3 : f32 to vector<32x1xf32>
    %12 = arith.divf %10, %11 : vector<32x1xf32>
    %cst_4 = arith.constant 9.99999997E-7 : f32
    %13 = vector.broadcast %cst_4 : f32 to vector<32x1xf32>
    %14 = arith.addf %12, %13 : vector<32x1xf32>
    %15 = math.rsqrt %14 : vector<32x1xf32>
    %16 = vector.broadcast %15 : vector<32x1xf32> to vector<32x16xf32>
    %17 = arith.mulf %7, %16 : vector<32x16xf32>
    %c0_5 = arith.constant 0 : index
    %c0_6 = arith.constant 0 : index
    %18 = vector.load %arg2[%c0_5, %c0_6] : memref<1x16xf32, #tpu.memory_space<vmem>>, vector<1x16xf32>
    %19 = vector.broadcast %18 : vector<1x16xf32> to vector<32x16xf32>
    %20 = arith.mulf %17, %19 : vector<32x16xf32>
    %c0_7 = arith.constant 0 : index
    %c0_8 = arith.constant 0 : index
    %21 = vector.load %arg3[%c0_7, %c0_8] : memref<1x16xf32, #tpu.memory_space<vmem>>, vector<1x16xf32>
    %22 = vector.broadcast %21 : vector<1x16xf32> to vector<32x16xf32>
    %23 = arith.addf %20, %22 : vector<32x16xf32>
    %cst_9 = arith.constant 5.000000e-01 : f32
    %24 = vector.broadcast %cst_9 : f32 to vector<32x16xf32>
    %25 = arith.mulf %24, %23 : vector<32x16xf32>
    %cst_10 = arith.constant 0.707106769 : f32
    %26 = vector.broadcast %cst_10 : f32 to vector<32x16xf32>
    %27 = arith.mulf %23, %26 : vector<32x16xf32>
    %28 = math.erf %27 : vector<32x16xf32>
    %cst_11 = arith.constant 1.000000e+00 : f32
    %29 = vector.broadcast %cst_11 : f32 to vector<32x16xf32>
    %30 = arith.addf %29, %28 : vector<32x16xf32>
    %31 = arith.mulf %25, %30 : vector<32x16xf32>
    %32 = arith.truncf %31 : vector<32x16xf32> to vector<32x16xbf16>
    %c0_12 = arith.constant 0 : index
    %c0_13 = arith.constant 0 : index
    %33 = vector.load %arg4[%c0_12, %c0_13] : memref<32x16xbf16, #tpu.memory_space<vmem>>, vector<32x16xbf16>
    tpu.vector_store %arg4[%c0_12, %c0_13], %32 {strides = array<i32>} : memref<32x16xbf16, #tpu.memory_space<vmem>>, vector<32x16xbf16>,
    return
  }
  func.func @transform_0(%arg0: i32) -> (i32, i32) {
    %c0_i32 = arith.constant 0 : i32
    %c0_i32_0 = arith.constant 0 : i32
    return %arg0, %c0_i32 : i32, i32
  }
  func.func @transform_1(%arg0: i32) -> (i32, i32) {
    %c0_i32 = arith.constant 0 : i32
    %c0_i32_0 = arith.constant 0 : i32
    %c0_i32_1 = arith.constant 0 : i32
    return %c0_i32, %c0_i32_0 : i32, i32
  }
  func.func @transform_2(%arg0: i32) -> (i32, i32) {
    %c0_i32 = arith.constant 0 : i32
    %c0_i32_0 = arith.constant 0 : i32
    %c0_i32_1 = arith.constant 0 : i32
    return %c0_i32, %c0_i32_0 : i32, i32
  }
  func.func @transform_3(%arg0: i32) -> (i32, i32) {
    %c0_i32 = arith.constant 0 : i32
    %c0_i32_0 = arith.constant 0 : i32
    return %arg0, %c0_i32 : i32, i32
  }
}

module attributes {stable_mosaic.version = 11 : i64} {
  func.func @_mm_kernel(%arg0: i32, %arg1: i32, %arg2: i32, %arg3: memref<32x128xbf16, #tpu.memory_space<vmem>>, %arg4: memref<128x128xbf16, #tpu.memory_space<vmem>>, %arg5: memref<1x128xf32, #tpu.memory_space<vmem>>, %arg6: memref<32x128xbf16, #tpu.memory_space<vmem>>, %arg7: memref<32x128xf32, #tpu.memory_space<vmem>>) attributes {dimension_semantics = [#tpu.dimension_semantics<parallel>, #tpu.dimension_semantics<parallel>, #tpu.dimension_semantics<arbitrary>], iteration_bounds = array<i64: 1, 1, 1>, scalar_prefetch = 0 : i64, scratch_operands = 1 : i64, tpu.core_type = #tpu.core_type<tc>, window_params = [{transform_indices = @transform_0, window_bounds = array<i64: 32, 128>}, {transform_indices = @transform_1, window_bounds = array<i64: 128, 128>}, {transform_indices = @transform_2, window_bounds = array<i64: 1, 128>}, {transform_indices = @transform_3, window_bounds = array<i64: 32, 128>}]} {
    %c0_i32 = arith.constant 0 : i32
    %0 = arith.cmpi eq, %arg2, %c0_i32 : i32
    %1 = arith.extui %0 : i1 to i32
    %c0_i32_0 = arith.constant 0 : i32
    %2 = arith.cmpi ne, %1, %c0_i32_0 : i32
    scf.if %2 {
      %cst_10 = arith.constant 0.000000e+00 : f32
      %12 = vector.broadcast %cst_10 : f32 to vector<32x128xf32>
      %c0_11 = arith.constant 0 : index
      %c0_12 = arith.constant 0 : index
      %13 = vector.load %arg7[%c0_11, %c0_12] : memref<32x128xf32, #tpu.memory_space<vmem>>, vector<32x128xf32>
      tpu.vector_store %arg7[%c0_11, %c0_12], %12 {strides = array<i32>} : memref<32x128xf32, #tpu.memory_space<vmem>>, vector<32x128xf32>,
    } else {
    }
    %c0 = arith.constant 0 : index
    %c0_1 = arith.constant 0 : index
    %3 = vector.load %arg7[%c0, %c0_1] : memref<32x128xf32, #tpu.memory_space<vmem>>, vector<32x128xf32>
    %c0_2 = arith.constant 0 : index
    %c0_3 = arith.constant 0 : index
    %4 = vector.load %arg3[%c0_2, %c0_3] : memref<32x128xbf16, #tpu.memory_space<vmem>>, vector<32x128xbf16>
    %c0_4 = arith.constant 0 : index
    %c0_5 = arith.constant 0 : index
    %5 = vector.load %arg4[%c0_4, %c0_5] : memref<128x128xbf16, #tpu.memory_space<vmem>>, vector<128x128xbf16>
    %cst = arith.constant dense<0.000000e+00> : vector<32x128xf32>
    %6 = tpu.matmul %4, %5, %cst {dimension_numbers = #tpu.dot_dimension_numbers<[1], [0], [0], [1], [0, 0, 1, 1], [], []>} : vector<32x128xbf16>, vector<128x128xbf16>, vector<32x128xf32> -> vector<32x128xf32>
    %7 = arith.addf %3, %6 : vector<32x128xf32>
    %c0_6 = arith.constant 0 : index
    %c0_7 = arith.constant 0 : index
    %8 = vector.load %arg7[%c0_6, %c0_7] : memref<32x128xf32, #tpu.memory_space<vmem>>, vector<32x128xf32>
    tpu.vector_store %arg7[%c0_6, %c0_7], %7 {strides = array<i32>} : memref<32x128xf32, #tpu.memory_space<vmem>>, vector<32x128xf32>,
    %c0_i32_8 = arith.constant 0 : i32
    %9 = arith.cmpi eq, %arg2, %c0_i32_8 : i32
    %10 = arith.extui %9 : i1 to i32
    %c0_i32_9 = arith.constant 0 : i32
    %11 = arith.cmpi ne, %10, %c0_i32_9 : i32
    scf.if %11 {
      %c0_10 = arith.constant 0 : index
      %c0_11 = arith.constant 0 : index
      %12 = vector.load %arg7[%c0_10, %c0_11] : memref<32x128xf32, #tpu.memory_space<vmem>>, vector<32x128xf32>
      %c0_12 = arith.constant 0 : index
      %c0_13 = arith.constant 0 : index
      %13 = vector.load %arg5[%c0_12, %c0_13] : memref<1x128xf32, #tpu.memory_space<vmem>>, vector<1x128xf32>
      %14 = vector.broadcast %13 : vector<1x128xf32> to vector<32x128xf32>
      %15 = arith.addf %12, %14 : vector<32x128xf32>
      %16 = arith.truncf %15 : vector<32x128xf32> to vector<32x128xbf16>
      %c0_14 = arith.constant 0 : index
      %c0_15 = arith.constant 0 : index
      %17 = vector.load %arg6[%c0_14, %c0_15] : memref<32x128xbf16, #tpu.memory_space<vmem>>, vector<32x128xbf16>
      tpu.vector_store %arg6[%c0_14, %c0_15], %16 {strides = array<i32>} : memref<32x128xbf16, #tpu.memory_space<vmem>>, vector<32x128xbf16>,
    } else {
    }
    return
  }
  func.func @transform_0(%arg0: i32, %arg1: i32, %arg2: i32) -> (i32, i32) {
    %c0_i32 = arith.constant 0 : i32
    return %arg0, %arg2 : i32, i32
  }
  func.func @transform_1(%arg0: i32, %arg1: i32, %arg2: i32) -> (i32, i32) {
    %c0_i32 = arith.constant 0 : i32
    return %arg2, %arg1 : i32, i32
  }
  func.func @transform_2(%arg0: i32, %arg1: i32, %arg2: i32) -> (i32, i32) {
    %c0_i32 = arith.constant 0 : i32
    %c0_i32_0 = arith.constant 0 : i32
    return %c0_i32, %arg1 : i32, i32
  }
  func.func @transform_3(%arg0: i32, %arg1: i32, %arg2: i32) -> (i32, i32) {
    %c0_i32 = arith.constant 0 : i32
    return %arg0, %arg1 : i32, i32
  }
}

module attributes {stable_mosaic.version = 11 : i64} {
  func.func @_mm_lnout_kernel(%arg0: i32, %arg1: memref<128x8xbf16, #tpu.memory_space<vmem>>, %arg2: memref<8x16xbf16, #tpu.memory_space<vmem>>, %arg3: memref<1x16xf32, #tpu.memory_space<vmem>>, %arg4: memref<1x16xf32, #tpu.memory_space<vmem>>, %arg5: memref<128x16xbf16, #tpu.memory_space<vmem>>) attributes {dimension_semantics = [#tpu.dimension_semantics<parallel>], iteration_bounds = array<i64: 1>, scalar_prefetch = 0 : i64, scratch_operands = 0 : i64, tpu.core_type = #tpu.core_type<tc>, window_params = [{transform_indices = @transform_0, window_bounds = array<i64: 128, 8>}, {pipeline_mode = #tpu.pipeline_mode<synchronous>, transform_indices = @transform_1, window_bounds = array<i64: 8, 16>}, {pipeline_mode = #tpu.pipeline_mode<synchronous>, transform_indices = @transform_2, window_bounds = array<i64: 1, 16>}, {pipeline_mode = #tpu.pipeline_mode<synchronous>, transform_indices = @transform_3, window_bounds = array<i64: 1, 16>}, {transform_indices = @transform_4, window_bounds = array<i64: 128, 16>}]} {
    %c0 = arith.constant 0 : index
    %c0_0 = arith.constant 0 : index
    %0 = vector.load %arg1[%c0, %c0_0] : memref<128x8xbf16, #tpu.memory_space<vmem>>, vector<128x8xbf16>
    %c0_1 = arith.constant 0 : index
    %c0_2 = arith.constant 0 : index
    %1 = vector.load %arg2[%c0_1, %c0_2] : memref<8x16xbf16, #tpu.memory_space<vmem>>, vector<8x16xbf16>
    %cst = arith.constant dense<0.000000e+00> : vector<128x16xf32>
    %2 = tpu.matmul %0, %1, %cst {dimension_numbers = #tpu.dot_dimension_numbers<[1], [0], [0], [1], [0, 0, 1, 1], [], []>} : vector<128x8xbf16>, vector<8x16xbf16>, vector<128x16xf32> -> vector<128x16xf32>
    %cst_3 = arith.constant dense<0.000000e+00> : vector<128xf32>
    %3 = vector.multi_reduction <add>, %2, %cst_3 [1] : vector<128x16xf32> to vector<128xf32>
    %4 = vector.shape_cast %3 : vector<128xf32> to vector<128x1xf32>
    %cst_4 = arith.constant 1.600000e+01 : f32
    %5 = vector.broadcast %cst_4 : f32 to vector<128x1xf32>
    %6 = arith.divf %4, %5 : vector<128x1xf32>
    %7 = vector.broadcast %6 : vector<128x1xf32> to vector<128x16xf32>
    %8 = arith.subf %2, %7 : vector<128x16xf32>
    %9 = arith.mulf %8, %8 : vector<128x16xf32>
    %cst_5 = arith.constant dense<0.000000e+00> : vector<128xf32>
    %10 = vector.multi_reduction <add>, %9, %cst_5 [1] : vector<128x16xf32> to vector<128xf32>
    %11 = vector.shape_cast %10 : vector<128xf32> to vector<128x1xf32>
    %cst_6 = arith.constant 1.600000e+01 : f32
    %12 = vector.broadcast %cst_6 : f32 to vector<128x1xf32>
    %13 = arith.divf %11, %12 : vector<128x1xf32>
    %cst_7 = arith.constant 9.99999997E-7 : f32
    %14 = vector.broadcast %cst_7 : f32 to vector<128x1xf32>
    %15 = arith.addf %13, %14 : vector<128x1xf32>
    %16 = math.rsqrt %15 : vector<128x1xf32>
    %17 = vector.broadcast %16 : vector<128x1xf32> to vector<128x16xf32>
    %18 = arith.mulf %8, %17 : vector<128x16xf32>
    %c0_8 = arith.constant 0 : index
    %c0_9 = arith.constant 0 : index
    %19 = vector.load %arg3[%c0_8, %c0_9] : memref<1x16xf32, #tpu.memory_space<vmem>>, vector<1x16xf32>
    %20 = vector.broadcast %19 : vector<1x16xf32> to vector<128x16xf32>
    %21 = arith.mulf %18, %20 : vector<128x16xf32>
    %c0_10 = arith.constant 0 : index
    %c0_11 = arith.constant 0 : index
    %22 = vector.load %arg4[%c0_10, %c0_11] : memref<1x16xf32, #tpu.memory_space<vmem>>, vector<1x16xf32>
    %23 = vector.broadcast %22 : vector<1x16xf32> to vector<128x16xf32>
    %24 = arith.addf %21, %23 : vector<128x16xf32>
    %25 = arith.truncf %24 : vector<128x16xf32> to vector<128x16xbf16>
    %c0_12 = arith.constant 0 : index
    %c0_13 = arith.constant 0 : index
    %26 = vector.load %arg5[%c0_12, %c0_13] : memref<128x16xbf16, #tpu.memory_space<vmem>>, vector<128x16xbf16>
    tpu.vector_store %arg5[%c0_12, %c0_13], %25 {strides = array<i32>} : memref<128x16xbf16, #tpu.memory_space<vmem>>, vector<128x16xbf16>,
    return
  }
  func.func @transform_0(%arg0: i32) -> (i32, i32) {
    %c0_i32 = arith.constant 0 : i32
    %c0_i32_0 = arith.constant 0 : i32
    return %arg0, %c0_i32 : i32, i32
  }
  func.func @transform_1(%arg0: i32) -> (i32, i32) {
    %c0_i32 = arith.constant 0 : i32
    %c0_i32_0 = arith.constant 0 : i32
    %c0_i32_1 = arith.constant 0 : i32
    return %c0_i32, %c0_i32_0 : i32, i32
  }
  func.func @transform_2(%arg0: i32) -> (i32, i32) {
    %c0_i32 = arith.constant 0 : i32
    %c0_i32_0 = arith.constant 0 : i32
    %c0_i32_1 = arith.constant 0 : i32
    return %c0_i32, %c0_i32_0 : i32, i32
  }
  func.func @transform_3(%arg0: i32) -> (i32, i32) {
    %c0_i32 = arith.constant 0 : i32
    %c0_i32_0 = arith.constant 0 : i32
    %c0_i32_1 = arith.constant 0 : i32
    return %c0_i32, %c0_i32_0 : i32, i32
  }
  func.func @transform_4(%arg0: i32) -> (i32, i32) {
    %c0_i32 = arith.constant 0 : i32
    %c0_i32_0 = arith.constant 0 : i32
    return %arg0, %c0_i32 : i32, i32
  }
}

module attributes {stable_mosaic.version = 11 : i64} {
  func.func @_conv3x3_ln_kernel(%arg0: i32, %arg1: memref<1x102x16xbf16, #tpu.memory_space<vmem>>, %arg2: memref<9x16x16xbf16, #tpu.memory_space<vmem>>, %arg3: memref<1x16xf32, #tpu.memory_space<vmem>>, %arg4: memref<1x16xf32, #tpu.memory_space<vmem>>, %arg5: memref<1x80x16xf32, #tpu.memory_space<vmem>>) attributes {dimension_semantics = [#tpu.dimension_semantics<parallel>], iteration_bounds = array<i64: 2>, scalar_prefetch = 0 : i64, scratch_operands = 0 : i64, tpu.core_type = #tpu.core_type<tc>, window_params = [{transform_indices = @transform_0, window_bounds = array<i64: 1, 102, 16>}, {pipeline_mode = #tpu.pipeline_mode<synchronous>, transform_indices = @transform_1, window_bounds = array<i64: 9, 16, 16>}, {pipeline_mode = #tpu.pipeline_mode<synchronous>, transform_indices = @transform_2, window_bounds = array<i64: 1, 16>}, {pipeline_mode = #tpu.pipeline_mode<synchronous>, transform_indices = @transform_3, window_bounds = array<i64: 1, 16>}, {transform_indices = @transform_4, window_bounds = array<i64: 1, 80, 16>}]} {
    %cst = arith.constant 0.000000e+00 : f32
    %0 = vector.broadcast %cst : f32 to vector<80x16xf32>
    %c0 = arith.constant 0 : index
    %c0_0 = arith.constant 0 : index
    %c0_1 = arith.constant 0 : index
    %1 = vector.load %arg1[%c0, %c0_0, %c0_1] : memref<1x102x16xbf16, #tpu.memory_space<vmem>>, vector<1x80x16xbf16>
    %2 = vector.shape_cast %1 : vector<1x80x16xbf16> to vector<80x16xbf16>
    %c0_2 = arith.constant 0 : index
    %c0_3 = arith.constant 0 : index
    %c0_4 = arith.constant 0 : index
    %3 = vector.load %arg2[%c0_2, %c0_3, %c0_4] : memref<9x16x16xbf16, #tpu.memory_space<vmem>>, vector<1x16x16xbf16>
    %4 = vector.shape_cast %3 : vector<1x16x16xbf16> to vector<16x16xbf16>
    %cst_5 = arith.constant dense<0.000000e+00> : vector<80x16xf32>
    %5 = tpu.matmul %2, %4, %cst_5 {dimension_numbers = #tpu.dot_dimension_numbers<[1], [0], [0], [1], [0, 0, 1, 1], [], []>} : vector<80x16xbf16>, vector<16x16xbf16>, vector<80x16xf32> -> vector<80x16xf32>
    %6 = arith.addf %0, %5 : vector<80x16xf32>
    %c0_6 = arith.constant 0 : index
    %c1 = arith.constant 1 : index
    %c0_7 = arith.constant 0 : index
    %7 = vector.load %arg1[%c0_6, %c1, %c0_7] : memref<1x102x16xbf16, #tpu.memory_space<vmem>>, vector<1x80x16xbf16>
    %8 = vector.shape_cast %7 : vector<1x80x16xbf16> to vector<80x16xbf16>
    %c1_8 = arith.constant 1 : index
    %c0_9 = arith.constant 0 : index
    %c0_10 = arith.constant 0 : index
    %9 = vector.load %arg2[%c1_8, %c0_9, %c0_10] : memref<9x16x16xbf16, #tpu.memory_space<vmem>>, vector<1x16x16xbf16>
    %10 = vector.shape_cast %9 : vector<1x16x16xbf16> to vector<16x16xbf16>
    %cst_11 = arith.constant dense<0.000000e+00> : vector<80x16xf32>
    %11 = tpu.matmul %8, %10, %cst_11 {dimension_numbers = #tpu.dot_dimension_numbers<[1], [0], [0], [1], [0, 0, 1, 1], [], []>} : vector<80x16xbf16>, vector<16x16xbf16>, vector<80x16xf32> -> vector<80x16xf32>
    %12 = arith.addf %6, %11 : vector<80x16xf32>
    %c0_12 = arith.constant 0 : index
    %c2 = arith.constant 2 : index
    %c0_13 = arith.constant 0 : index
    %13 = vector.load %arg1[%c0_12, %c2, %c0_13] : memref<1x102x16xbf16, #tpu.memory_space<vmem>>, vector<1x80x16xbf16>
    %14 = vector.shape_cast %13 : vector<1x80x16xbf16> to vector<80x16xbf16>
    %c2_14 = arith.constant 2 : index
    %c0_15 = arith.constant 0 : index
    %c0_16 = arith.constant 0 : index
    %15 = vector.load %arg2[%c2_14, %c0_15, %c0_16] : memref<9x16x16xbf16, #tpu.memory_space<vmem>>, vector<1x16x16xbf16>
    %16 = vector.shape_cast %15 : vector<1x16x16xbf16> to vector<16x16xbf16>
    %cst_17 = arith.constant dense<0.000000e+00> : vector<80x16xf32>
    %17 = tpu.matmul %14, %16, %cst_17 {dimension_numbers = #tpu.dot_dimension_numbers<[1], [0], [0], [1], [0, 0, 1, 1], [], []>} : vector<80x16xbf16>, vector<16x16xbf16>, vector<80x16xf32> -> vector<80x16xf32>
    %18 = arith.addf %12, %17 : vector<80x16xf32>
    %c0_18 = arith.constant 0 : index
    %c10 = arith.constant 10 : index
    %c0_19 = arith.constant 0 : index
    %19 = vector.load %arg1[%c0_18, %c10, %c0_19] : memref<1x102x16xbf16, #tpu.memory_space<vmem>>, vector<1x80x16xbf16>
    %20 = vector.shape_cast %19 : vector<1x80x16xbf16> to vector<80x16xbf16>
    %c3 = arith.constant 3 : index
    %c0_20 = arith.constant 0 : index
    %c0_21 = arith.constant 0 : index
    %21 = vector.load %arg2[%c3, %c0_20, %c0_21] : memref<9x16x16xbf16, #tpu.memory_space<vmem>>, vector<1x16x16xbf16>
    %22 = vector.shape_cast %21 : vector<1x16x16xbf16> to vector<16x16xbf16>
    %cst_22 = arith.constant dense<0.000000e+00> : vector<80x16xf32>
    %23 = tpu.matmul %20, %22, %cst_22 {dimension_numbers = #tpu.dot_dimension_numbers<[1], [0], [0], [1], [0, 0, 1, 1], [], []>} : vector<80x16xbf16>, vector<16x16xbf16>, vector<80x16xf32> -> vector<80x16xf32>
    %24 = arith.addf %18, %23 : vector<80x16xf32>
    %c0_23 = arith.constant 0 : index
    %c11 = arith.constant 11 : index
    %c0_24 = arith.constant 0 : index
    %25 = vector.load %arg1[%c0_23, %c11, %c0_24] : memref<1x102x16xbf16, #tpu.memory_space<vmem>>, vector<1x80x16xbf16>
    %26 = vector.shape_cast %25 : vector<1x80x16xbf16> to vector<80x16xbf16>
    %c4 = arith.constant 4 : index
    %c0_25 = arith.constant 0 : index
    %c0_26 = arith.constant 0 : index
    %27 = vector.load %arg2[%c4, %c0_25, %c0_26] : memref<9x16x16xbf16, #tpu.memory_space<vmem>>, vector<1x16x16xbf16>
    %28 = vector.shape_cast %27 : vector<1x16x16xbf16> to vector<16x16xbf16>
    %cst_27 = arith.constant dense<0.000000e+00> : vector<80x16xf32>
    %29 = tpu.matmul %26, %28, %cst_27 {dimension_numbers = #tpu.dot_dimension_numbers<[1], [0], [0], [1], [0, 0, 1, 1], [], []>} : vector<80x16xbf16>, vector<16x16xbf16>, vector<80x16xf32> -> vector<80x16xf32>
    %30 = arith.addf %24, %29 : vector<80x16xf32>
    %c0_28 = arith.constant 0 : index
    %c12 = arith.constant 12 : index
    %c0_29 = arith.constant 0 : index
    %31 = vector.load %arg1[%c0_28, %c12, %c0_29] : memref<1x102x16xbf16, #tpu.memory_space<vmem>>, vector<1x80x16xbf16>
    %32 = vector.shape_cast %31 : vector<1x80x16xbf16> to vector<80x16xbf16>
    %c5 = arith.constant 5 : index
    %c0_30 = arith.constant 0 : index
    %c0_31 = arith.constant 0 : index
    %33 = vector.load %arg2[%c5, %c0_30, %c0_31] : memref<9x16x16xbf16, #tpu.memory_space<vmem>>, vector<1x16x16xbf16>
    %34 = vector.shape_cast %33 : vector<1x16x16xbf16> to vector<16x16xbf16>
    %cst_32 = arith.constant dense<0.000000e+00> : vector<80x16xf32>
    %35 = tpu.matmul %32, %34, %cst_32 {dimension_numbers = #tpu.dot_dimension_numbers<[1], [0], [0], [1], [0, 0, 1, 1], [], []>} : vector<80x16xbf16>, vector<16x16xbf16>, vector<80x16xf32> -> vector<80x16xf32>
    %36 = arith.addf %30, %35 : vector<80x16xf32>
    %c0_33 = arith.constant 0 : index
    %c20 = arith.constant 20 : index
    %c0_34 = arith.constant 0 : index
    %37 = vector.load %arg1[%c0_33, %c20, %c0_34] : memref<1x102x16xbf16, #tpu.memory_space<vmem>>, vector<1x80x16xbf16>
    %38 = vector.shape_cast %37 : vector<1x80x16xbf16> to vector<80x16xbf16>
    %c6 = arith.constant 6 : index
    %c0_35 = arith.constant 0 : index
    %c0_36 = arith.constant 0 : index
    %39 = vector.load %arg2[%c6, %c0_35, %c0_36] : memref<9x16x16xbf16, #tpu.memory_space<vmem>>, vector<1x16x16xbf16>
    %40 = vector.shape_cast %39 : vector<1x16x16xbf16> to vector<16x16xbf16>
    %cst_37 = arith.constant dense<0.000000e+00> : vector<80x16xf32>
    %41 = tpu.matmul %38, %40, %cst_37 {dimension_numbers = #tpu.dot_dimension_numbers<[1], [0], [0], [1], [0, 0, 1, 1], [], []>} : vector<80x16xbf16>, vector<16x16xbf16>, vector<80x16xf32> -> vector<80x16xf32>
    %42 = arith.addf %36, %41 : vector<80x16xf32>
    %c0_38 = arith.constant 0 : index
    %c21 = arith.constant 21 : index
    %c0_39 = arith.constant 0 : index
    %43 = vector.load %arg1[%c0_38, %c21, %c0_39] : memref<1x102x16xbf16, #tpu.memory_space<vmem>>, vector<1x80x16xbf16>
    %44 = vector.shape_cast %43 : vector<1x80x16xbf16> to vector<80x16xbf16>
    %c7 = arith.constant 7 : index
    %c0_40 = arith.constant 0 : index
    %c0_41 = arith.constant 0 : index
    %45 = vector.load %arg2[%c7, %c0_40, %c0_41] : memref<9x16x16xbf16, #tpu.memory_space<vmem>>, vector<1x16x16xbf16>
    %46 = vector.shape_cast %45 : vector<1x16x16xbf16> to vector<16x16xbf16>
    %cst_42 = arith.constant dense<0.000000e+00> : vector<80x16xf32>
    %47 = tpu.matmul %44, %46, %cst_42 {dimension_numbers = #tpu.dot_dimension_numbers<[1], [0], [0], [1], [0, 0, 1, 1], [], []>} : vector<80x16xbf16>, vector<16x16xbf16>, vector<80x16xf32> -> vector<80x16xf32>
    %48 = arith.addf %42, %47 : vector<80x16xf32>
    %c0_43 = arith.constant 0 : index
    %c22 = arith.constant 22 : index
    %c0_44 = arith.constant 0 : index
    %49 = vector.load %arg1[%c0_43, %c22, %c0_44] : memref<1x102x16xbf16, #tpu.memory_space<vmem>>, vector<1x80x16xbf16>
    %50 = vector.shape_cast %49 : vector<1x80x16xbf16> to vector<80x16xbf16>
    %c8 = arith.constant 8 : index
    %c0_45 = arith.constant 0 : index
    %c0_46 = arith.constant 0 : index
    %51 = vector.load %arg2[%c8, %c0_45, %c0_46] : memref<9x16x16xbf16, #tpu.memory_space<vmem>>, vector<1x16x16xbf16>
    %52 = vector.shape_cast %51 : vector<1x16x16xbf16> to vector<16x16xbf16>
    %cst_47 = arith.constant dense<0.000000e+00> : vector<80x16xf32>
    %53 = tpu.matmul %50, %52, %cst_47 {dimension_numbers = #tpu.dot_dimension_numbers<[1], [0], [0], [1], [0, 0, 1, 1], [], []>} : vector<80x16xbf16>, vector<16x16xbf16>, vector<80x16xf32> -> vector<80x16xf32>
    %54 = arith.addf %48, %53 : vector<80x16xf32>
    %cst_48 = arith.constant dense<0.000000e+00> : vector<80xf32>
    %55 = vector.multi_reduction <add>, %54, %cst_48 [1] : vector<80x16xf32> to vector<80xf32>
    %56 = vector.shape_cast %55 : vector<80xf32> to vector<80x1xf32>
    %cst_49 = arith.constant 1.600000e+01 : f32
    %57 = vector.broadcast %cst_49 : f32 to vector<80x1xf32>
    %58 = arith.divf %56, %57 : vector<80x1xf32>
    %59 = vector.broadcast %58 : vector<80x1xf32> to vector<80x16xf32>
    %60 = arith.subf %54, %59 : vector<80x16xf32>
    %61 = arith.mulf %60, %60 : vector<80x16xf32>
    %cst_50 = arith.constant dense<0.000000e+00> : vector<80xf32>
    %62 = vector.multi_reduction <add>, %61, %cst_50 [1] : vector<80x16xf32> to vector<80xf32>
    %63 = vector.shape_cast %62 : vector<80xf32> to vector<80x1xf32>
    %cst_51 = arith.constant 1.600000e+01 : f32
    %64 = vector.broadcast %cst_51 : f32 to vector<80x1xf32>
    %65 = arith.divf %63, %64 : vector<80x1xf32>
    %cst_52 = arith.constant 9.99999997E-7 : f32
    %66 = vector.broadcast %cst_52 : f32 to vector<80x1xf32>
    %67 = arith.addf %65, %66 : vector<80x1xf32>
    %68 = math.rsqrt %67 : vector<80x1xf32>
    %69 = vector.broadcast %68 : vector<80x1xf32> to vector<80x16xf32>
    %70 = arith.mulf %60, %69 : vector<80x16xf32>
    %c0_53 = arith.constant 0 : index
    %c0_54 = arith.constant 0 : index
    %71 = vector.load %arg3[%c0_53, %c0_54] : memref<1x16xf32, #tpu.memory_space<vmem>>, vector<1x16xf32>
    %72 = vector.broadcast %71 : vector<1x16xf32> to vector<80x16xf32>
    %73 = arith.mulf %70, %72 : vector<80x16xf32>
    %c0_55 = arith.constant 0 : index
    %c0_56 = arith.constant 0 : index
    %74 = vector.load %arg4[%c0_55, %c0_56] : memref<1x16xf32, #tpu.memory_space<vmem>>, vector<1x16xf32>
    %75 = vector.broadcast %74 : vector<1x16xf32> to vector<80x16xf32>
    %76 = arith.addf %73, %75 : vector<80x16xf32>
    %c0_57 = arith.constant 0 : index
    %c0_58 = arith.constant 0 : index
    %c0_59 = arith.constant 0 : index
    %77 = vector.load %arg5[%c0_57, %c0_58, %c0_59] : memref<1x80x16xf32, #tpu.memory_space<vmem>>, vector<1x80x16xf32>
    %78 = vector.shape_cast %77 : vector<1x80x16xf32> to vector<80x16xf32>
    %79 = vector.shape_cast %76 : vector<80x16xf32> to vector<1x80x16xf32>
    tpu.vector_store %arg5[%c0_57, %c0_58, %c0_59], %79 {strides = array<i32>} : memref<1x80x16xf32, #tpu.memory_space<vmem>>, vector<1x80x16xf32>,
    return
  }
  func.func @transform_0(%arg0: i32) -> (i32, i32, i32) {
    %c0_i32 = arith.constant 0 : i32
    %c0_i32_0 = arith.constant 0 : i32
    %c0_i32_1 = arith.constant 0 : i32
    return %arg0, %c0_i32, %c0_i32_0 : i32, i32, i32
  }
  func.func @transform_1(%arg0: i32) -> (i32, i32, i32) {
    %c0_i32 = arith.constant 0 : i32
    %c0_i32_0 = arith.constant 0 : i32
    %c0_i32_1 = arith.constant 0 : i32
    %c0_i32_2 = arith.constant 0 : i32
    return %c0_i32, %c0_i32_0, %c0_i32_1 : i32, i32, i32
  }
  func.func @transform_2(%arg0: i32) -> (i32, i32) {
    %c0_i32 = arith.constant 0 : i32
    %c0_i32_0 = arith.constant 0 : i32
    %c0_i32_1 = arith.constant 0 : i32
    return %c0_i32, %c0_i32_0 : i32, i32
  }
  func.func @transform_3(%arg0: i32) -> (i32, i32) {
    %c0_i32 = arith.constant 0 : i32
    %c0_i32_0 = arith.constant 0 : i32
    %c0_i32_1 = arith.constant 0 : i32
    return %c0_i32, %c0_i32_0 : i32, i32
  }
  func.func @transform_4(%arg0: i32) -> (i32, i32, i32) {
    %c0_i32 = arith.constant 0 : i32
    %c0_i32_0 = arith.constant 0 : i32
    %c0_i32_1 = arith.constant 0 : i32
    return %arg0, %c0_i32, %c0_i32_0 : i32, i32, i32
  }
}

module attributes {stable_mosaic.version = 11 : i64} {
  func.func @_mm_lnout_kernel(%arg0: i32, %arg1: memref<32x16xbf16, #tpu.memory_space<vmem>>, %arg2: memref<16x16xbf16, #tpu.memory_space<vmem>>, %arg3: memref<1x16xf32, #tpu.memory_space<vmem>>, %arg4: memref<1x16xf32, #tpu.memory_space<vmem>>, %arg5: memref<32x16xbf16, #tpu.memory_space<vmem>>) attributes {dimension_semantics = [#tpu.dimension_semantics<parallel>], iteration_bounds = array<i64: 1>, scalar_prefetch = 0 : i64, scratch_operands = 0 : i64, tpu.core_type = #tpu.core_type<tc>, window_params = [{transform_indices = @transform_0, window_bounds = array<i64: 32, 16>}, {pipeline_mode = #tpu.pipeline_mode<synchronous>, transform_indices = @transform_1, window_bounds = array<i64: 16, 16>}, {pipeline_mode = #tpu.pipeline_mode<synchronous>, transform_indices = @transform_2, window_bounds = array<i64: 1, 16>}, {pipeline_mode = #tpu.pipeline_mode<synchronous>, transform_indices = @transform_3, window_bounds = array<i64: 1, 16>}, {transform_indices = @transform_4, window_bounds = array<i64: 32, 16>}]} {
    %c0 = arith.constant 0 : index
    %c0_0 = arith.constant 0 : index
    %0 = vector.load %arg1[%c0, %c0_0] : memref<32x16xbf16, #tpu.memory_space<vmem>>, vector<32x16xbf16>
    %c0_1 = arith.constant 0 : index
    %c0_2 = arith.constant 0 : index
    %1 = vector.load %arg2[%c0_1, %c0_2] : memref<16x16xbf16, #tpu.memory_space<vmem>>, vector<16x16xbf16>
    %cst = arith.constant dense<0.000000e+00> : vector<32x16xf32>
    %2 = tpu.matmul %0, %1, %cst {dimension_numbers = #tpu.dot_dimension_numbers<[1], [0], [0], [1], [0, 0, 1, 1], [], []>} : vector<32x16xbf16>, vector<16x16xbf16>, vector<32x16xf32> -> vector<32x16xf32>
    %cst_3 = arith.constant dense<0.000000e+00> : vector<32xf32>
    %3 = vector.multi_reduction <add>, %2, %cst_3 [1] : vector<32x16xf32> to vector<32xf32>
    %4 = vector.shape_cast %3 : vector<32xf32> to vector<32x1xf32>
    %cst_4 = arith.constant 1.600000e+01 : f32
    %5 = vector.broadcast %cst_4 : f32 to vector<32x1xf32>
    %6 = arith.divf %4, %5 : vector<32x1xf32>
    %7 = vector.broadcast %6 : vector<32x1xf32> to vector<32x16xf32>
    %8 = arith.subf %2, %7 : vector<32x16xf32>
    %9 = arith.mulf %8, %8 : vector<32x16xf32>
    %cst_5 = arith.constant dense<0.000000e+00> : vector<32xf32>
    %10 = vector.multi_reduction <add>, %9, %cst_5 [1] : vector<32x16xf32> to vector<32xf32>
    %11 = vector.shape_cast %10 : vector<32xf32> to vector<32x1xf32>
    %cst_6 = arith.constant 1.600000e+01 : f32
    %12 = vector.broadcast %cst_6 : f32 to vector<32x1xf32>
    %13 = arith.divf %11, %12 : vector<32x1xf32>
    %cst_7 = arith.constant 9.99999997E-7 : f32
    %14 = vector.broadcast %cst_7 : f32 to vector<32x1xf32>
    %15 = arith.addf %13, %14 : vector<32x1xf32>
    %16 = math.rsqrt %15 : vector<32x1xf32>
    %17 = vector.broadcast %16 : vector<32x1xf32> to vector<32x16xf32>
    %18 = arith.mulf %8, %17 : vector<32x16xf32>
    %c0_8 = arith.constant 0 : index
    %c0_9 = arith.constant 0 : index
    %19 = vector.load %arg3[%c0_8, %c0_9] : memref<1x16xf32, #tpu.memory_space<vmem>>, vector<1x16xf32>
    %20 = vector.broadcast %19 : vector<1x16xf32> to vector<32x16xf32>
    %21 = arith.mulf %18, %20 : vector<32x16xf32>
    %c0_10 = arith.constant 0 : index
    %c0_11 = arith.constant 0 : index
    %22 = vector.load %arg4[%c0_10, %c0_11] : memref<1x16xf32, #tpu.memory_space<vmem>>, vector<1x16xf32>
    %23 = vector.broadcast %22 : vector<1x16xf32> to vector<32x16xf32>
    %24 = arith.addf %21, %23 : vector<32x16xf32>
    %25 = arith.truncf %24 : vector<32x16xf32> to vector<32x16xbf16>
    %c0_12 = arith.constant 0 : index
    %c0_13 = arith.constant 0 : index
    %26 = vector.load %arg5[%c0_12, %c0_13] : memref<32x16xbf16, #tpu.memory_space<vmem>>, vector<32x16xbf16>
    tpu.vector_store %arg5[%c0_12, %c0_13], %25 {strides = array<i32>} : memref<32x16xbf16, #tpu.memory_space<vmem>>, vector<32x16xbf16>,
    return
  }
  func.func @transform_0(%arg0: i32) -> (i32, i32) {
    %c0_i32 = arith.constant 0 : i32
    %c0_i32_0 = arith.constant 0 : i32
    return %arg0, %c0_i32 : i32, i32
  }
  func.func @transform_1(%arg0: i32) -> (i32, i32) {
    %c0_i32 = arith.constant 0 : i32
    %c0_i32_0 = arith.constant 0 : i32
    %c0_i32_1 = arith.constant 0 : i32
    return %c0_i32, %c0_i32_0 : i32, i32
  }
  func.func @transform_2(%arg0: i32) -> (i32, i32) {
    %c0_i32 = arith.constant 0 : i32
    %c0_i32_0 = arith.constant 0 : i32
    %c0_i32_1 = arith.constant 0 : i32
    return %c0_i32, %c0_i32_0 : i32, i32
  }
  func.func @transform_3(%arg0: i32) -> (i32, i32) {
    %c0_i32 = arith.constant 0 : i32
    %c0_i32_0 = arith.constant 0 : i32
    %c0_i32_1 = arith.constant 0 : i32
    return %c0_i32, %c0_i32_0 : i32, i32
  }
  func.func @transform_4(%arg0: i32) -> (i32, i32) {
    %c0_i32 = arith.constant 0 : i32
    %c0_i32_0 = arith.constant 0 : i32
    return %arg0, %c0_i32 : i32, i32
  }
}

module attributes {stable_mosaic.version = 11 : i64} {
  func.func @_conv3x3_ln_kernel(%arg0: i32, %arg1: memref<1x38x16xbf16, #tpu.memory_space<vmem>>, %arg2: memref<9x16x16xbf16, #tpu.memory_space<vmem>>, %arg3: memref<1x16xf32, #tpu.memory_space<vmem>>, %arg4: memref<1x16xf32, #tpu.memory_space<vmem>>, %arg5: memref<1x24x16xf32, #tpu.memory_space<vmem>>) attributes {dimension_semantics = [#tpu.dimension_semantics<parallel>], iteration_bounds = array<i64: 2>, scalar_prefetch = 0 : i64, scratch_operands = 0 : i64, tpu.core_type = #tpu.core_type<tc>, window_params = [{transform_indices = @transform_0, window_bounds = array<i64: 1, 38, 16>}, {pipeline_mode = #tpu.pipeline_mode<synchronous>, transform_indices = @transform_1, window_bounds = array<i64: 9, 16, 16>}, {pipeline_mode = #tpu.pipeline_mode<synchronous>, transform_indices = @transform_2, window_bounds = array<i64: 1, 16>}, {pipeline_mode = #tpu.pipeline_mode<synchronous>, transform_indices = @transform_3, window_bounds = array<i64: 1, 16>}, {transform_indices = @transform_4, window_bounds = array<i64: 1, 24, 16>}]} {
    %cst = arith.constant 0.000000e+00 : f32
    %0 = vector.broadcast %cst : f32 to vector<24x16xf32>
    %c0 = arith.constant 0 : index
    %c0_0 = arith.constant 0 : index
    %c0_1 = arith.constant 0 : index
    %1 = vector.load %arg1[%c0, %c0_0, %c0_1] : memref<1x38x16xbf16, #tpu.memory_space<vmem>>, vector<1x24x16xbf16>
    %2 = vector.shape_cast %1 : vector<1x24x16xbf16> to vector<24x16xbf16>
    %c0_2 = arith.constant 0 : index
    %c0_3 = arith.constant 0 : index
    %c0_4 = arith.constant 0 : index
    %3 = vector.load %arg2[%c0_2, %c0_3, %c0_4] : memref<9x16x16xbf16, #tpu.memory_space<vmem>>, vector<1x16x16xbf16>
    %4 = vector.shape_cast %3 : vector<1x16x16xbf16> to vector<16x16xbf16>
    %cst_5 = arith.constant dense<0.000000e+00> : vector<24x16xf32>
    %5 = tpu.matmul %2, %4, %cst_5 {dimension_numbers = #tpu.dot_dimension_numbers<[1], [0], [0], [1], [0, 0, 1, 1], [], []>} : vector<24x16xbf16>, vector<16x16xbf16>, vector<24x16xf32> -> vector<24x16xf32>
    %6 = arith.addf %0, %5 : vector<24x16xf32>
    %c0_6 = arith.constant 0 : index
    %c1 = arith.constant 1 : index
    %c0_7 = arith.constant 0 : index
    %7 = vector.load %arg1[%c0_6, %c1, %c0_7] : memref<1x38x16xbf16, #tpu.memory_space<vmem>>, vector<1x24x16xbf16>
    %8 = vector.shape_cast %7 : vector<1x24x16xbf16> to vector<24x16xbf16>
    %c1_8 = arith.constant 1 : index
    %c0_9 = arith.constant 0 : index
    %c0_10 = arith.constant 0 : index
    %9 = vector.load %arg2[%c1_8, %c0_9, %c0_10] : memref<9x16x16xbf16, #tpu.memory_space<vmem>>, vector<1x16x16xbf16>
    %10 = vector.shape_cast %9 : vector<1x16x16xbf16> to vector<16x16xbf16>
    %cst_11 = arith.constant dense<0.000000e+00> : vector<24x16xf32>
    %11 = tpu.matmul %8, %10, %cst_11 {dimension_numbers = #tpu.dot_dimension_numbers<[1], [0], [0], [1], [0, 0, 1, 1], [], []>} : vector<24x16xbf16>, vector<16x16xbf16>, vector<24x16xf32> -> vector<24x16xf32>
    %12 = arith.addf %6, %11 : vector<24x16xf32>
    %c0_12 = arith.constant 0 : index
    %c2 = arith.constant 2 : index
    %c0_13 = arith.constant 0 : index
    %13 = vector.load %arg1[%c0_12, %c2, %c0_13] : memref<1x38x16xbf16, #tpu.memory_space<vmem>>, vector<1x24x16xbf16>
    %14 = vector.shape_cast %13 : vector<1x24x16xbf16> to vector<24x16xbf16>
    %c2_14 = arith.constant 2 : index
    %c0_15 = arith.constant 0 : index
    %c0_16 = arith.constant 0 : index
    %15 = vector.load %arg2[%c2_14, %c0_15, %c0_16] : memref<9x16x16xbf16, #tpu.memory_space<vmem>>, vector<1x16x16xbf16>
    %16 = vector.shape_cast %15 : vector<1x16x16xbf16> to vector<16x16xbf16>
    %cst_17 = arith.constant dense<0.000000e+00> : vector<24x16xf32>
    %17 = tpu.matmul %14, %16, %cst_17 {dimension_numbers = #tpu.dot_dimension_numbers<[1], [0], [0], [1], [0, 0, 1, 1], [], []>} : vector<24x16xbf16>, vector<16x16xbf16>, vector<24x16xf32> -> vector<24x16xf32>
    %18 = arith.addf %12, %17 : vector<24x16xf32>
    %c0_18 = arith.constant 0 : index
    %c6 = arith.constant 6 : index
    %c0_19 = arith.constant 0 : index
    %19 = vector.load %arg1[%c0_18, %c6, %c0_19] : memref<1x38x16xbf16, #tpu.memory_space<vmem>>, vector<1x24x16xbf16>
    %20 = vector.shape_cast %19 : vector<1x24x16xbf16> to vector<24x16xbf16>
    %c3 = arith.constant 3 : index
    %c0_20 = arith.constant 0 : index
    %c0_21 = arith.constant 0 : index
    %21 = vector.load %arg2[%c3, %c0_20, %c0_21] : memref<9x16x16xbf16, #tpu.memory_space<vmem>>, vector<1x16x16xbf16>
    %22 = vector.shape_cast %21 : vector<1x16x16xbf16> to vector<16x16xbf16>
    %cst_22 = arith.constant dense<0.000000e+00> : vector<24x16xf32>
    %23 = tpu.matmul %20, %22, %cst_22 {dimension_numbers = #tpu.dot_dimension_numbers<[1], [0], [0], [1], [0, 0, 1, 1], [], []>} : vector<24x16xbf16>, vector<16x16xbf16>, vector<24x16xf32> -> vector<24x16xf32>
    %24 = arith.addf %18, %23 : vector<24x16xf32>
    %c0_23 = arith.constant 0 : index
    %c7 = arith.constant 7 : index
    %c0_24 = arith.constant 0 : index
    %25 = vector.load %arg1[%c0_23, %c7, %c0_24] : memref<1x38x16xbf16, #tpu.memory_space<vmem>>, vector<1x24x16xbf16>
    %26 = vector.shape_cast %25 : vector<1x24x16xbf16> to vector<24x16xbf16>
    %c4 = arith.constant 4 : index
    %c0_25 = arith.constant 0 : index
    %c0_26 = arith.constant 0 : index
    %27 = vector.load %arg2[%c4, %c0_25, %c0_26] : memref<9x16x16xbf16, #tpu.memory_space<vmem>>, vector<1x16x16xbf16>
    %28 = vector.shape_cast %27 : vector<1x16x16xbf16> to vector<16x16xbf16>
    %cst_27 = arith.constant dense<0.000000e+00> : vector<24x16xf32>
    %29 = tpu.matmul %26, %28, %cst_27 {dimension_numbers = #tpu.dot_dimension_numbers<[1], [0], [0], [1], [0, 0, 1, 1], [], []>} : vector<24x16xbf16>, vector<16x16xbf16>, vector<24x16xf32> -> vector<24x16xf32>
    %30 = arith.addf %24, %29 : vector<24x16xf32>
    %c0_28 = arith.constant 0 : index
    %c8 = arith.constant 8 : index
    %c0_29 = arith.constant 0 : index
    %31 = vector.load %arg1[%c0_28, %c8, %c0_29] : memref<1x38x16xbf16, #tpu.memory_space<vmem>>, vector<1x24x16xbf16>
    %32 = vector.shape_cast %31 : vector<1x24x16xbf16> to vector<24x16xbf16>
    %c5 = arith.constant 5 : index
    %c0_30 = arith.constant 0 : index
    %c0_31 = arith.constant 0 : index
    %33 = vector.load %arg2[%c5, %c0_30, %c0_31] : memref<9x16x16xbf16, #tpu.memory_space<vmem>>, vector<1x16x16xbf16>
    %34 = vector.shape_cast %33 : vector<1x16x16xbf16> to vector<16x16xbf16>
    %cst_32 = arith.constant dense<0.000000e+00> : vector<24x16xf32>
    %35 = tpu.matmul %32, %34, %cst_32 {dimension_numbers = #tpu.dot_dimension_numbers<[1], [0], [0], [1], [0, 0, 1, 1], [], []>} : vector<24x16xbf16>, vector<16x16xbf16>, vector<24x16xf32> -> vector<24x16xf32>
    %36 = arith.addf %30, %35 : vector<24x16xf32>
    %c0_33 = arith.constant 0 : index
    %c12 = arith.constant 12 : index
    %c0_34 = arith.constant 0 : index
    %37 = vector.load %arg1[%c0_33, %c12, %c0_34] : memref<1x38x16xbf16, #tpu.memory_space<vmem>>, vector<1x24x16xbf16>
    %38 = vector.shape_cast %37 : vector<1x24x16xbf16> to vector<24x16xbf16>
    %c6_35 = arith.constant 6 : index
    %c0_36 = arith.constant 0 : index
    %c0_37 = arith.constant 0 : index
    %39 = vector.load %arg2[%c6_35, %c0_36, %c0_37] : memref<9x16x16xbf16, #tpu.memory_space<vmem>>, vector<1x16x16xbf16>
    %40 = vector.shape_cast %39 : vector<1x16x16xbf16> to vector<16x16xbf16>
    %cst_38 = arith.constant dense<0.000000e+00> : vector<24x16xf32>
    %41 = tpu.matmul %38, %40, %cst_38 {dimension_numbers = #tpu.dot_dimension_numbers<[1], [0], [0], [1], [0, 0, 1, 1], [], []>} : vector<24x16xbf16>, vector<16x16xbf16>, vector<24x16xf32> -> vector<24x16xf32>
    %42 = arith.addf %36, %41 : vector<24x16xf32>
    %c0_39 = arith.constant 0 : index
    %c13 = arith.constant 13 : index
    %c0_40 = arith.constant 0 : index
    %43 = vector.load %arg1[%c0_39, %c13, %c0_40] : memref<1x38x16xbf16, #tpu.memory_space<vmem>>, vector<1x24x16xbf16>
    %44 = vector.shape_cast %43 : vector<1x24x16xbf16> to vector<24x16xbf16>
    %c7_41 = arith.constant 7 : index
    %c0_42 = arith.constant 0 : index
    %c0_43 = arith.constant 0 : index
    %45 = vector.load %arg2[%c7_41, %c0_42, %c0_43] : memref<9x16x16xbf16, #tpu.memory_space<vmem>>, vector<1x16x16xbf16>
    %46 = vector.shape_cast %45 : vector<1x16x16xbf16> to vector<16x16xbf16>
    %cst_44 = arith.constant dense<0.000000e+00> : vector<24x16xf32>
    %47 = tpu.matmul %44, %46, %cst_44 {dimension_numbers = #tpu.dot_dimension_numbers<[1], [0], [0], [1], [0, 0, 1, 1], [], []>} : vector<24x16xbf16>, vector<16x16xbf16>, vector<24x16xf32> -> vector<24x16xf32>
    %48 = arith.addf %42, %47 : vector<24x16xf32>
    %c0_45 = arith.constant 0 : index
    %c14 = arith.constant 14 : index
    %c0_46 = arith.constant 0 : index
    %49 = vector.load %arg1[%c0_45, %c14, %c0_46] : memref<1x38x16xbf16, #tpu.memory_space<vmem>>, vector<1x24x16xbf16>
    %50 = vector.shape_cast %49 : vector<1x24x16xbf16> to vector<24x16xbf16>
    %c8_47 = arith.constant 8 : index
    %c0_48 = arith.constant 0 : index
    %c0_49 = arith.constant 0 : index
    %51 = vector.load %arg2[%c8_47, %c0_48, %c0_49] : memref<9x16x16xbf16, #tpu.memory_space<vmem>>, vector<1x16x16xbf16>
    %52 = vector.shape_cast %51 : vector<1x16x16xbf16> to vector<16x16xbf16>
    %cst_50 = arith.constant dense<0.000000e+00> : vector<24x16xf32>
    %53 = tpu.matmul %50, %52, %cst_50 {dimension_numbers = #tpu.dot_dimension_numbers<[1], [0], [0], [1], [0, 0, 1, 1], [], []>} : vector<24x16xbf16>, vector<16x16xbf16>, vector<24x16xf32> -> vector<24x16xf32>
    %54 = arith.addf %48, %53 : vector<24x16xf32>
    %cst_51 = arith.constant dense<0.000000e+00> : vector<24xf32>
    %55 = vector.multi_reduction <add>, %54, %cst_51 [1] : vector<24x16xf32> to vector<24xf32>
    %56 = vector.shape_cast %55 : vector<24xf32> to vector<24x1xf32>
    %cst_52 = arith.constant 1.600000e+01 : f32
    %57 = vector.broadcast %cst_52 : f32 to vector<24x1xf32>
    %58 = arith.divf %56, %57 : vector<24x1xf32>
    %59 = vector.broadcast %58 : vector<24x1xf32> to vector<24x16xf32>
    %60 = arith.subf %54, %59 : vector<24x16xf32>
    %61 = arith.mulf %60, %60 : vector<24x16xf32>
    %cst_53 = arith.constant dense<0.000000e+00> : vector<24xf32>
    %62 = vector.multi_reduction <add>, %61, %cst_53 [1] : vector<24x16xf32> to vector<24xf32>
    %63 = vector.shape_cast %62 : vector<24xf32> to vector<24x1xf32>
    %cst_54 = arith.constant 1.600000e+01 : f32
    %64 = vector.broadcast %cst_54 : f32 to vector<24x1xf32>
    %65 = arith.divf %63, %64 : vector<24x1xf32>
    %cst_55 = arith.constant 9.99999997E-7 : f32
    %66 = vector.broadcast %cst_55 : f32 to vector<24x1xf32>
    %67 = arith.addf %65, %66 : vector<24x1xf32>
    %68 = math.rsqrt %67 : vector<24x1xf32>
    %69 = vector.broadcast %68 : vector<24x1xf32> to vector<24x16xf32>
    %70 = arith.mulf %60, %69 : vector<24x16xf32>
    %c0_56 = arith.constant 0 : index
    %c0_57 = arith.constant 0 : index
    %71 = vector.load %arg3[%c0_56, %c0_57] : memref<1x16xf32, #tpu.memory_space<vmem>>, vector<1x16xf32>
    %72 = vector.broadcast %71 : vector<1x16xf32> to vector<24x16xf32>
    %73 = arith.mulf %70, %72 : vector<24x16xf32>
    %c0_58 = arith.constant 0 : index
    %c0_59 = arith.constant 0 : index
    %74 = vector.load %arg4[%c0_58, %c0_59] : memref<1x16xf32, #tpu.memory_space<vmem>>, vector<1x16xf32>
    %75 = vector.broadcast %74 : vector<1x16xf32> to vector<24x16xf32>
    %76 = arith.addf %73, %75 : vector<24x16xf32>
    %c0_60 = arith.constant 0 : index
    %c0_61 = arith.constant 0 : index
    %c0_62 = arith.constant 0 : index
    %77 = vector.load %arg5[%c0_60, %c0_61, %c0_62] : memref<1x24x16xf32, #tpu.memory_space<vmem>>, vector<1x24x16xf32>
    %78 = vector.shape_cast %77 : vector<1x24x16xf32> to vector<24x16xf32>
    %79 = vector.shape_cast %76 : vector<24x16xf32> to vector<1x24x16xf32>
    tpu.vector_store %arg5[%c0_60, %c0_61, %c0_62], %79 {strides = array<i32>} : memref<1x24x16xf32, #tpu.memory_space<vmem>>, vector<1x24x16xf32>,
    return
  }
  func.func @transform_0(%arg0: i32) -> (i32, i32, i32) {
    %c0_i32 = arith.constant 0 : i32
    %c0_i32_0 = arith.constant 0 : i32
    %c0_i32_1 = arith.constant 0 : i32
    return %arg0, %c0_i32, %c0_i32_0 : i32, i32, i32
  }
  func.func @transform_1(%arg0: i32) -> (i32, i32, i32) {
    %c0_i32 = arith.constant 0 : i32
    %c0_i32_0 = arith.constant 0 : i32
    %c0_i32_1 = arith.constant 0 : i32
    %c0_i32_2 = arith.constant 0 : i32
    return %c0_i32, %c0_i32_0, %c0_i32_1 : i32, i32, i32
  }
  func.func @transform_2(%arg0: i32) -> (i32, i32) {
    %c0_i32 = arith.constant 0 : i32
    %c0_i32_0 = arith.constant 0 : i32
    %c0_i32_1 = arith.constant 0 : i32
    return %c0_i32, %c0_i32_0 : i32, i32
  }
  func.func @transform_3(%arg0: i32) -> (i32, i32) {
    %c0_i32 = arith.constant 0 : i32
    %c0_i32_0 = arith.constant 0 : i32
    %c0_i32_1 = arith.constant 0 : i32
    return %c0_i32, %c0_i32_0 : i32, i32
  }
  func.func @transform_4(%arg0: i32) -> (i32, i32, i32) {
    %c0_i32 = arith.constant 0 : i32
    %c0_i32_0 = arith.constant 0 : i32
    %c0_i32_1 = arith.constant 0 : i32
    return %arg0, %c0_i32, %c0_i32_0 : i32, i32, i32
  }
}

module attributes {stable_mosaic.version = 11 : i64} {
  func.func @_mm_lnout_kernel(%arg0: i32, %arg1: memref<8x32xbf16, #tpu.memory_space<vmem>>, %arg2: memref<32x16xbf16, #tpu.memory_space<vmem>>, %arg3: memref<1x16xf32, #tpu.memory_space<vmem>>, %arg4: memref<1x16xf32, #tpu.memory_space<vmem>>, %arg5: memref<8x16xbf16, #tpu.memory_space<vmem>>) attributes {dimension_semantics = [#tpu.dimension_semantics<parallel>], iteration_bounds = array<i64: 1>, scalar_prefetch = 0 : i64, scratch_operands = 0 : i64, tpu.core_type = #tpu.core_type<tc>, window_params = [{transform_indices = @transform_0, window_bounds = array<i64: 8, 32>}, {pipeline_mode = #tpu.pipeline_mode<synchronous>, transform_indices = @transform_1, window_bounds = array<i64: 32, 16>}, {pipeline_mode = #tpu.pipeline_mode<synchronous>, transform_indices = @transform_2, window_bounds = array<i64: 1, 16>}, {pipeline_mode = #tpu.pipeline_mode<synchronous>, transform_indices = @transform_3, window_bounds = array<i64: 1, 16>}, {transform_indices = @transform_4, window_bounds = array<i64: 8, 16>}]} {
    %c0 = arith.constant 0 : index
    %c0_0 = arith.constant 0 : index
    %0 = vector.load %arg1[%c0, %c0_0] : memref<8x32xbf16, #tpu.memory_space<vmem>>, vector<8x32xbf16>
    %c0_1 = arith.constant 0 : index
    %c0_2 = arith.constant 0 : index
    %1 = vector.load %arg2[%c0_1, %c0_2] : memref<32x16xbf16, #tpu.memory_space<vmem>>, vector<32x16xbf16>
    %cst = arith.constant dense<0.000000e+00> : vector<8x16xf32>
    %2 = tpu.matmul %0, %1, %cst {dimension_numbers = #tpu.dot_dimension_numbers<[1], [0], [0], [1], [0, 0, 1, 1], [], []>} : vector<8x32xbf16>, vector<32x16xbf16>, vector<8x16xf32> -> vector<8x16xf32>
    %cst_3 = arith.constant dense<0.000000e+00> : vector<8xf32>
    %3 = vector.multi_reduction <add>, %2, %cst_3 [1] : vector<8x16xf32> to vector<8xf32>
    %4 = vector.shape_cast %3 : vector<8xf32> to vector<8x1xf32>
    %cst_4 = arith.constant 1.600000e+01 : f32
    %5 = vector.broadcast %cst_4 : f32 to vector<8x1xf32>
    %6 = arith.divf %4, %5 : vector<8x1xf32>
    %7 = vector.broadcast %6 : vector<8x1xf32> to vector<8x16xf32>
    %8 = arith.subf %2, %7 : vector<8x16xf32>
    %9 = arith.mulf %8, %8 : vector<8x16xf32>
    %cst_5 = arith.constant dense<0.000000e+00> : vector<8xf32>
    %10 = vector.multi_reduction <add>, %9, %cst_5 [1] : vector<8x16xf32> to vector<8xf32>
    %11 = vector.shape_cast %10 : vector<8xf32> to vector<8x1xf32>
    %cst_6 = arith.constant 1.600000e+01 : f32
    %12 = vector.broadcast %cst_6 : f32 to vector<8x1xf32>
    %13 = arith.divf %11, %12 : vector<8x1xf32>
    %cst_7 = arith.constant 9.99999997E-7 : f32
    %14 = vector.broadcast %cst_7 : f32 to vector<8x1xf32>
    %15 = arith.addf %13, %14 : vector<8x1xf32>
    %16 = math.rsqrt %15 : vector<8x1xf32>
    %17 = vector.broadcast %16 : vector<8x1xf32> to vector<8x16xf32>
    %18 = arith.mulf %8, %17 : vector<8x16xf32>
    %c0_8 = arith.constant 0 : index
    %c0_9 = arith.constant 0 : index
    %19 = vector.load %arg3[%c0_8, %c0_9] : memref<1x16xf32, #tpu.memory_space<vmem>>, vector<1x16xf32>
    %20 = vector.broadcast %19 : vector<1x16xf32> to vector<8x16xf32>
    %21 = arith.mulf %18, %20 : vector<8x16xf32>
    %c0_10 = arith.constant 0 : index
    %c0_11 = arith.constant 0 : index
    %22 = vector.load %arg4[%c0_10, %c0_11] : memref<1x16xf32, #tpu.memory_space<vmem>>, vector<1x16xf32>
    %23 = vector.broadcast %22 : vector<1x16xf32> to vector<8x16xf32>
    %24 = arith.addf %21, %23 : vector<8x16xf32>
    %25 = arith.truncf %24 : vector<8x16xf32> to vector<8x16xbf16>
    %c0_12 = arith.constant 0 : index
    %c0_13 = arith.constant 0 : index
    %26 = vector.load %arg5[%c0_12, %c0_13] : memref<8x16xbf16, #tpu.memory_space<vmem>>, vector<8x16xbf16>
    tpu.vector_store %arg5[%c0_12, %c0_13], %25 {strides = array<i32>} : memref<8x16xbf16, #tpu.memory_space<vmem>>, vector<8x16xbf16>,
    return
  }
  func.func @transform_0(%arg0: i32) -> (i32, i32) {
    %c0_i32 = arith.constant 0 : i32
    %c0_i32_0 = arith.constant 0 : i32
    return %arg0, %c0_i32 : i32, i32
  }
  func.func @transform_1(%arg0: i32) -> (i32, i32) {
    %c0_i32 = arith.constant 0 : i32
    %c0_i32_0 = arith.constant 0 : i32
    %c0_i32_1 = arith.constant 0 : i32
    return %c0_i32, %c0_i32_0 : i32, i32
  }
  func.func @transform_2(%arg0: i32) -> (i32, i32) {
    %c0_i32 = arith.constant 0 : i32
    %c0_i32_0 = arith.constant 0 : i32
    %c0_i32_1 = arith.constant 0 : i32
    return %c0_i32, %c0_i32_0 : i32, i32
  }
  func.func @transform_3(%arg0: i32) -> (i32, i32) {
    %c0_i32 = arith.constant 0 : i32
    %c0_i32_0 = arith.constant 0 : i32
    %c0_i32_1 = arith.constant 0 : i32
    return %c0_i32, %c0_i32_0 : i32, i32
  }
  func.func @transform_4(%arg0: i32) -> (i32, i32) {
    %c0_i32 = arith.constant 0 : i32
    %c0_i32_0 = arith.constant 0 : i32
    return %arg0, %c0_i32 : i32, i32
  }
}

module attributes {stable_mosaic.version = 11 : i64} {
  func.func @_conv3x3_ln_kernel(%arg0: i32, %arg1: memref<1x18x16xbf16, #tpu.memory_space<vmem>>, %arg2: memref<9x16x16xbf16, #tpu.memory_space<vmem>>, %arg3: memref<1x16xf32, #tpu.memory_space<vmem>>, %arg4: memref<1x16xf32, #tpu.memory_space<vmem>>, %arg5: memref<1x8x16xf32, #tpu.memory_space<vmem>>) attributes {dimension_semantics = [#tpu.dimension_semantics<parallel>], iteration_bounds = array<i64: 2>, scalar_prefetch = 0 : i64, scratch_operands = 0 : i64, tpu.core_type = #tpu.core_type<tc>, window_params = [{transform_indices = @transform_0, window_bounds = array<i64: 1, 18, 16>}, {pipeline_mode = #tpu.pipeline_mode<synchronous>, transform_indices = @transform_1, window_bounds = array<i64: 9, 16, 16>}, {pipeline_mode = #tpu.pipeline_mode<synchronous>, transform_indices = @transform_2, window_bounds = array<i64: 1, 16>}, {pipeline_mode = #tpu.pipeline_mode<synchronous>, transform_indices = @transform_3, window_bounds = array<i64: 1, 16>}, {transform_indices = @transform_4, window_bounds = array<i64: 1, 8, 16>}]} {
    %cst = arith.constant 0.000000e+00 : f32
    %0 = vector.broadcast %cst : f32 to vector<8x16xf32>
    %c0 = arith.constant 0 : index
    %c0_0 = arith.constant 0 : index
    %c0_1 = arith.constant 0 : index
    %1 = vector.load %arg1[%c0, %c0_0, %c0_1] : memref<1x18x16xbf16, #tpu.memory_space<vmem>>, vector<1x8x16xbf16>
    %2 = vector.shape_cast %1 : vector<1x8x16xbf16> to vector<8x16xbf16>
    %c0_2 = arith.constant 0 : index
    %c0_3 = arith.constant 0 : index
    %c0_4 = arith.constant 0 : index
    %3 = vector.load %arg2[%c0_2, %c0_3, %c0_4] : memref<9x16x16xbf16, #tpu.memory_space<vmem>>, vector<1x16x16xbf16>
    %4 = vector.shape_cast %3 : vector<1x16x16xbf16> to vector<16x16xbf16>
    %cst_5 = arith.constant dense<0.000000e+00> : vector<8x16xf32>
    %5 = tpu.matmul %2, %4, %cst_5 {dimension_numbers = #tpu.dot_dimension_numbers<[1], [0], [0], [1], [0, 0, 1, 1], [], []>} : vector<8x16xbf16>, vector<16x16xbf16>, vector<8x16xf32> -> vector<8x16xf32>
    %6 = arith.addf %0, %5 : vector<8x16xf32>
    %c0_6 = arith.constant 0 : index
    %c1 = arith.constant 1 : index
    %c0_7 = arith.constant 0 : index
    %7 = vector.load %arg1[%c0_6, %c1, %c0_7] : memref<1x18x16xbf16, #tpu.memory_space<vmem>>, vector<1x8x16xbf16>
    %8 = vector.shape_cast %7 : vector<1x8x16xbf16> to vector<8x16xbf16>
    %c1_8 = arith.constant 1 : index
    %c0_9 = arith.constant 0 : index
    %c0_10 = arith.constant 0 : index
    %9 = vector.load %arg2[%c1_8, %c0_9, %c0_10] : memref<9x16x16xbf16, #tpu.memory_space<vmem>>, vector<1x16x16xbf16>
    %10 = vector.shape_cast %9 : vector<1x16x16xbf16> to vector<16x16xbf16>
    %cst_11 = arith.constant dense<0.000000e+00> : vector<8x16xf32>
    %11 = tpu.matmul %8, %10, %cst_11 {dimension_numbers = #tpu.dot_dimension_numbers<[1], [0], [0], [1], [0, 0, 1, 1], [], []>} : vector<8x16xbf16>, vector<16x16xbf16>, vector<8x16xf32> -> vector<8x16xf32>
    %12 = arith.addf %6, %11 : vector<8x16xf32>
    %c0_12 = arith.constant 0 : index
    %c2 = arith.constant 2 : index
    %c0_13 = arith.constant 0 : index
    %13 = vector.load %arg1[%c0_12, %c2, %c0_13] : memref<1x18x16xbf16, #tpu.memory_space<vmem>>, vector<1x8x16xbf16>
    %14 = vector.shape_cast %13 : vector<1x8x16xbf16> to vector<8x16xbf16>
    %c2_14 = arith.constant 2 : index
    %c0_15 = arith.constant 0 : index
    %c0_16 = arith.constant 0 : index
    %15 = vector.load %arg2[%c2_14, %c0_15, %c0_16] : memref<9x16x16xbf16, #tpu.memory_space<vmem>>, vector<1x16x16xbf16>
    %16 = vector.shape_cast %15 : vector<1x16x16xbf16> to vector<16x16xbf16>
    %cst_17 = arith.constant dense<0.000000e+00> : vector<8x16xf32>
    %17 = tpu.matmul %14, %16, %cst_17 {dimension_numbers = #tpu.dot_dimension_numbers<[1], [0], [0], [1], [0, 0, 1, 1], [], []>} : vector<8x16xbf16>, vector<16x16xbf16>, vector<8x16xf32> -> vector<8x16xf32>
    %18 = arith.addf %12, %17 : vector<8x16xf32>
    %c0_18 = arith.constant 0 : index
    %c4 = arith.constant 4 : index
    %c0_19 = arith.constant 0 : index
    %19 = vector.load %arg1[%c0_18, %c4, %c0_19] : memref<1x18x16xbf16, #tpu.memory_space<vmem>>, vector<1x8x16xbf16>
    %20 = vector.shape_cast %19 : vector<1x8x16xbf16> to vector<8x16xbf16>
    %c3 = arith.constant 3 : index
    %c0_20 = arith.constant 0 : index
    %c0_21 = arith.constant 0 : index
    %21 = vector.load %arg2[%c3, %c0_20, %c0_21] : memref<9x16x16xbf16, #tpu.memory_space<vmem>>, vector<1x16x16xbf16>
    %22 = vector.shape_cast %21 : vector<1x16x16xbf16> to vector<16x16xbf16>
    %cst_22 = arith.constant dense<0.000000e+00> : vector<8x16xf32>
    %23 = tpu.matmul %20, %22, %cst_22 {dimension_numbers = #tpu.dot_dimension_numbers<[1], [0], [0], [1], [0, 0, 1, 1], [], []>} : vector<8x16xbf16>, vector<16x16xbf16>, vector<8x16xf32> -> vector<8x16xf32>
    %24 = arith.addf %18, %23 : vector<8x16xf32>
    %c0_23 = arith.constant 0 : index
    %c5 = arith.constant 5 : index
    %c0_24 = arith.constant 0 : index
    %25 = vector.load %arg1[%c0_23, %c5, %c0_24] : memref<1x18x16xbf16, #tpu.memory_space<vmem>>, vector<1x8x16xbf16>
    %26 = vector.shape_cast %25 : vector<1x8x16xbf16> to vector<8x16xbf16>
    %c4_25 = arith.constant 4 : index
    %c0_26 = arith.constant 0 : index
    %c0_27 = arith.constant 0 : index
    %27 = vector.load %arg2[%c4_25, %c0_26, %c0_27] : memref<9x16x16xbf16, #tpu.memory_space<vmem>>, vector<1x16x16xbf16>
    %28 = vector.shape_cast %27 : vector<1x16x16xbf16> to vector<16x16xbf16>
    %cst_28 = arith.constant dense<0.000000e+00> : vector<8x16xf32>
    %29 = tpu.matmul %26, %28, %cst_28 {dimension_numbers = #tpu.dot_dimension_numbers<[1], [0], [0], [1], [0, 0, 1, 1], [], []>} : vector<8x16xbf16>, vector<16x16xbf16>, vector<8x16xf32> -> vector<8x16xf32>
    %30 = arith.addf %24, %29 : vector<8x16xf32>
    %c0_29 = arith.constant 0 : index
    %c6 = arith.constant 6 : index
    %c0_30 = arith.constant 0 : index
    %31 = vector.load %arg1[%c0_29, %c6, %c0_30] : memref<1x18x16xbf16, #tpu.memory_space<vmem>>, vector<1x8x16xbf16>
    %32 = vector.shape_cast %31 : vector<1x8x16xbf16> to vector<8x16xbf16>
    %c5_31 = arith.constant 5 : index
    %c0_32 = arith.constant 0 : index
    %c0_33 = arith.constant 0 : index
    %33 = vector.load %arg2[%c5_31, %c0_32, %c0_33] : memref<9x16x16xbf16, #tpu.memory_space<vmem>>, vector<1x16x16xbf16>
    %34 = vector.shape_cast %33 : vector<1x16x16xbf16> to vector<16x16xbf16>
    %cst_34 = arith.constant dense<0.000000e+00> : vector<8x16xf32>
    %35 = tpu.matmul %32, %34, %cst_34 {dimension_numbers = #tpu.dot_dimension_numbers<[1], [0], [0], [1], [0, 0, 1, 1], [], []>} : vector<8x16xbf16>, vector<16x16xbf16>, vector<8x16xf32> -> vector<8x16xf32>
    %36 = arith.addf %30, %35 : vector<8x16xf32>
    %c0_35 = arith.constant 0 : index
    %c8 = arith.constant 8 : index
    %c0_36 = arith.constant 0 : index
    %37 = vector.load %arg1[%c0_35, %c8, %c0_36] : memref<1x18x16xbf16, #tpu.memory_space<vmem>>, vector<1x8x16xbf16>
    %38 = vector.shape_cast %37 : vector<1x8x16xbf16> to vector<8x16xbf16>
    %c6_37 = arith.constant 6 : index
    %c0_38 = arith.constant 0 : index
    %c0_39 = arith.constant 0 : index
    %39 = vector.load %arg2[%c6_37, %c0_38, %c0_39] : memref<9x16x16xbf16, #tpu.memory_space<vmem>>, vector<1x16x16xbf16>
    %40 = vector.shape_cast %39 : vector<1x16x16xbf16> to vector<16x16xbf16>
    %cst_40 = arith.constant dense<0.000000e+00> : vector<8x16xf32>
    %41 = tpu.matmul %38, %40, %cst_40 {dimension_numbers = #tpu.dot_dimension_numbers<[1], [0], [0], [1], [0, 0, 1, 1], [], []>} : vector<8x16xbf16>, vector<16x16xbf16>, vector<8x16xf32> -> vector<8x16xf32>
    %42 = arith.addf %36, %41 : vector<8x16xf32>
    %c0_41 = arith.constant 0 : index
    %c9 = arith.constant 9 : index
    %c0_42 = arith.constant 0 : index
    %43 = vector.load %arg1[%c0_41, %c9, %c0_42] : memref<1x18x16xbf16, #tpu.memory_space<vmem>>, vector<1x8x16xbf16>
    %44 = vector.shape_cast %43 : vector<1x8x16xbf16> to vector<8x16xbf16>
    %c7 = arith.constant 7 : index
    %c0_43 = arith.constant 0 : index
    %c0_44 = arith.constant 0 : index
    %45 = vector.load %arg2[%c7, %c0_43, %c0_44] : memref<9x16x16xbf16, #tpu.memory_space<vmem>>, vector<1x16x16xbf16>
    %46 = vector.shape_cast %45 : vector<1x16x16xbf16> to vector<16x16xbf16>
    %cst_45 = arith.constant dense<0.000000e+00> : vector<8x16xf32>
    %47 = tpu.matmul %44, %46, %cst_45 {dimension_numbers = #tpu.dot_dimension_numbers<[1], [0], [0], [1], [0, 0, 1, 1], [], []>} : vector<8x16xbf16>, vector<16x16xbf16>, vector<8x16xf32> -> vector<8x16xf32>
    %48 = arith.addf %42, %47 : vector<8x16xf32>
    %c0_46 = arith.constant 0 : index
    %c10 = arith.constant 10 : index
    %c0_47 = arith.constant 0 : index
    %49 = vector.load %arg1[%c0_46, %c10, %c0_47] : memref<1x18x16xbf16, #tpu.memory_space<vmem>>, vector<1x8x16xbf16>
    %50 = vector.shape_cast %49 : vector<1x8x16xbf16> to vector<8x16xbf16>
    %c8_48 = arith.constant 8 : index
    %c0_49 = arith.constant 0 : index
    %c0_50 = arith.constant 0 : index
    %51 = vector.load %arg2[%c8_48, %c0_49, %c0_50] : memref<9x16x16xbf16, #tpu.memory_space<vmem>>, vector<1x16x16xbf16>
    %52 = vector.shape_cast %51 : vector<1x16x16xbf16> to vector<16x16xbf16>
    %cst_51 = arith.constant dense<0.000000e+00> : vector<8x16xf32>
    %53 = tpu.matmul %50, %52, %cst_51 {dimension_numbers = #tpu.dot_dimension_numbers<[1], [0], [0], [1], [0, 0, 1, 1], [], []>} : vector<8x16xbf16>, vector<16x16xbf16>, vector<8x16xf32> -> vector<8x16xf32>
    %54 = arith.addf %48, %53 : vector<8x16xf32>
    %cst_52 = arith.constant dense<0.000000e+00> : vector<8xf32>
    %55 = vector.multi_reduction <add>, %54, %cst_52 [1] : vector<8x16xf32> to vector<8xf32>
    %56 = vector.shape_cast %55 : vector<8xf32> to vector<8x1xf32>
    %cst_53 = arith.constant 1.600000e+01 : f32
    %57 = vector.broadcast %cst_53 : f32 to vector<8x1xf32>
    %58 = arith.divf %56, %57 : vector<8x1xf32>
    %59 = vector.broadcast %58 : vector<8x1xf32> to vector<8x16xf32>
    %60 = arith.subf %54, %59 : vector<8x16xf32>
    %61 = arith.mulf %60, %60 : vector<8x16xf32>
    %cst_54 = arith.constant dense<0.000000e+00> : vector<8xf32>
    %62 = vector.multi_reduction <add>, %61, %cst_54 [1] : vector<8x16xf32> to vector<8xf32>
    %63 = vector.shape_cast %62 : vector<8xf32> to vector<8x1xf32>
    %cst_55 = arith.constant 1.600000e+01 : f32
    %64 = vector.broadcast %cst_55 : f32 to vector<8x1xf32>
    %65 = arith.divf %63, %64 : vector<8x1xf32>
    %cst_56 = arith.constant 9.99999997E-7 : f32
    %66 = vector.broadcast %cst_56 : f32 to vector<8x1xf32>
    %67 = arith.addf %65, %66 : vector<8x1xf32>
    %68 = math.rsqrt %67 : vector<8x1xf32>
    %69 = vector.broadcast %68 : vector<8x1xf32> to vector<8x16xf32>
    %70 = arith.mulf %60, %69 : vector<8x16xf32>
    %c0_57 = arith.constant 0 : index
    %c0_58 = arith.constant 0 : index
    %71 = vector.load %arg3[%c0_57, %c0_58] : memref<1x16xf32, #tpu.memory_space<vmem>>, vector<1x16xf32>
    %72 = vector.broadcast %71 : vector<1x16xf32> to vector<8x16xf32>
    %73 = arith.mulf %70, %72 : vector<8x16xf32>
    %c0_59 = arith.constant 0 : index
    %c0_60 = arith.constant 0 : index
    %74 = vector.load %arg4[%c0_59, %c0_60] : memref<1x16xf32, #tpu.memory_space<vmem>>, vector<1x16xf32>
    %75 = vector.broadcast %74 : vector<1x16xf32> to vector<8x16xf32>
    %76 = arith.addf %73, %75 : vector<8x16xf32>
    %c0_61 = arith.constant 0 : index
    %c0_62 = arith.constant 0 : index
    %c0_63 = arith.constant 0 : index
    %77 = vector.load %arg5[%c0_61, %c0_62, %c0_63] : memref<1x8x16xf32, #tpu.memory_space<vmem>>, vector<1x8x16xf32>
    %78 = vector.shape_cast %77 : vector<1x8x16xf32> to vector<8x16xf32>
    %79 = vector.shape_cast %76 : vector<8x16xf32> to vector<1x8x16xf32>
    tpu.vector_store %arg5[%c0_61, %c0_62, %c0_63], %79 {strides = array<i32>} : memref<1x8x16xf32, #tpu.memory_space<vmem>>, vector<1x8x16xf32>,
    return
  }
  func.func @transform_0(%arg0: i32) -> (i32, i32, i32) {
    %c0_i32 = arith.constant 0 : i32
    %c0_i32_0 = arith.constant 0 : i32
    %c0_i32_1 = arith.constant 0 : i32
    return %arg0, %c0_i32, %c0_i32_0 : i32, i32, i32
  }
  func.func @transform_1(%arg0: i32) -> (i32, i32, i32) {
    %c0_i32 = arith.constant 0 : i32
    %c0_i32_0 = arith.constant 0 : i32
    %c0_i32_1 = arith.constant 0 : i32
    %c0_i32_2 = arith.constant 0 : i32
    return %c0_i32, %c0_i32_0, %c0_i32_1 : i32, i32, i32
  }
  func.func @transform_2(%arg0: i32) -> (i32, i32) {
    %c0_i32 = arith.constant 0 : i32
    %c0_i32_0 = arith.constant 0 : i32
    %c0_i32_1 = arith.constant 0 : i32
    return %c0_i32, %c0_i32_0 : i32, i32
  }
  func.func @transform_3(%arg0: i32) -> (i32, i32) {
    %c0_i32 = arith.constant 0 : i32
    %c0_i32_0 = arith.constant 0 : i32
    %c0_i32_1 = arith.constant 0 : i32
    return %c0_i32, %c0_i32_0 : i32, i32
  }
  func.func @transform_4(%arg0: i32) -> (i32, i32, i32) {
    %c0_i32 = arith.constant 0 : i32
    %c0_i32_0 = arith.constant 0 : i32
    %c0_i32_1 = arith.constant 0 : i32
    return %arg0, %c0_i32, %c0_i32_0 : i32, i32, i32
  }
}

module attributes {stable_mosaic.version = 11 : i64} {
  func.func @_conv3x3_ln_kernel(%arg0: i32, %arg1: memref<1x11x16xbf16, #tpu.memory_space<vmem>>, %arg2: memref<9x16x16xbf16, #tpu.memory_space<vmem>>, %arg3: memref<1x16xf32, #tpu.memory_space<vmem>>, %arg4: memref<1x16xf32, #tpu.memory_space<vmem>>, %arg5: memref<1x3x16xf32, #tpu.memory_space<vmem>>) attributes {dimension_semantics = [#tpu.dimension_semantics<parallel>], iteration_bounds = array<i64: 2>, scalar_prefetch = 0 : i64, scratch_operands = 0 : i64, tpu.core_type = #tpu.core_type<tc>, window_params = [{transform_indices = @transform_0, window_bounds = array<i64: 1, 11, 16>}, {pipeline_mode = #tpu.pipeline_mode<synchronous>, transform_indices = @transform_1, window_bounds = array<i64: 9, 16, 16>}, {pipeline_mode = #tpu.pipeline_mode<synchronous>, transform_indices = @transform_2, window_bounds = array<i64: 1, 16>}, {pipeline_mode = #tpu.pipeline_mode<synchronous>, transform_indices = @transform_3, window_bounds = array<i64: 1, 16>}, {transform_indices = @transform_4, window_bounds = array<i64: 1, 3, 16>}]} {
    %cst = arith.constant 0.000000e+00 : f32
    %0 = vector.broadcast %cst : f32 to vector<3x16xf32>
    %c0 = arith.constant 0 : index
    %c0_0 = arith.constant 0 : index
    %c0_1 = arith.constant 0 : index
    %1 = vector.load %arg1[%c0, %c0_0, %c0_1] : memref<1x11x16xbf16, #tpu.memory_space<vmem>>, vector<1x3x16xbf16>
    %2 = vector.shape_cast %1 : vector<1x3x16xbf16> to vector<3x16xbf16>
    %c0_2 = arith.constant 0 : index
    %c0_3 = arith.constant 0 : index
    %c0_4 = arith.constant 0 : index
    %3 = vector.load %arg2[%c0_2, %c0_3, %c0_4] : memref<9x16x16xbf16, #tpu.memory_space<vmem>>, vector<1x16x16xbf16>
    %4 = vector.shape_cast %3 : vector<1x16x16xbf16> to vector<16x16xbf16>
    %cst_5 = arith.constant dense<0.000000e+00> : vector<3x16xf32>
    %5 = tpu.matmul %2, %4, %cst_5 {dimension_numbers = #tpu.dot_dimension_numbers<[1], [0], [0], [1], [0, 0, 1, 1], [], []>} : vector<3x16xbf16>, vector<16x16xbf16>, vector<3x16xf32> -> vector<3x16xf32>
    %6 = arith.addf %0, %5 : vector<3x16xf32>
    %c0_6 = arith.constant 0 : index
    %c1 = arith.constant 1 : index
    %c0_7 = arith.constant 0 : index
    %7 = vector.load %arg1[%c0_6, %c1, %c0_7] : memref<1x11x16xbf16, #tpu.memory_space<vmem>>, vector<1x3x16xbf16>
    %8 = vector.shape_cast %7 : vector<1x3x16xbf16> to vector<3x16xbf16>
    %c1_8 = arith.constant 1 : index
    %c0_9 = arith.constant 0 : index
    %c0_10 = arith.constant 0 : index
    %9 = vector.load %arg2[%c1_8, %c0_9, %c0_10] : memref<9x16x16xbf16, #tpu.memory_space<vmem>>, vector<1x16x16xbf16>
    %10 = vector.shape_cast %9 : vector<1x16x16xbf16> to vector<16x16xbf16>
    %cst_11 = arith.constant dense<0.000000e+00> : vector<3x16xf32>
    %11 = tpu.matmul %8, %10, %cst_11 {dimension_numbers = #tpu.dot_dimension_numbers<[1], [0], [0], [1], [0, 0, 1, 1], [], []>} : vector<3x16xbf16>, vector<16x16xbf16>, vector<3x16xf32> -> vector<3x16xf32>
    %12 = arith.addf %6, %11 : vector<3x16xf32>
    %c0_12 = arith.constant 0 : index
    %c2 = arith.constant 2 : index
    %c0_13 = arith.constant 0 : index
    %13 = vector.load %arg1[%c0_12, %c2, %c0_13] : memref<1x11x16xbf16, #tpu.memory_space<vmem>>, vector<1x3x16xbf16>
    %14 = vector.shape_cast %13 : vector<1x3x16xbf16> to vector<3x16xbf16>
    %c2_14 = arith.constant 2 : index
    %c0_15 = arith.constant 0 : index
    %c0_16 = arith.constant 0 : index
    %15 = vector.load %arg2[%c2_14, %c0_15, %c0_16] : memref<9x16x16xbf16, #tpu.memory_space<vmem>>, vector<1x16x16xbf16>
    %16 = vector.shape_cast %15 : vector<1x16x16xbf16> to vector<16x16xbf16>
    %cst_17 = arith.constant dense<0.000000e+00> : vector<3x16xf32>
    %17 = tpu.matmul %14, %16, %cst_17 {dimension_numbers = #tpu.dot_dimension_numbers<[1], [0], [0], [1], [0, 0, 1, 1], [], []>} : vector<3x16xbf16>, vector<16x16xbf16>, vector<3x16xf32> -> vector<3x16xf32>
    %18 = arith.addf %12, %17 : vector<3x16xf32>
    %c0_18 = arith.constant 0 : index
    %c3 = arith.constant 3 : index
    %c0_19 = arith.constant 0 : index
    %19 = vector.load %arg1[%c0_18, %c3, %c0_19] : memref<1x11x16xbf16, #tpu.memory_space<vmem>>, vector<1x3x16xbf16>
    %20 = vector.shape_cast %19 : vector<1x3x16xbf16> to vector<3x16xbf16>
    %c3_20 = arith.constant 3 : index
    %c0_21 = arith.constant 0 : index
    %c0_22 = arith.constant 0 : index
    %21 = vector.load %arg2[%c3_20, %c0_21, %c0_22] : memref<9x16x16xbf16, #tpu.memory_space<vmem>>, vector<1x16x16xbf16>
    %22 = vector.shape_cast %21 : vector<1x16x16xbf16> to vector<16x16xbf16>
    %cst_23 = arith.constant dense<0.000000e+00> : vector<3x16xf32>
    %23 = tpu.matmul %20, %22, %cst_23 {dimension_numbers = #tpu.dot_dimension_numbers<[1], [0], [0], [1], [0, 0, 1, 1], [], []>} : vector<3x16xbf16>, vector<16x16xbf16>, vector<3x16xf32> -> vector<3x16xf32>
    %24 = arith.addf %18, %23 : vector<3x16xf32>
    %c0_24 = arith.constant 0 : index
    %c4 = arith.constant 4 : index
    %c0_25 = arith.constant 0 : index
    %25 = vector.load %arg1[%c0_24, %c4, %c0_25] : memref<1x11x16xbf16, #tpu.memory_space<vmem>>, vector<1x3x16xbf16>
    %26 = vector.shape_cast %25 : vector<1x3x16xbf16> to vector<3x16xbf16>
    %c4_26 = arith.constant 4 : index
    %c0_27 = arith.constant 0 : index
    %c0_28 = arith.constant 0 : index
    %27 = vector.load %arg2[%c4_26, %c0_27, %c0_28] : memref<9x16x16xbf16, #tpu.memory_space<vmem>>, vector<1x16x16xbf16>
    %28 = vector.shape_cast %27 : vector<1x16x16xbf16> to vector<16x16xbf16>
    %cst_29 = arith.constant dense<0.000000e+00> : vector<3x16xf32>
    %29 = tpu.matmul %26, %28, %cst_29 {dimension_numbers = #tpu.dot_dimension_numbers<[1], [0], [0], [1], [0, 0, 1, 1], [], []>} : vector<3x16xbf16>, vector<16x16xbf16>, vector<3x16xf32> -> vector<3x16xf32>
    %30 = arith.addf %24, %29 : vector<3x16xf32>
    %c0_30 = arith.constant 0 : index
    %c5 = arith.constant 5 : index
    %c0_31 = arith.constant 0 : index
    %31 = vector.load %arg1[%c0_30, %c5, %c0_31] : memref<1x11x16xbf16, #tpu.memory_space<vmem>>, vector<1x3x16xbf16>
    %32 = vector.shape_cast %31 : vector<1x3x16xbf16> to vector<3x16xbf16>
    %c5_32 = arith.constant 5 : index
    %c0_33 = arith.constant 0 : index
    %c0_34 = arith.constant 0 : index
    %33 = vector.load %arg2[%c5_32, %c0_33, %c0_34] : memref<9x16x16xbf16, #tpu.memory_space<vmem>>, vector<1x16x16xbf16>
    %34 = vector.shape_cast %33 : vector<1x16x16xbf16> to vector<16x16xbf16>
    %cst_35 = arith.constant dense<0.000000e+00> : vector<3x16xf32>
    %35 = tpu.matmul %32, %34, %cst_35 {dimension_numbers = #tpu.dot_dimension_numbers<[1], [0], [0], [1], [0, 0, 1, 1], [], []>} : vector<3x16xbf16>, vector<16x16xbf16>, vector<3x16xf32> -> vector<3x16xf32>
    %36 = arith.addf %30, %35 : vector<3x16xf32>
    %c0_36 = arith.constant 0 : index
    %c6 = arith.constant 6 : index
    %c0_37 = arith.constant 0 : index
    %37 = vector.load %arg1[%c0_36, %c6, %c0_37] : memref<1x11x16xbf16, #tpu.memory_space<vmem>>, vector<1x3x16xbf16>
    %38 = vector.shape_cast %37 : vector<1x3x16xbf16> to vector<3x16xbf16>
    %c6_38 = arith.constant 6 : index
    %c0_39 = arith.constant 0 : index
    %c0_40 = arith.constant 0 : index
    %39 = vector.load %arg2[%c6_38, %c0_39, %c0_40] : memref<9x16x16xbf16, #tpu.memory_space<vmem>>, vector<1x16x16xbf16>
    %40 = vector.shape_cast %39 : vector<1x16x16xbf16> to vector<16x16xbf16>
    %cst_41 = arith.constant dense<0.000000e+00> : vector<3x16xf32>
    %41 = tpu.matmul %38, %40, %cst_41 {dimension_numbers = #tpu.dot_dimension_numbers<[1], [0], [0], [1], [0, 0, 1, 1], [], []>} : vector<3x16xbf16>, vector<16x16xbf16>, vector<3x16xf32> -> vector<3x16xf32>
    %42 = arith.addf %36, %41 : vector<3x16xf32>
    %c0_42 = arith.constant 0 : index
    %c7 = arith.constant 7 : index
    %c0_43 = arith.constant 0 : index
    %43 = vector.load %arg1[%c0_42, %c7, %c0_43] : memref<1x11x16xbf16, #tpu.memory_space<vmem>>, vector<1x3x16xbf16>
    %44 = vector.shape_cast %43 : vector<1x3x16xbf16> to vector<3x16xbf16>
    %c7_44 = arith.constant 7 : index
    %c0_45 = arith.constant 0 : index
    %c0_46 = arith.constant 0 : index
    %45 = vector.load %arg2[%c7_44, %c0_45, %c0_46] : memref<9x16x16xbf16, #tpu.memory_space<vmem>>, vector<1x16x16xbf16>
    %46 = vector.shape_cast %45 : vector<1x16x16xbf16> to vector<16x16xbf16>
    %cst_47 = arith.constant dense<0.000000e+00> : vector<3x16xf32>
    %47 = tpu.matmul %44, %46, %cst_47 {dimension_numbers = #tpu.dot_dimension_numbers<[1], [0], [0], [1], [0, 0, 1, 1], [], []>} : vector<3x16xbf16>, vector<16x16xbf16>, vector<3x16xf32> -> vector<3x16xf32>
    %48 = arith.addf %42, %47 : vector<3x16xf32>
    %c0_48 = arith.constant 0 : index
    %c8 = arith.constant 8 : index
    %c0_49 = arith.constant 0 : index
    %49 = vector.load %arg1[%c0_48, %c8, %c0_49] : memref<1x11x16xbf16, #tpu.memory_space<vmem>>, vector<1x3x16xbf16>
    %50 = vector.shape_cast %49 : vector<1x3x16xbf16> to vector<3x16xbf16>
    %c8_50 = arith.constant 8 : index
    %c0_51 = arith.constant 0 : index
    %c0_52 = arith.constant 0 : index
    %51 = vector.load %arg2[%c8_50, %c0_51, %c0_52] : memref<9x16x16xbf16, #tpu.memory_space<vmem>>, vector<1x16x16xbf16>
    %52 = vector.shape_cast %51 : vector<1x16x16xbf16> to vector<16x16xbf16>
    %cst_53 = arith.constant dense<0.000000e+00> : vector<3x16xf32>
    %53 = tpu.matmul %50, %52, %cst_53 {dimension_numbers = #tpu.dot_dimension_numbers<[1], [0], [0], [1], [0, 0, 1, 1], [], []>} : vector<3x16xbf16>, vector<16x16xbf16>, vector<3x16xf32> -> vector<3x16xf32>
    %54 = arith.addf %48, %53 : vector<3x16xf32>
    %cst_54 = arith.constant dense<0.000000e+00> : vector<3xf32>
    %55 = vector.multi_reduction <add>, %54, %cst_54 [1] : vector<3x16xf32> to vector<3xf32>
    %56 = vector.shape_cast %55 : vector<3xf32> to vector<3x1xf32>
    %cst_55 = arith.constant 1.600000e+01 : f32
    %57 = vector.broadcast %cst_55 : f32 to vector<3x1xf32>
    %58 = arith.divf %56, %57 : vector<3x1xf32>
    %59 = vector.broadcast %58 : vector<3x1xf32> to vector<3x16xf32>
    %60 = arith.subf %54, %59 : vector<3x16xf32>
    %61 = arith.mulf %60, %60 : vector<3x16xf32>
    %cst_56 = arith.constant dense<0.000000e+00> : vector<3xf32>
    %62 = vector.multi_reduction <add>, %61, %cst_56 [1] : vector<3x16xf32> to vector<3xf32>
    %63 = vector.shape_cast %62 : vector<3xf32> to vector<3x1xf32>
    %cst_57 = arith.constant 1.600000e+01 : f32
    %64 = vector.broadcast %cst_57 : f32 to vector<3x1xf32>
    %65 = arith.divf %63, %64 : vector<3x1xf32>
    %cst_58 = arith.constant 9.99999997E-7 : f32
    %66 = vector.broadcast %cst_58 : f32 to vector<3x1xf32>
    %67 = arith.addf %65, %66 : vector<3x1xf32>
    %68 = math.rsqrt %67 : vector<3x1xf32>
    %69 = vector.broadcast %68 : vector<3x1xf32> to vector<3x16xf32>
    %70 = arith.mulf %60, %69 : vector<3x16xf32>
    %c0_59 = arith.constant 0 : index
    %c0_60 = arith.constant 0 : index
    %71 = vector.load %arg3[%c0_59, %c0_60] : memref<1x16xf32, #tpu.memory_space<vmem>>, vector<1x16xf32>
    %72 = vector.broadcast %71 : vector<1x16xf32> to vector<3x16xf32>
    %73 = arith.mulf %70, %72 : vector<3x16xf32>
    %c0_61 = arith.constant 0 : index
    %c0_62 = arith.constant 0 : index
    %74 = vector.load %arg4[%c0_61, %c0_62] : memref<1x16xf32, #tpu.memory_space<vmem>>, vector<1x16xf32>
    %75 = vector.broadcast %74 : vector<1x16xf32> to vector<3x16xf32>
    %76 = arith.addf %73, %75 : vector<3x16xf32>
    %c0_63 = arith.constant 0 : index
    %c0_64 = arith.constant 0 : index
    %c0_65 = arith.constant 0 : index
    %77 = vector.load %arg5[%c0_63, %c0_64, %c0_65] : memref<1x3x16xf32, #tpu.memory_space<vmem>>, vector<1x3x16xf32>
    %78 = vector.shape_cast %77 : vector<1x3x16xf32> to vector<3x16xf32>
    %79 = vector.shape_cast %76 : vector<3x16xf32> to vector<1x3x16xf32>
    tpu.vector_store %arg5[%c0_63, %c0_64, %c0_65], %79 {strides = array<i32>} : memref<1x3x16xf32, #tpu.memory_space<vmem>>, vector<1x3x16xf32>,
    return
  }
  func.func @transform_0(%arg0: i32) -> (i32, i32, i32) {
    %c0_i32 = arith.constant 0 : i32
    %c0_i32_0 = arith.constant 0 : i32
    %c0_i32_1 = arith.constant 0 : i32
    return %arg0, %c0_i32, %c0_i32_0 : i32, i32, i32
  }
  func.func @transform_1(%arg0: i32) -> (i32, i32, i32) {
    %c0_i32 = arith.constant 0 : i32
    %c0_i32_0 = arith.constant 0 : i32
    %c0_i32_1 = arith.constant 0 : i32
    %c0_i32_2 = arith.constant 0 : i32
    return %c0_i32, %c0_i32_0, %c0_i32_1 : i32, i32, i32
  }
  func.func @transform_2(%arg0: i32) -> (i32, i32) {
    %c0_i32 = arith.constant 0 : i32
    %c0_i32_0 = arith.constant 0 : i32
    %c0_i32_1 = arith.constant 0 : i32
    return %c0_i32, %c0_i32_0 : i32, i32
  }
  func.func @transform_3(%arg0: i32) -> (i32, i32) {
    %c0_i32 = arith.constant 0 : i32
    %c0_i32_0 = arith.constant 0 : i32
    %c0_i32_1 = arith.constant 0 : i32
    return %c0_i32, %c0_i32_0 : i32, i32
  }
  func.func @transform_4(%arg0: i32) -> (i32, i32, i32) {
    %c0_i32 = arith.constant 0 : i32
    %c0_i32_0 = arith.constant 0 : i32
    %c0_i32_1 = arith.constant 0 : i32
    return %arg0, %c0_i32, %c0_i32_0 : i32, i32, i32
  }
}

</mosaic_0001>

<bundles_post_ra>
// kernel: vitsfp_forward.25
= control target key start
LH: loop header
LB: loop body
LE: loop exit
PB: predicated region body
PF: predicated region fallthrough
CT: control target
= control target key end

     0   :  { %vm22_vm0 = vcmask 261120   ;;  %v149_v8 = vmov 0.0   ;;  %vm150_vm1 = vmmov 0   ;;  %s205_s0 = inlined_call_operand.vmem [shape: f32[8,32], index: 0, kind: input, shape index: {}]   ;;  %s206_s3 = inlined_call_operand.vmem [shape: bf16[32,128], index: 3, kind: input, shape index: {}]   ;;  %s207_s1 = inlined_call_operand.vmem [shape: f32[1,32], index: 1, kind: input, shape index: {}]   ;;  %s208_s2 = inlined_call_operand.vmem [shape: f32[1,32], index: 2, kind: input, shape index: {}]   ;;  %s209_s4 = inlined_call_operand.vmem [shape: f32[1,128], index: 4, kind: input, shape index: {}]   ;;  %s210_s5 = inlined_call_operand.vmem [shape: bf16[8,128], index: 5, kind: output, shape index: {}]  }
   0x1   :  { %v21_v0 = vld [vmem:[%s205_s0] sm:$0xff]  ;;  %135 = vmatprep.subr.bf16.mxu0 %v149_v8  ;;  %v146_v9 = vld [vmem:[%s206_s3 + $0x8] sm:$0xff]   ;;  %139 = vmatprep.mubr.msk.bf16.mxu0 %vm150_vm1, %v149_v8 }
   0x2   :  { %v23_v1 = vsel %vm22_vm0, %v21_v0, 0.0  ;;  %v145_v7 = vld [vmem:[%s206_s3] sm:$0xff]  }
   0x3   :  { %24 = vadd.xlane.f32.xlu0 %v23_v1  ;;  %136 = vmatpush3.bf16.msra.mxu0 %v145_v7  ;;  %v126_v14 = vld [vmem:[%s207_s1] ss:$0 sm:$0xff] }
   0x4   :  { %137 = vmatprep.subr.bf16.mxu0 %v149_v8  ;;  %v127_v16 = vld [vmem:[%s208_s2] ss:$0 sm:$0xff] }
   0x5   :  { %v128_v20 = vld [vmem:[%s209_s4] ss:$0 sm:$0xff] }
   0x7   :  { %138 = vmatpush3.bf16.msra.mxu0 %v146_v9 }
  0x90   :  { %v25_v2 = vpop.xlane.xlu0 %24 }
  0x91   :  { %v27_v3 = vmul.f32 0.03125, %v25_v2 }
  0x93   :  { %v28_v4 = vsub.f32 %v21_v0, %v27_v3 }
  0x95   :  { %v29_v5 = vmul.f32 %v28_v4, %v28_v4 }
  0x97   :  { %v30_v6 = vsel %vm22_vm0, %v29_v5, 0.0 }
  0x98   :  { %31 = vadd.xlane.f32.xlu0 %v30_v6 }
 0x125   :  { %v32_v10 = vpop.xlane.xlu0 %31 }
 0x126   :  { %v33_v11 = vmul.f32 0.03125, %v32_v10 }
 0x128   :  { %v34_v12 = vadd.f32 1e-06, %v33_v11 }
 0x12a   :  { %147 = vrsqrt.f32 %v34_v12 }
 0x134   :  { %v148_v13 = vpop.eup %147 }
 0x135   :  { %v36_v15 = vmul.f32 %v148_v13, %v28_v4 }
 0x137   :  { %v44_v17 = vmul.f32 %v126_v14, %v36_v15 }
 0x139   :  { %v52_v18 = vadd.f32 %v127_v16, %v44_v17 }
 0x13b   :  { %v53_v19 = vpack.c.bf16 %v52_v18, %v52_v18 }
 0x13d   :  { %140 = vmatmul.mubr.msk.bf16.vlgmr.msra.gmra.mrb[0].mxu0 %vm22_vm0, %v53_v19 }
 0x210   :  { %v114_v21 = vpop.f32.mrb[0].mxu0 }
 0x211   :  { %v115_v22 = vadd.f32 %v128_v20, %v114_v21  ;;  %v141_v23 = vpop.f32.mrb[1].mxu0 }
 0x212   :  { %v117_v24 = vpop.f32.mrb[2].mxu0 }
 0x213   :  { %v120_v25 = vpack.c.bf16 %v115_v22, %v115_v22  ;;  %v142_v26 = vpop.f32.mrb[3].mxu0 }
 0x215   :  { %121 = vst [vmem:[%s210_s5] sm:$0xf] %v120_v25 }

// kernel: vitsfp_forward.24
= control target key start
LH: loop header
LB: loop body
LE: loop exit
PB: predicated region body
PF: predicated region fallthrough
CT: control target
= control target key end

     0   :  { %s864_s12 = smov 0   ;;  %s866_s13 = smov 0   ;;  %s939_s0 = inlined_call_operand.vmem [shape: bf16[8,768], index: 0, kind: input, shape index: {}]   ;;  %s940_s1 = inlined_call_operand.vmem [shape: bf16[768,128], index: 1, kind: input, shape index: {}]   ;;  %s941_s2 = inlined_call_operand.vmem [shape: f32[1,128], index: 2, kind: input, shape index: {}]   ;;  %s942_s3 = inlined_call_operand.vmem [shape: f32[8,128], index: 3, kind: output, shape index: {}]  }
   0x1   :  { %s868_s14 = smov 0  }
   0x2 LB: > { %s25_s15 = sadd.s32 1, %s835_s13  ;;  %p676_p0 = scmp.ge.s32.totalorder %s839_s14, 1  ;;  %s839_s14 = sphi %s868_s14, %s13_s14   ;;  %s835_s13 = sphi %s866_s13, %s944_s13   ;;  %s831_s12 = sphi %s864_s12, %s943_s12  }
   0x3   : > { %p26_p1 = scmp.ge.s32.totalorder %s25_s15, 2  ;;  %p189_p2 = scmp.lt.s32.totalorder %s839_s14, 3 }
   0x5   : > { %s946_s15 = smov (%p26_p1, %s25_s15), 0  ;;  %p190_p3 = pnand %p676_p0, %p189_p2 }
   0x6   : > { %s230_s16 = smul.u32 (!%p190_p3), 3, %s831_s12  ;;  %p679_p6 = scmp.ne.s32.totalorder (!%p190_p3), %s831_s12, 0 }
   0x7   : > { %193 = sbr.rel (%p190_p3) target bundleno = 287 (0x11f), region = 32 }
   0x8   : > { %s240_s17 = smul.u32 (!%p190_p3), 48, %s831_s12  ;;  %p233_p4 = scmp.lt.s32.totalorder (!%p190_p3), %s230_s16, 5 }
   0xa   : > { %p241_p5 = scmp.lt.s32.totalorder (!%p190_p3), %s240_s17, 95 }
   0xe   : > { %s948_s16 = smov (!%p233_p4, %s230_s16), 5  ;;  %s950_s17 = smov (!%p241_p5, %s240_s17), 95 }
   0xf   : > { %s677_s18 = sshll.u32 %s948_s16, 2  ;;  %s678_s22 = sshll.u32 %s950_s17, 2  ;;  %v841_v0 = vmov (!%p679_p6), 0.0  }
  0x10   : > { %s889_s21 = scalar_lea.vmem %s939_s0, %s677_s18  ;;  %s894_s25 = scalar_lea.vmem %s940_s1, %s678_s22  ;;  %264 = vst [vmem:[#allocation2] sm:$0xff] (!%p679_p6), %v841_v0 }
  0x11   : > { %263 = sbr.rel (%p679_p6) target bundleno = 24 (0x18), region = 36 }
  0x18 PF: > { %v790_v1 = vld [vmem:[%s894_s25 + $0x40] sm:$0xff]   ;;  %v842_v2 = vmov 0.0   ;;  %vm843_vm0 = vmmov 0   ;;  %v793_v5 = vld [vmem:[%s894_s25 + $0x48] sm:$0xff]   ;;  %v796_v8 = vld [vmem:[%s894_s25 + $0x50] sm:$0xff]   ;;  %p707_p7 = scmp.ne.s32.totalorder %s831_s12, 1 }
  0x19   : > { %743 = vmatprep.subr.bf16.mxu1 %v842_v2  ;;  %v791_v3 = vld [vmem:[%s894_s25] sm:$0xff]   ;;  %712 = vmatprep.subr.bf16.mxu0 %v790_v1  ;;  %v794_v6 = vld [vmem:[%s894_s25 + $0x8] sm:$0xff]   ;;  %v797_v9 = vld [vmem:[%s894_s25 + $0x10] sm:$0xff]  }
  0x1a   : > { %v792_v4 = vld [vmem:[%s894_s25 + $0x80] sm:$0xff]   ;;  %759 = vmatprep.mubr.msk.bf16.mxu1 %vm843_vm0, %v842_v2  ;;  %713 = vmatpush3.bf16.msra.mxu0 %v791_v3  ;;  %v795_v7 = vld [vmem:[%s894_s25 + $0x88] sm:$0xff]   ;;  %v798_v10 = vld [vmem:[%s894_s25 + $0x90] sm:$0xff]  }
  0x1b   : > { %744 = vmatpush3.bf16.msra.mxu1 %v792_v4  ;;  %714 = vmatprep.subr.bf16.mxu0 %v793_v5  ;;  %v799_v11 = vld [vmem:[%s894_s25 + $0x58] sm:$0xff]   ;;  %v802_v14 = vld [vmem:[%s894_s25 + $0x60] sm:$0xff]   ;;  %v805_v17 = vld [vmem:[%s894_s25 + $0x68] sm:$0xff]  }
  0x1c   : > { %745 = vmatprep.subr.bf16.mxu1 %v842_v2  ;;  %v800_v12 = vld [vmem:[%s894_s25 + $0x18] sm:$0xff]   ;;  %v803_v15 = vld [vmem:[%s894_s25 + $0x20] sm:$0xff]   ;;  %v806_v18 = vld [vmem:[%s894_s25 + $0x28] sm:$0xff]  }
  0x1d   : > { %v801_v13 = vld [vmem:[%s894_s25 + $0x98] sm:$0xff]   ;;  %v804_v16 = vld [vmem:[%s894_s25 + $0xa0] sm:$0xff]   ;;  %v807_v19 = vld [vmem:[%s894_s25 + $0xa8] sm:$0xff]  }
  0x1e   : > { %715 = vmatpush3.bf16.msra.mxu0 %v794_v6  ;;  %v808_v20 = vld [vmem:[%s894_s25 + $0x70] sm:$0xff]   ;;  %v811_v23 = vld [vmem:[%s894_s25 + $0x78] sm:$0xff]   ;;  %v266_v24 = vld [vmem:[%s889_s21] sm:$0xff] }
  0x1f   : > { %746 = vmatpush3.bf16.msra.mxu1 %v795_v7  ;;  %716 = vmatprep.subr.bf16.mxu0 %v796_v8  ;;  %v809_v21 = vld [vmem:[%s894_s25 + $0x30] sm:$0xff]   ;;  %v681_v25 = vcombine.high %v266_v24, %v266_v24  ;;  %v812_v26 = vld [vmem:[%s894_s25 + $0x38] sm:$0xff]   ;;  %v680_v28 = vcombine.low %v266_v24, %v266_v24  ;;  %v816_v29 = vld [vmem:[%s889_s21 + $0x8] ss:$0 sps:$4 sm:$0xff]  }
  0x20   : > { %747 = vmatprep.subr.bf16.mxu1 %v842_v2  ;;  %v810_v22 = vld [vmem:[%s894_s25 + $0xb0] sm:$0xff]   ;;  %v813_v27 = vld [vmem:[%s894_s25 + $0xb8] sm:$0xff]   ;;  %v265_v36 = vld [vmem:[#allocation2] sm:$0xff] }
  0x21   : > { %503 = vmatprep.mubr.bf16.mxu0 %v681_v25  ;;  %v708_v43 = vld [vmem:[%s941_s2] ss:$0 sm:$0xff] (!%p707_p7) }
  0x22   : > { %717 = vmatpush3.bf16.msra.mxu0 %v797_v9 }
  0x23   : > { %748 = vmatpush3.bf16.msra.mxu1 %v798_v10  ;;  %718 = vmatprep.subr.bf16.mxu0 %v799_v11 }
  0x24   : > { %749 = vmatprep.subr.bf16.mxu1 %v842_v2 }
  0x26   : > { %719 = vmatpush3.bf16.msra.mxu0 %v800_v12 }
  0x27   : > { %750 = vmatpush3.bf16.msra.mxu1 %v801_v13  ;;  %720 = vmatprep.subr.bf16.mxu0 %v802_v14 }
  0x28   : > { %751 = vmatprep.subr.bf16.mxu1 %v842_v2 }
  0x2a   : > { %721 = vmatpush3.bf16.msra.mxu0 %v803_v15 }
  0x2b   : > { %752 = vmatpush3.bf16.msra.mxu1 %v804_v16  ;;  %722 = vmatprep.subr.bf16.mxu0 %v805_v17 }
  0x2c   : > { %753 = vmatprep.subr.bf16.mxu1 %v842_v2 }
  0x2e   : > { %723 = vmatpush3.bf16.msra.mxu0 %v806_v18 }
  0x2f   : > { %754 = vmatpush3.bf16.msra.mxu1 %v807_v19  ;;  %724 = vmatprep.subr.bf16.mxu0 %v808_v20 }
  0x30   : > { %755 = vmatprep.subr.bf16.mxu1 %v842_v2 }
  0x32   : > { %725 = vmatpush3.bf16.msra.mxu0 %v809_v21 }
  0x33   : > { %756 = vmatpush3.bf16.msra.mxu1 %v810_v22  ;;  %726 = vmatprep.subr.bf16.mxu0 %v811_v23 }
  0x34   : > { %757 = vmatprep.subr.bf16.mxu1 %v842_v2 }
  0x36   : > { %727 = vmatpush3.bf16.msra.mxu0 %v812_v26 }
  0x37   : > { %758 = vmatpush3.bf16.msra.mxu1 %v813_v27 }
  0x39   : > { %504 = vmatmul.mubr.bf16.vlgmr.msra.gmra.mrb[0].mxu0 %v680_v28 }
  0x3a   : > { %760 = vmatmul.mubr.bf16.vlgmr.msra.gmra.mrb[0].mxu1 %v816_v29 }
 0x10c   : > { %v728_v30 = vpop.f32.mrb[0].mxu0 }
 0x10d   : > { %v545_v31 = vpop.f32.mrb[0].mxu1  ;;  %v729_v32 = vpop.f32.mrb[1].mxu0 }
 0x10e   : > { %v730_v33 = vadd.f32 %v729_v32, %v728_v30  ;;  %v761_v34 = vpop.f32.mrb[1].mxu1  ;;  %v731_v35 = vpop.f32.mrb[2].mxu0  ;;  %556 = sbr.rel (%p707_p7) target bundleno = 287 (0x11f), region = 40 }
 0x10f   : > { %v548_v37 = vpop.f32.mrb[2].mxu1  ;;  %v732_v38 = vpop.f32.mrb[3].mxu0 }
 0x110   : > { %v546_v39 = vadd.f32 %v730_v33, %v545_v31  ;;  %v762_v40 = vpop.f32.mrb[3].mxu1 }
 0x112   : > { %v551_v41 = vadd.f32 %v546_v39, %v265_v36 }
 0x114   : > { %552 = vst [vmem:[#allocation2] sm:$0xff] %v551_v41 }
 0x11b   : > { %v557_v42 = vld [vmem:[#allocation2] sm:$0xff] }
 0x11c   : > { %v565_v44 = vadd.f32 %v708_v43, %v557_v42 }
 0x11e   : > { %566 = vst [vmem:[%s942_s3] sm:$0xff] %v565_v44 }
 0x11f PF: > { %s13_s14 = sadd.s32 1, %s839_s14   ;;  %s943_s12 = smov %s835_s13 }
 0x120   : > { %p10_p8 = scmp.ge.s32.totalorder %s13_s14, 4   ;;  %s944_s13 = smov %s946_s15 }
 0x122   :  { %12 = sbr.rel (!%p10_p8) target bundleno = 2 (0x2), region = 76 }

// kernel: vitsfp_forward.26
= control target key start
LH: loop header
LB: loop body
LE: loop exit
PB: predicated region body
PF: predicated region fallthrough
CT: control target
= control target key end

     0   :  { %s641_s12 = smov 0   ;;  %s643_s13 = smov 0   ;;  %s694_s0 = inlined_call_operand.vmem [shape: bf16[8,4,8], index: 0, kind: input, shape index: {}]   ;;  %s695_s1 = inlined_call_operand.vmem [shape: bf16[8,4,8], index: 1, kind: input, shape index: {}]   ;;  %s696_s2 = inlined_call_operand.vmem [shape: bf16[8,4,8], index: 2, kind: input, shape index: {}]   ;;  %s697_s3 = inlined_call_operand.vmem [shape: bf16[8,4,8], index: 3, kind: output, shape index: {}]  }
   0x1   :  { %s645_s14 = smov 0  }
   0x2 LB: > { %s32_s15 = sadd.s32 1, %s611_s13  ;;  %p532_p0 = scmp.ge.s32.totalorder %s615_s14, 1  ;;  %s615_s14 = sphi %s645_s14, %s13_s14   ;;  %s611_s13 = sphi %s643_s13, %s699_s13   ;;  %s607_s12 = sphi %s641_s12, %s698_s12  }
   0x3   : > { %p34_p1 = scmp.ge.s32.totalorder %s32_s15, 8  ;;  %p190_p2 = scmp.lt.s32.totalorder %s615_s14, 9 }
   0x5   : > { %s701_s15 = smov (%p34_p1, %s32_s15), 0  ;;  %p191_p3 = pnand %p532_p0, %p190_p2 }
   0x6   : > { %vm268_vm0 = vcmask (!%p191_p3), 60416   ;;  %p232_p4 = scmp.lt.s32.totalorder (!%p191_p3), %s607_s12, 7  ;;  %v617_v0 = vmov (!%p191_p3), 0.0   ;;  %vm618_vm1 = vmmov (!%p191_p3), 0   ;;  %vm272_vm2 = vcmask (!%p191_p3), 64512  }
   0x7   : > { %194 = sbr.rel (%p191_p3) target bundleno = 825 (0x339), region = 32  ;;  %269 = vst.msk [vmem:[#allocation4] sm:$0xf] (!%p191_p3), %vm268_vm0, %v617_v0  ;;  %545 = vmatprep.subr.bf16.mxu0 (!%p191_p3), %v617_v0  ;;  %547 = vmatprep.mubr.msk.bf16.mxu0 (!%p191_p3), %vm618_vm1, %v617_v0  ;;  %vm265_vm3 = vcmask (!%p191_p3), 3072   ;;  %v619_v4 = vmov (!%p191_p3), -inf   ;;  %vm321_vm4 = vcmask (!%p191_p3), 27648  }
   0x8   : > { %551 = vmatprep.subr.bf16.mxu1 (!%p191_p3), %v617_v0  ;;  %553 = vmatprep.mubr.msk.bf16.mxu1 (!%p191_p3), %vm618_vm1, %v617_v0  ;;  %266 = vst.msk [vmem:[#allocation2] sm:$0xf] (!%p191_p3), %vm265_vm3, %v619_v4  ;;  %267 = vst.msk [vmem:[#allocation3] sm:$0xf] (!%p191_p3), %vm265_vm3, %v617_v0  ;;  %v620_v11 = vmov (!%p191_p3), 0   ;;  %vm358_vm5 = vcmask (!%p191_p3), 1041408  }
   0x9   : > { %585 = vset.pattern.permute.xlu0 (!%p191_p3), %v620_v11  ;;  %586 = vset.pattern.permute.xlu1 (!%p191_p3), %v620_v11  ;;  %vm354_vm6 = vcmask (!%p191_p3), 31744   ;;  %vm419_vm7 = vcmask (!%p191_p3), 58368  }
   0xe   : > { %s703_s12 = smov (!%p232_p4, %s607_s12), 7  ;;  %v345_v32 = vld [vmem:[#allocation4] sm:$0xf] }
   0xf   : > { %s660_s16 = sshll.u32 %s703_s12, 1  ;;  %v320_v12 = vld [vmem:[#allocation2] sm:$0xf]  ;;  %v337_v26 = vld [vmem:[#allocation3] sm:$0xf] }
  0x10   : > { %s245_s19 = scalar_lea.vmem %s695_s1, %s660_s16  ;;  %s238_s22 = scalar_lea.vmem %s694_s0, %s660_s16 }
  0x11   : > { %v271_v1 = vld [vmem:[%s245_s19] sm:$0x3]  ;;  %s252_s25 = scalar_lea.vmem %s696_s2, %s660_s16  ;;  %s259_s28 = scalar_lea.vmem %s697_s3, %s660_s16 }
  0x12   : > { %v277_v2 = vsel %vm272_vm2, %v271_v1, 0  ;;  %v270_v3 = vld [vmem:[%s238_s22] sm:$0x3] }
  0x13   : > { %546 = vmatpush3.bf16.xpose.msra.mxu0 %v277_v2  ;;  %v353_v16 = vld [vmem:[%s252_s25] sm:$0x3] }
  0x14   : > { %v360_v17 = vsel %vm358_vm5, %v353_v16, 0 }
  0x15   : > { %552 = vmatpush3.bf16.msra.mxu1 %v360_v17 }
  0x1a   : > { %548 = vmatmul.mubr.msk.bf16.vlgmr.msra.gmra.mrb[0].mxu0 %vm272_vm2, %v270_v3 }
  0xed   : > { %v313_v5 = vpop.f32.mrb[0].mxu0 }
  0xee   : > { %v319_v6 = vmul.f32 0.35355338, %v313_v5  ;;  %v549_v7 = vpop.f32.mrb[1].mxu0 }
  0xef   : > { %v316_v8 = vpop.f32.mrb[2].mxu0 }
  0xf0   : > { %v550_v9 = vpop.f32.mrb[3].mxu0  ;;  %v322_v10 = vsel %vm321_vm4, %v319_v6, -inf }
  0xf1   : > { %323 = vmax.xlane.f32.xlu0 %v322_v10 }
 0x17e   : > { %v324_v13 = vpop.xlane.xlu0 %323 }
 0x17f   : > { %v325_v14 = vmax.f32 %v320_v12, %v324_v13 }
 0x181   : > { %v326_v15 = vsub.f32 %v320_v12, %v325_v14  ;;  %405 = vst.msk [vmem:[#allocation2] sm:$0xf] %vm265_vm3, %v325_v14  ;;  %331 = vperm.xlu0 %585, %v325_v14  }
 0x183   : > { %v327_v24 = vmul.f32 1.442695, %v326_v15 }
 0x200   : > { %v332_v18 = vpop.permute.xlu0 %331 }
 0x201   : > { %v334_v19 = vsub.f32 %v319_v6, %v332_v18 }
 0x203   : > { %v335_v20 = vmul.f32 1.442695, %v334_v19 }
 0x205   : > { %587 = vpow2.f32 %v335_v20 }
 0x206   : > { %589 = vpow2.f32 %v327_v24 }
 0x20f   : > { %v588_v21 = vpop.eup %587 }
 0x210   : > { %v339_v22 = vsel %vm321_vm4, %v588_v21, 0.0  ;;  %v352_v23 = vpack.c.bf16 %v588_v21, %v588_v21  ;;  %v590_v25 = vpop.eup %589 }
 0x211   : > { %340 = vadd.xlane.f32.xlu1 %v339_v22  ;;  %v338_v27 = vmul.f32 %v590_v25, %v337_v26 }
 0x212   : > { %554 = vmatmul.mubr.msk.bf16.vlgmr.msra.gmra.mrb[0].mxu1 %vm354_vm6, %v352_v23 }
 0x222   : > { %348 = vperm.xlu1 %586, %v590_v25  }
 0x29e   : > { %v341_v28 = vpop.xlane.xlu1 %340 }
 0x29f   : > { %v342_v29 = vadd.f32 %v341_v28, %v338_v27 }
 0x2a1   : > { %344 = vst.msk [vmem:[#allocation3] sm:$0xf] %vm265_vm3, %v342_v29 }
 0x2a2   : > { %v349_v33 = vpop.permute.xlu1 %348 }
 0x2a3   : > { %v351_v34 = vmul.f32 %v349_v33, %v345_v32 }
 0x2a8   : > { %v410_v30 = vld [vmem:[#allocation3] sm:$0xf] }
 0x2a9   : > { %591 = vrcp.f32 %v410_v30 }
 0x2b3   : > { %v592_v31 = vpop.eup %591 }
 0x2b4   : > { %414 = vperm.xlu1 %586, %v592_v31  }
 0x2e5   : > { %v396_v35 = vpop.f32.mrb[0].mxu1 }
 0x2e6   : > { %v402_v36 = vadd.f32 %v396_v35, %v351_v34  ;;  %v555_v37 = vpop.f32.mrb[1].mxu1 }
 0x2e7   : > { %v399_v38 = vpop.f32.mrb[2].mxu1 }
 0x2e8   : > { %404 = vst.msk [vmem:[#allocation4] sm:$0xf] %vm268_vm0, %v402_v36  ;;  %v556_v39 = vpop.f32.mrb[3].mxu1 }
 0x2ef   : > { %v409_v40 = vld [vmem:[#allocation4] sm:$0xf] }
 0x333   : > { %v415_v41 = vpop.permute.xlu1 %414 }
 0x334   : > { %v417_v42 = vmul.f32 %v415_v41, %v409_v40 }
 0x336   : > { %v418_v43 = vpack.c.bf16 %v417_v42, %v417_v42 }
 0x338   : > { %420 = vst.msk [vmem:[%s259_s28] sm:$0x3] %vm419_vm7, %v418_v43 }
 0x339 PF: > { %s13_s14 = sadd.s32 1, %s615_s14   ;;  %s698_s12 = smov %s611_s13 }
 0x33a   : > { %p10_p5 = scmp.ge.s32.totalorder %s13_s14, 10   ;;  %s699_s13 = smov %s701_s15 }
 0x33c   :  { %12 = sbr.rel (!%p10_p5) target bundleno = 2 (0x2), region = 76 }

// kernel: vitsfp_forward.27
= control target key start
LH: loop header
LB: loop body
LE: loop exit
PB: predicated region body
PF: predicated region fallthrough
CT: control target
= control target key end

     0   :  { %v198_v0 = vmov 0.0   ;;  %vm199_vm0 = vmmov 0   ;;  %s261_s1 = inlined_call_operand.vmem [shape: bf16[128,128], index: 1, kind: input, shape index: {}]   ;;  %s262_s0 = inlined_call_operand.vmem [shape: bf16[8,128], index: 0, kind: input, shape index: {}]   ;;  %s263_s2 = inlined_call_operand.vmem [shape: f32[1,128], index: 2, kind: input, shape index: {}]   ;;  %s264_s3 = inlined_call_operand.vmem [shape: f32[8,128], index: 3, kind: input, shape index: {}]   ;;  %s265_s4 = inlined_call_operand.vmem [shape: f32[8,128], index: 4, kind: output, shape index: {}]  }
   0x1   :  { %168 = vmatprep.subr.bf16.mxu0 %v198_v0  ;;  %v190_v1 = vld [vmem:[%s261_s1] sm:$0xff]   ;;  %184 = vmatprep.mubr.msk.bf16.mxu0 %vm199_vm0, %v198_v0  ;;  %v191_v2 = vld [vmem:[%s261_s1 + $0x8] sm:$0xff]   ;;  %v192_v3 = vld [vmem:[%s261_s1 + $0x10] sm:$0xff]  }
   0x2   :  { %169 = vmatpush3.bf16.msra.mxu0 %v190_v1  ;;  %v193_v4 = vld [vmem:[%s261_s1 + $0x18] sm:$0xff]   ;;  %v194_v5 = vld [vmem:[%s261_s1 + $0x20] sm:$0xff]   ;;  %v195_v6 = vld [vmem:[%s261_s1 + $0x28] sm:$0xff]  }
   0x3   :  { %170 = vmatprep.subr.bf16.mxu0 %v198_v0  ;;  %v196_v7 = vld [vmem:[%s261_s1 + $0x30] sm:$0xff]   ;;  %v197_v8 = vld [vmem:[%s261_s1 + $0x38] sm:$0xff]   ;;  %v24_v9 = vld [vmem:[%s262_s0] sm:$0xf] }
   0x4   :  { %v158_v10 = vld [vmem:[%s263_s2] ss:$0 sm:$0xff] }
   0x5   :  { %v143_v12 = vld [vmem:[%s264_s3] sm:$0xff] }
   0x6   :  { %171 = vmatpush3.bf16.msra.mxu0 %v191_v2 }
   0x7   :  { %172 = vmatprep.subr.bf16.mxu0 %v198_v0 }
   0xa   :  { %173 = vmatpush3.bf16.msra.mxu0 %v192_v3 }
   0xb   :  { %174 = vmatprep.subr.bf16.mxu0 %v198_v0 }
   0xe   :  { %175 = vmatpush3.bf16.msra.mxu0 %v193_v4 }
   0xf   :  { %176 = vmatprep.subr.bf16.mxu0 %v198_v0 }
  0x12   :  { %177 = vmatpush3.bf16.msra.mxu0 %v194_v5 }
  0x13   :  { %178 = vmatprep.subr.bf16.mxu0 %v198_v0 }
  0x16   :  { %179 = vmatpush3.bf16.msra.mxu0 %v195_v6 }
  0x17   :  { %180 = vmatprep.subr.bf16.mxu0 %v198_v0 }
  0x1a   :  { %181 = vmatpush3.bf16.msra.mxu0 %v196_v7 }
  0x1b   :  { %182 = vmatprep.subr.bf16.mxu0 %v198_v0 }
  0x1e   :  { %183 = vmatpush3.bf16.msra.mxu0 %v197_v8 }
  0x21   :  { %185 = vmatmul.mubr.bf16.vlgmr.msra.gmra.mrb[0].mxu0 %v24_v9 }
  0xf4   :  { %v123_v11 = vpop.f32.mrb[0].mxu0 }
  0xf5   :  { %v142_v13 = vadd.f32 %v158_v10, %v123_v11  ;;  %v186_v14 = vpop.f32.mrb[1].mxu0 }
  0xf6   :  { %v126_v15 = vpop.f32.mrb[2].mxu0 }
  0xf7   :  { %v144_v16 = vadd.f32 %v143_v12, %v142_v13  ;;  %v187_v17 = vpop.f32.mrb[3].mxu0 }
  0xf9   :  { %145 = vst [vmem:[%s265_s4] sm:$0xff] %v144_v16 }

// kernel: vitsfp_forward.28
= control target key start
LH: loop header
LB: loop body
LE: loop exit
PB: predicated region body
PF: predicated region fallthrough
CT: control target
= control target key end

     0   :  { %vm22_vm0 = vcmask 261120   ;;  %v156_v8 = vmov 0.0   ;;  %vm157_vm1 = vmmov 0   ;;  %s212_s0 = inlined_call_operand.vmem [shape: f32[8,32], index: 0, kind: input, shape index: {}]   ;;  %s213_s3 = inlined_call_operand.vmem [shape: bf16[32,128], index: 3, kind: input, shape index: {}]   ;;  %s214_s1 = inlined_call_operand.vmem [shape: f32[1,32], index: 1, kind: input, shape index: {}]   ;;  %s215_s2 = inlined_call_operand.vmem [shape: f32[1,32], index: 2, kind: input, shape index: {}]   ;;  %s216_s4 = inlined_call_operand.vmem [shape: f32[1,128], index: 4, kind: input, shape index: {}]   ;;  %s217_s5 = inlined_call_operand.vmem [shape: bf16[8,128], index: 5, kind: output, shape index: {}]  }
   0x1   :  { %v21_v0 = vld [vmem:[%s212_s0] sm:$0xff]  ;;  %140 = vmatprep.subr.bf16.mxu0 %v156_v8  ;;  %v151_v9 = vld [vmem:[%s213_s3 + $0x8] sm:$0xff]   ;;  %144 = vmatprep.mubr.msk.bf16.mxu0 %vm157_vm1, %v156_v8 }
   0x2   :  { %v23_v1 = vsel %vm22_vm0, %v21_v0, 0.0  ;;  %v150_v7 = vld [vmem:[%s213_s3] sm:$0xff]  }
   0x3   :  { %24 = vadd.xlane.f32.xlu0 %v23_v1  ;;  %141 = vmatpush3.bf16.msra.mxu0 %v150_v7  ;;  %v131_v14 = vld [vmem:[%s214_s1] ss:$0 sm:$0xff] }
   0x4   :  { %142 = vmatprep.subr.bf16.mxu0 %v156_v8  ;;  %v132_v16 = vld [vmem:[%s215_s2] ss:$0 sm:$0xff] }
   0x5   :  { %v133_v20 = vld [vmem:[%s216_s4] ss:$0 sm:$0xff] }
   0x7   :  { %143 = vmatpush3.bf16.msra.mxu0 %v151_v9 }
  0x90   :  { %v25_v2 = vpop.xlane.xlu0 %24 }
  0x91   :  { %v27_v3 = vmul.f32 0.03125, %v25_v2 }
  0x93   :  { %v28_v4 = vsub.f32 %v21_v0, %v27_v3 }
  0x95   :  { %v29_v5 = vmul.f32 %v28_v4, %v28_v4 }
  0x97   :  { %v30_v6 = vsel %vm22_vm0, %v29_v5, 0.0 }
  0x98   :  { %31 = vadd.xlane.f32.xlu0 %v30_v6 }
 0x125   :  { %v32_v10 = vpop.xlane.xlu0 %31 }
 0x126   :  { %v33_v11 = vmul.f32 0.03125, %v32_v10 }
 0x128   :  { %v34_v12 = vadd.f32 1e-06, %v33_v11 }
 0x12a   :  { %152 = vrsqrt.f32 %v34_v12 }
 0x134   :  { %v153_v13 = vpop.eup %152 }
 0x135   :  { %v36_v15 = vmul.f32 %v153_v13, %v28_v4 }
 0x137   :  { %v44_v17 = vmul.f32 %v131_v14, %v36_v15 }
 0x139   :  { %v52_v18 = vadd.f32 %v132_v16, %v44_v17 }
 0x13b   :  { %v53_v19 = vpack.c.bf16 %v52_v18, %v52_v18 }
 0x13d   :  { %145 = vmatmul.mubr.msk.bf16.vlgmr.msra.gmra.mrb[0].mxu0 %vm22_vm0, %v53_v19 }
 0x210   :  { %v114_v21 = vpop.f32.mrb[0].mxu0 }
 0x211   :  { %v115_v22 = vadd.f32 %v133_v20, %v114_v21  ;;  %v146_v23 = vpop.f32.mrb[1].mxu0 }
 0x212   :  { %v117_v24 = vpop.f32.mrb[2].mxu0 }
 0x213   :  { %v121_v25 = vmul.f32 0.70710677, %v115_v22  ;;  %v147_v26 = vpop.f32.mrb[3].mxu0  ;;  %v120_v28 = vmul.f32 0.5, %v115_v22 }
 0x215   :  { %154 = verf.f32 %v121_v25 }
 0x21f   :  { %v155_v27 = vpop.eup %154 }
 0x220   :  { %v123_v29 = vadd.f32 1.0, %v155_v27 }
 0x222   :  { %v124_v30 = vmul.f32 %v123_v29, %v120_v28 }
 0x224   :  { %v125_v31 = vpack.c.bf16 %v124_v30, %v124_v30 }
 0x226   :  { %126 = vst [vmem:[%s217_s5] sm:$0xf] %v125_v31 }

// kernel: tile.18
= control target key start
LH: loop header
LB: loop body
LE: loop exit
PB: predicated region body
PF: predicated region fallthrough
CT: control target
= control target key end

     0   :  { %s22_s0 = inlined_call_operand.vmem [shape: f32[16], index: 0, kind: input, shape index: {}]   ;;  %s23_s1 = inlined_call_operand.vmem [shape: f32[4,16], index: 1, kind: output, shape index: {}]  }
   0x1   :  { %v4_v0 = vld [vmem:[%s22_s0] ss:$0 sm:$0xff] }
   0x2   :  { %5 = vst [vmem:[%s23_s1] sm:$0xf] %v4_v0 }

// kernel: tile.19
= control target key start
LH: loop header
LB: loop body
LE: loop exit
PB: predicated region body
PF: predicated region fallthrough
CT: control target
= control target key end

     0   :  { %vm7_vm0 = vcmask 130048   ;;  %s37_s8 = smov 16   ;;  %s38_s9 = smov 32   ;;  %vm13_vm1 = vcmask 523648   ;;  %vm19_vm2 = vcmask 392448   ;;  %vm25_vm3 = vcmask 261248   ;;  %s55_s0 = inlined_call_operand.vmem [shape: f32[4,16], index: 0, kind: input, shape index: {}]   ;;  %s56_s1 = inlined_call_operand.vmem [shape: f32[1,64], index: 1, kind: output, shape index: {}]  }
   0x1   :  { %v4_v0 = vld [vmem:[%s55_s0] sm:$0xf]  ;;  %s36_s0 = smov 48  }
   0x2   :  { %5 = vst [vmem:[#allocation1] sm:$0xf] %v4_v0 }
   0x9   :  { %v10_v1 = vld [vmem:[#allocation1 + $0x3] sm:$0x1]   ;;  %v22_v2 = vld [vmem:[#allocation1 + $0x1] sm:$0x1]   ;;  %v6_v3 = vld [vmem:[#allocation1] sm:$0x1]  }
   0xa   :  { %11 = vrot.lane.b32.xlu0 %v10_v1, %s36_s0  ;;  %23 = vrot.lane.b32.xlu1 %v22_v2, %s37_s8  ;;  %v16_v4 = vld [vmem:[#allocation1 + $0x2] sm:$0x1]   ;;  %8 = vst.msk [vmem:[#allocation0] sm:$0x1] %vm7_vm0, %v6_v3  }
   0xe   :  { %17 = vrot.lane.b32.xlu0 %v16_v4, %s38_s9 }
  0x7c   :  { %v12_v5 = vpop.permute.xlu0 %11   ;;  %v24_v6 = vpop.permute.xlu1 %23  }
  0x7d   :  { %14 = vst.msk [vmem:[#allocation0] sm:$0x1] %vm13_vm1, %v12_v5  }
  0x80   :  { %v18_v7 = vpop.permute.xlu0 %17  }
  0x81   :  { %20 = vst.msk [vmem:[#allocation0] sm:$0x1] %vm19_vm2, %v18_v7  }
  0x82   :  { %26 = vst.msk [vmem:[#allocation0] sm:$0x1] %vm25_vm3, %v24_v6  }
  0x89   :  { %v30_v8 = vld [vmem:[#allocation0] sm:$0x1] }
  0x8a   :  { %32 = vst [vmem:[%s56_s1] sm:$0x1] %v30_v8 }

// kernel: vitsfp_forward.35
= control target key start
LH: loop header
LB: loop body
LE: loop exit
PB: predicated region body
PF: predicated region fallthrough
CT: control target
= control target key end

     0   :  { %vm15_vm0 = vcmask 261120   ;;  %vm47_vm1 = vcmask 257024   ;;  %s89_s0 = inlined_call_operand.vmem [shape: f32[8,32], index: 0, kind: input, shape index: {}]   ;;  %s90_s1 = inlined_call_operand.vmem [shape: f32[1,32], index: 1, kind: input, shape index: {}]   ;;  %s91_s2 = inlined_call_operand.vmem [shape: f32[1,32], index: 2, kind: input, shape index: {}]   ;;  %s92_s3 = inlined_call_operand.vmem [shape: bf16[8,32], index: 3, kind: output, shape index: {}]  }
   0x1   :  { %v14_v0 = vld [vmem:[%s89_s0] sm:$0xff] }
   0x2   :  { %v16_v1 = vsel %vm15_vm0, %v14_v0, 0.0  ;;  %v53_v11 = vld [vmem:[%s90_s1] ss:$0 sm:$0xff] }
   0x3   :  { %17 = vadd.xlane.f32.xlu0 %v16_v1  ;;  %v54_v13 = vld [vmem:[%s91_s2] ss:$0 sm:$0xff] }
  0x90   :  { %v18_v2 = vpop.xlane.xlu0 %17 }
  0x91   :  { %v20_v3 = vmul.f32 0.03125, %v18_v2 }
  0x93   :  { %v21_v4 = vsub.f32 %v14_v0, %v20_v3 }
  0x95   :  { %v22_v5 = vmul.f32 %v21_v4, %v21_v4 }
  0x97   :  { %v23_v6 = vsel %vm15_vm0, %v22_v5, 0.0 }
  0x98   :  { %24 = vadd.xlane.f32.xlu0 %v23_v6 }
 0x125   :  { %v25_v7 = vpop.xlane.xlu0 %24 }
 0x126   :  { %v26_v8 = vmul.f32 0.03125, %v25_v7 }
 0x128   :  { %v27_v9 = vadd.f32 1e-06, %v26_v8 }
 0x12a   :  { %55 = vrsqrt.f32 %v27_v9 }
 0x134   :  { %v56_v10 = vpop.eup %55 }
 0x135   :  { %v29_v12 = vmul.f32 %v56_v10, %v21_v4 }
 0x137   :  { %v37_v14 = vmul.f32 %v53_v11, %v29_v12 }
 0x139   :  { %v45_v15 = vadd.f32 %v54_v13, %v37_v14 }
 0x13b   :  { %v46_v16 = vpack.c.bf16 %v45_v15, %v45_v15 }
 0x13d   :  { %48 = vst.msk [vmem:[%s92_s3] sm:$0xf] %vm47_vm1, %v46_v16 }

// kernel: tile.23
= control target key start
LH: loop header
LB: loop body
LE: loop exit
PB: predicated region body
PF: predicated region fallthrough
CT: control target
= control target key end

     0   :  { %s22_s0 = inlined_call_operand.vmem [shape: f32[8], index: 0, kind: input, shape index: {}]   ;;  %s23_s1 = inlined_call_operand.vmem [shape: f32[4,8], index: 1, kind: output, shape index: {}]  }
   0x1   :  { %v4_v0 = vld [vmem:[%s22_s0] ss:$0 sm:$0xff] }
   0x2   :  { %5 = vst [vmem:[%s23_s1] sm:$0xf] %v4_v0 }

// kernel: tile.24
= control target key start
LH: loop header
LB: loop body
LE: loop exit
PB: predicated region body
PF: predicated region fallthrough
CT: control target
= control target key end

     0   :  { %vm7_vm0 = vcmask 64512   ;;  %s37_s8 = smov 8   ;;  %s38_s9 = smov 16   ;;  %vm13_vm1 = vcmask 261312   ;;  %vm19_vm2 = vcmask 195712   ;;  %vm25_vm3 = vcmask 130112   ;;  %s55_s0 = inlined_call_operand.vmem [shape: f32[4,8], index: 0, kind: input, shape index: {}]   ;;  %s56_s1 = inlined_call_operand.vmem [shape: f32[1,32], index: 1, kind: output, shape index: {}]  }
   0x1   :  { %v4_v0 = vld [vmem:[%s55_s0] sm:$0xf]  ;;  %s36_s0 = smov 24  }
   0x2   :  { %5 = vst [vmem:[#allocation1] sm:$0xf] %v4_v0 }
   0x9   :  { %v10_v1 = vld [vmem:[#allocation1 + $0x3] sm:$0x1]   ;;  %v22_v2 = vld [vmem:[#allocation1 + $0x1] sm:$0x1]   ;;  %v6_v3 = vld [vmem:[#allocation1] sm:$0x1]  }
   0xa   :  { %11 = vrot.lane.b32.xlu0 %v10_v1, %s36_s0  ;;  %23 = vrot.lane.b32.xlu1 %v22_v2, %s37_s8  ;;  %v16_v4 = vld [vmem:[#allocation1 + $0x2] sm:$0x1]   ;;  %8 = vst.msk [vmem:[#allocation0] sm:$0x1] %vm7_vm0, %v6_v3  }
   0xe   :  { %17 = vrot.lane.b32.xlu0 %v16_v4, %s38_s9 }
  0x7c   :  { %v12_v5 = vpop.permute.xlu0 %11   ;;  %v24_v6 = vpop.permute.xlu1 %23  }
  0x7d   :  { %14 = vst.msk [vmem:[#allocation0] sm:$0x1] %vm13_vm1, %v12_v5  }
  0x80   :  { %v18_v7 = vpop.permute.xlu0 %17  }
  0x81   :  { %20 = vst.msk [vmem:[#allocation0] sm:$0x1] %vm19_vm2, %v18_v7  }
  0x82   :  { %26 = vst.msk [vmem:[#allocation0] sm:$0x1] %vm25_vm3, %v24_v6  }
  0x89   :  { %v30_v8 = vld [vmem:[#allocation0] sm:$0x1] }
  0x8a   :  { %32 = vst [vmem:[%s56_s1] sm:$0x1] %v30_v8 }

// kernel: vitsfp_forward.36
= control target key start
LH: loop header
LB: loop body
LE: loop exit
PB: predicated region body
PF: predicated region fallthrough
CT: control target
= control target key end

     0   :  { %v194_v0 = vmov 0.0   ;;  %vm195_vm0 = vmmov 0   ;;  %s249_s1 = inlined_call_operand.vmem [shape: bf16[128,128], index: 1, kind: input, shape index: {}]   ;;  %s250_s0 = inlined_call_operand.vmem [shape: bf16[8,128], index: 0, kind: input, shape index: {}]   ;;  %s251_s2 = inlined_call_operand.vmem [shape: f32[1,128], index: 2, kind: input, shape index: {}]   ;;  %s252_s3 = inlined_call_operand.vmem [shape: bf16[8,128], index: 3, kind: output, shape index: {}]  }
   0x1   :  { %164 = vmatprep.subr.bf16.mxu0 %v194_v0  ;;  %v186_v1 = vld [vmem:[%s249_s1] sm:$0xff]   ;;  %180 = vmatprep.mubr.msk.bf16.mxu0 %vm195_vm0, %v194_v0  ;;  %v187_v2 = vld [vmem:[%s249_s1 + $0x8] sm:$0xff]   ;;  %v188_v3 = vld [vmem:[%s249_s1 + $0x10] sm:$0xff]  }
   0x2   :  { %165 = vmatpush3.bf16.msra.mxu0 %v186_v1  ;;  %v189_v4 = vld [vmem:[%s249_s1 + $0x18] sm:$0xff]   ;;  %v190_v5 = vld [vmem:[%s249_s1 + $0x20] sm:$0xff]   ;;  %v191_v6 = vld [vmem:[%s249_s1 + $0x28] sm:$0xff]  }
   0x3   :  { %166 = vmatprep.subr.bf16.mxu0 %v194_v0  ;;  %v192_v7 = vld [vmem:[%s249_s1 + $0x30] sm:$0xff]   ;;  %v193_v8 = vld [vmem:[%s249_s1 + $0x38] sm:$0xff]   ;;  %v21_v9 = vld [vmem:[%s250_s0] sm:$0xf] }
   0x4   :  { %v154_v10 = vld [vmem:[%s251_s2] ss:$0 sm:$0xff] }
   0x6   :  { %167 = vmatpush3.bf16.msra.mxu0 %v187_v2 }
   0x7   :  { %168 = vmatprep.subr.bf16.mxu0 %v194_v0 }
   0xa   :  { %169 = vmatpush3.bf16.msra.mxu0 %v188_v3 }
   0xb   :  { %170 = vmatprep.subr.bf16.mxu0 %v194_v0 }
   0xe   :  { %171 = vmatpush3.bf16.msra.mxu0 %v189_v4 }
   0xf   :  { %172 = vmatprep.subr.bf16.mxu0 %v194_v0 }
  0x12   :  { %173 = vmatpush3.bf16.msra.mxu0 %v190_v5 }
  0x13   :  { %174 = vmatprep.subr.bf16.mxu0 %v194_v0 }
  0x16   :  { %175 = vmatpush3.bf16.msra.mxu0 %v191_v6 }
  0x17   :  { %176 = vmatprep.subr.bf16.mxu0 %v194_v0 }
  0x1a   :  { %177 = vmatpush3.bf16.msra.mxu0 %v192_v7 }
  0x1b   :  { %178 = vmatprep.subr.bf16.mxu0 %v194_v0 }
  0x1e   :  { %179 = vmatpush3.bf16.msra.mxu0 %v193_v8 }
  0x21   :  { %181 = vmatmul.mubr.bf16.vlgmr.msra.gmra.mrb[0].mxu0 %v21_v9 }
  0xf4   :  { %v120_v11 = vpop.f32.mrb[0].mxu0 }
  0xf5   :  { %v139_v12 = vadd.f32 %v154_v10, %v120_v11  ;;  %v182_v13 = vpop.f32.mrb[1].mxu0 }
  0xf6   :  { %v123_v14 = vpop.f32.mrb[2].mxu0 }
  0xf7   :  { %v140_v15 = vpack.c.bf16 %v139_v12, %v139_v12  ;;  %v183_v16 = vpop.f32.mrb[3].mxu0 }
  0xf9   :  { %141 = vst [vmem:[%s252_s3] sm:$0xf] %v140_v15 }

// kernel: vitsfp_forward.37
= control target key start
LH: loop header
LB: loop body
LE: loop exit
PB: predicated region body
PF: predicated region fallthrough
CT: control target
= control target key end

     0   :  { %vm22_vm0 = vcmask 130048   ;;  %vm134_vm1 = vcmask 125952   ;;  %s234_s0 = inlined_call_operand.vmem [shape: bf16[32,16], index: 0, kind: input, shape index: {}]   ;;  %s235_s1 = inlined_call_operand.vmem [shape: f32[1,16], index: 1, kind: input, shape index: {}]   ;;  %s236_s2 = inlined_call_operand.vmem [shape: f32[1,16], index: 2, kind: input, shape index: {}]   ;;  %s237_s3 = inlined_call_operand.vmem [shape: bf16[32,16], index: 3, kind: output, shape index: {}]  }
   0x1   :  { %v154_v0 = vld [vmem:[%s234_s0] sm:$0xff]   ;;  %v161_v1 = vld [vmem:[%s234_s0 + $0x8] sm:$0xff]  }
   0x2   :  { %v155_v2 = vunpack.c.l.bf16 %v154_v0  ;;  %v159_v3 = vunpack.c.l.bf16 %v161_v1  ;;  %v156_v4 = vunpack.c.h.bf16 %v154_v0  ;;  %v160_v5 = vunpack.c.h.bf16 %v161_v1  ;;  %v143_v43 = vld [vmem:[%s235_s1] ss:$0 sm:$0xff] }
   0x3   :  { %v144_v45 = vld [vmem:[%s236_s2] ss:$0 sm:$0xff] }
   0x4   :  { %v23_v6 = vsel %vm22_vm0, %v155_v2, 0.0  ;;  %v29_v7 = vsel %vm22_vm0, %v159_v3, 0.0  ;;  %v26_v8 = vsel %vm22_vm0, %v156_v4, 0.0  ;;  %v32_v9 = vsel %vm22_vm0, %v160_v5, 0.0 }
   0x5   :  { %24 = vadd.xlane.f32.xlu0 %v23_v6  ;;  %30 = vadd.xlane.f32.xlu1 %v29_v7 }
   0x9   :  { %27 = vadd.xlane.f32.xlu0 %v26_v8  ;;  %33 = vadd.xlane.f32.xlu1 %v32_v9 }
  0x92   :  { %v25_v10 = vpop.xlane.xlu0 %24  ;;  %v31_v11 = vpop.xlane.xlu1 %30 }
  0x93   :  { %v36_v12 = vmul.f32 0.0625, %v25_v10  ;;  %v38_v13 = vmul.f32 0.0625, %v31_v11 }
  0x95   :  { %v40_v14 = vsub.f32 %v155_v2, %v36_v12  ;;  %v42_v15 = vsub.f32 %v159_v3, %v38_v13 }
  0x96   :  { %v28_v16 = vpop.xlane.xlu0 %27  ;;  %v34_v17 = vpop.xlane.xlu1 %33 }
  0x97   :  { %v37_v18 = vmul.f32 0.0625, %v28_v16  ;;  %v39_v19 = vmul.f32 0.0625, %v34_v17  ;;  %v44_v20 = vmul.f32 %v40_v14, %v40_v14  ;;  %v46_v21 = vmul.f32 %v42_v15, %v42_v15 }
  0x99   :  { %v41_v22 = vsub.f32 %v156_v4, %v37_v18  ;;  %v43_v23 = vsub.f32 %v160_v5, %v39_v19  ;;  %v48_v24 = vsel %vm22_vm0, %v44_v20, 0.0  ;;  %v54_v25 = vsel %vm22_vm0, %v46_v21, 0.0 }
  0x9a   :  { %49 = vadd.xlane.f32.xlu0 %v48_v24 }
  0x9b   :  { %v45_v26 = vmul.f32 %v41_v22, %v41_v22  ;;  %v47_v27 = vmul.f32 %v43_v23, %v43_v23 }
  0x9d   :  { %v51_v28 = vsel %vm22_vm0, %v45_v26, 0.0  ;;  %v57_v29 = vsel %vm22_vm0, %v47_v27, 0.0 }
  0x9e   :  { %55 = vadd.xlane.f32.xlu0 %v54_v25  ;;  %52 = vadd.xlane.f32.xlu1 %v51_v28 }
  0xa2   :  { %58 = vadd.xlane.f32.xlu1 %v57_v29 }
 0x127   :  { %v50_v30 = vpop.xlane.xlu0 %49 }
 0x128   :  { %v60_v31 = vmul.f32 0.0625, %v50_v30 }
 0x12a   :  { %v64_v32 = vadd.f32 1e-06, %v60_v31 }
 0x12b   :  { %v53_v33 = vpop.xlane.xlu1 %52  ;;  %v56_v34 = vpop.xlane.xlu0 %55 }
 0x12c   :  { %162 = vrsqrt.f32 %v64_v32  ;;  %v61_v35 = vmul.f32 0.0625, %v53_v33  ;;  %v62_v36 = vmul.f32 0.0625, %v56_v34 }
 0x12e   :  { %v65_v37 = vadd.f32 1e-06, %v61_v35  ;;  %v66_v38 = vadd.f32 1e-06, %v62_v36 }
 0x12f   :  { %v59_v39 = vpop.xlane.xlu1 %58 }
 0x130   :  { %164 = vrsqrt.f32 %v65_v37  ;;  %v63_v40 = vmul.f32 0.0625, %v59_v39 }
 0x131   :  { %166 = vrsqrt.f32 %v66_v38 }
 0x132   :  { %v67_v41 = vadd.f32 1e-06, %v63_v40 }
 0x134   :  { %168 = vrsqrt.f32 %v67_v41 }
 0x136   :  { %v163_v42 = vpop.eup %162 }
 0x137   :  { %v72_v44 = vmul.f32 %v163_v42, %v40_v14 }
 0x139   :  { %v83_v46 = vmul.f32 %v143_v43, %v72_v44 }
 0x13a   :  { %v165_v47 = vpop.eup %164 }
 0x13b   :  { %v167_v48 = vpop.eup %166  ;;  %v94_v49 = vadd.f32 %v144_v45, %v83_v46  ;;  %v73_v50 = vmul.f32 %v165_v47, %v41_v22 }
 0x13c   :  { %v74_v51 = vmul.f32 %v167_v48, %v42_v15 }
 0x13d   :  { %v102_v52 = vmul.f32 0.70710677, %v94_v49  ;;  %v84_v53 = vmul.f32 %v143_v43, %v73_v50  ;;  %v98_v1 = vmul.f32 0.5, %v94_v49 }
 0x13e   :  { %v169_v54 = vpop.eup %168  ;;  %v85_v55 = vmul.f32 %v143_v43, %v74_v51 }
 0x13f   :  { %170 = verf.f32 %v102_v52  ;;  %v95_v56 = vadd.f32 %v144_v45, %v84_v53  ;;  %v75_v57 = vmul.f32 %v169_v54, %v43_v23 }
 0x140   :  { %v96_v58 = vadd.f32 %v144_v45, %v85_v55 }
 0x141   :  { %v103_v59 = vmul.f32 0.70710677, %v95_v56  ;;  %v86_v60 = vmul.f32 %v143_v43, %v75_v57  ;;  %v99_v7 = vmul.f32 0.5, %v95_v56 }
 0x142   :  { %v104_v61 = vmul.f32 0.70710677, %v96_v58  ;;  %v100_v9 = vmul.f32 0.5, %v96_v58 }
 0x143   :  { %172 = verf.f32 %v103_v59  ;;  %v97_v62 = vadd.f32 %v144_v45, %v86_v60 }
 0x144   :  { %174 = verf.f32 %v104_v61 }
 0x145   :  { %v105_v63 = vmul.f32 0.70710677, %v97_v62  ;;  %v101_v15 = vmul.f32 0.5, %v97_v62 }
 0x147   :  { %176 = verf.f32 %v105_v63 }
 0x149   :  { %v171_v0 = vpop.eup %170 }
 0x14a   :  { %v110_v2 = vadd.f32 1.0, %v171_v0 }
 0x14c   :  { %v114_v3 = vmul.f32 %v110_v2, %v98_v1 }
 0x14d   :  { %v173_v4 = vpop.eup %172 }
 0x14e   :  { %v175_v5 = vpop.eup %174  ;;  %v149_v6 = vpack.c.bf16 %v114_v3, %v114_v3  ;;  %v111_v8 = vadd.f32 1.0, %v173_v4 }
 0x14f   :  { %v112_v10 = vadd.f32 1.0, %v175_v5 }
 0x150   :  { %135 = vst.msk [vmem:[%s237_s3] sm:$0xf] %vm134_vm1, %v149_v6  ;;  %v115_v11 = vmul.f32 %v111_v8, %v99_v7 }
 0x151   :  { %v177_v12 = vpop.eup %176  ;;  %v116_v13 = vmul.f32 %v112_v10, %v100_v9 }
 0x152   :  { %v150_v14 = vpack.c.bf16 %v115_v11, %v115_v11  ;;  %v113_v16 = vadd.f32 1.0, %v177_v12 }
 0x153   :  { %v151_v17 = vpack.c.bf16 %v116_v13, %v116_v13 }
 0x154   :  { %136 = vst.msk [vmem:[%s237_s3 + $0x4] sm:$0xf] %vm134_vm1, %v150_v14  ;;  %v117_v18 = vmul.f32 %v113_v16, %v101_v15 }
 0x155   :  { %137 = vst.msk [vmem:[%s237_s3 + $0x8] sm:$0xf] %vm134_vm1, %v151_v17 }
 0x156   :  { %v152_v19 = vpack.c.bf16 %v117_v18, %v117_v18 }
 0x158   :  { %138 = vst.msk [vmem:[%s237_s3 + $0xc] sm:$0xf] %vm134_vm1, %v152_v19 }

// kernel: vitsfp_forward.38
= control target key start
LH: loop header
LB: loop body
LE: loop exit
PB: predicated region body
PF: predicated region fallthrough
CT: control target
= control target key end

     0   :  { %s335_s1 = inlined_call_operand.vmem [shape: bf16[128,128], index: 1, kind: input, shape index: {}]   ;;  %s336_s0 = inlined_call_operand.vmem [shape: bf16[32,128], index: 0, kind: input, shape index: {}]   ;;  %s337_s2 = inlined_call_operand.vmem [shape: f32[1,128], index: 2, kind: input, shape index: {}]   ;;  %s338_s3 = inlined_call_operand.vmem [shape: bf16[32,128], index: 3, kind: output, shape index: {}]  }
   0x1   :  { %v266_v0 = vld [vmem:[%s335_s1] sm:$0xff]   ;;  %v267_v1 = vld [vmem:[%s335_s1 + $0x8] sm:$0xff]   ;;  %v268_v2 = vld [vmem:[%s335_s1 + $0x10] sm:$0xff]  }
   0x2   :  { %246 = vmatprep.subr.bf16.mxu0 %v266_v0  ;;  %v269_v3 = vld [vmem:[%s335_s1 + $0x18] sm:$0xff]   ;;  %v274_v4 = vld [vmem:[%s336_s0] sm:$0xff]   ;;  %v271_v6 = vld [vmem:[%s335_s1 + $0x28] sm:$0xff]  }
   0x3   :  { %247 = vmatpush3.bf16.msra.mxu0 %v266_v0  ;;  %262 = vmatprep.mubr.bf16.mxu0 %v274_v4  ;;  %v270_v5 = vld [vmem:[%s335_s1 + $0x20] sm:$0xff]   ;;  %v272_v7 = vld [vmem:[%s335_s1 + $0x30] sm:$0xff]   ;;  %v273_v8 = vld [vmem:[%s335_s1 + $0x38] sm:$0xff]  }
   0x4   :  { %248 = vmatprep.subr.bf16.mxu0 %v267_v1  ;;  %v275_v9 = vld [vmem:[%s336_s0 + $0x8] sm:$0xff]   ;;  %v216_v11 = vld [vmem:[%s337_s2] ss:$0 sm:$0xff] }
   0x7   :  { %249 = vmatpush3.bf16.msra.mxu0 %v267_v1 }
   0x8   :  { %250 = vmatprep.subr.bf16.mxu0 %v268_v2 }
   0xb   :  { %251 = vmatpush3.bf16.msra.mxu0 %v268_v2 }
   0xc   :  { %252 = vmatprep.subr.bf16.mxu0 %v269_v3 }
   0xf   :  { %253 = vmatpush3.bf16.msra.mxu0 %v269_v3 }
  0x10   :  { %254 = vmatprep.subr.bf16.mxu0 %v270_v5 }
  0x13   :  { %255 = vmatpush3.bf16.msra.mxu0 %v270_v5 }
  0x14   :  { %256 = vmatprep.subr.bf16.mxu0 %v271_v6 }
  0x17   :  { %257 = vmatpush3.bf16.msra.mxu0 %v271_v6 }
  0x18   :  { %258 = vmatprep.subr.bf16.mxu0 %v272_v7 }
  0x1b   :  { %259 = vmatpush3.bf16.msra.mxu0 %v272_v7 }
  0x1c   :  { %260 = vmatprep.subr.bf16.mxu0 %v273_v8 }
  0x1f   :  { %261 = vmatpush3.bf16.msra.mxu0 %v273_v8 }
  0x22   :  { %263 = vmatmul.mubr.bf16.vlgmr.msra.gmra.mrb[0].mxu0 %v275_v9 }
  0xf5   :  { %v264_v10 = vpop.f32.mrb[0].mxu0 }
  0xf6   :  { %v141_v12 = vpop.f32.mrb[1].mxu0  ;;  %v180_v14 = vadd.f32 %v264_v10, %v216_v11 }
  0xf7   :  { %v265_v13 = vpop.f32.mrb[2].mxu0  ;;  %v178_v17 = vadd.f32 %v216_v11, %v141_v12 }
  0xf8   :  { %v181_v15 = vadd.f32 %v265_v13, %v216_v11  ;;  %v144_v16 = vpop.f32.mrb[3].mxu0 }
  0xf9   :  { %v179_v18 = vadd.f32 %v216_v11, %v144_v16 }
  0xfa   :  { %v233_v19 = vpack.c.bf16 %v181_v15, %v180_v14 }
  0xfb   :  { %v228_v20 = vpack.c.bf16 %v179_v18, %v178_v17 }
  0xfc   :  { %235 = vst [vmem:[%s338_s3 + $0x8] sm:$0xff] %v233_v19  }
  0xfd   :  { %229 = vst [vmem:[%s338_s3] sm:$0xff] %v228_v20  }

// kernel: vitsfp_forward.39
= control target key start
LH: loop header
LB: loop body
LE: loop exit
PB: predicated region body
PF: predicated region fallthrough
CT: control target
= control target key end

     0   :  { %vm100_vm0 = vcmask 1043456   ;;  %vm75_vm1 = vcmask 64512   ;;  %vm201_vm2 = vcmask 130048   ;;  %vm521_vm3 = vcmask 125952   ;;  %s985_s1 = inlined_call_operand.vmem [shape: bf16[8,16], index: 1, kind: input, shape index: {}]   ;;  %s986_s0 = inlined_call_operand.vmem [shape: bf16[128,8], index: 0, kind: input, shape index: {}]   ;;  %s987_s2 = inlined_call_operand.vmem [shape: f32[1,16], index: 2, kind: input, shape index: {}]   ;;  %s988_s3 = inlined_call_operand.vmem [shape: f32[1,16], index: 3, kind: input, shape index: {}]   ;;  %s989_s4 = inlined_call_operand.vmem [shape: bf16[128,16], index: 4, kind: output, shape index: {}]  }
   0x1   :  { %v34_v0 = vld [vmem:[%s985_s1] sm:$0xf]  ;;  %v625_v4 = vld [vmem:[%s986_s0 + $0x8] sm:$0xff]   ;;  %v627_v6 = vld [vmem:[%s986_s0 + $0x10] sm:$0xff]  }
   0x2   :  { %621 = vmatprep.subr.msk.bf16.mxu0 %vm100_vm0, %v34_v0  ;;  %622 = vmatprep.subr.msk.bf16.mxu1 %vm100_vm0, %v34_v0  ;;  %v102_v1 = vsel %vm100_vm0, %v34_v0, 0  ;;  %v623_v2 = vld [vmem:[%s986_s0] sm:$0xff]   ;;  %v626_v5 = vld [vmem:[%s986_s0 + $0x28] sm:$0xff]   ;;  %v629_v7 = vld [vmem:[%s986_s0 + $0x30] sm:$0xff]  }
   0x3   :  { %602 = vmatpush3.bf16.msra.mxu0 %v102_v1  ;;  %620 = vmatpush3.bf16.msra.mxu1 %v102_v1  ;;  %v624_v3 = vld [vmem:[%s986_s0 + $0x20] sm:$0xff]   ;;  %v628_v8 = vld [vmem:[%s986_s0 + $0x18] sm:$0xff]  }
   0x4   :  { %603 = vmatprep.mubr.msk.bf16.mxu0 %vm75_vm1, %v623_v2  ;;  %611 = vmatprep.mubr.msk.bf16.mxu1 %vm75_vm1, %v624_v3  ;;  %v630_v9 = vld [vmem:[%s986_s0 + $0x38] sm:$0xff]  }
   0x6   :  { %604 = vmatmul.mubr.msk.bf16.vlgmr.msra.gmra.mrb[0].mxu0 %vm75_vm1, %v625_v4  ;;  %612 = vmatmul.mubr.msk.bf16.vlgmr.msra.gmra.mrb[0].mxu1 %vm75_vm1, %v626_v5 }
   0x7   :  { %607 = vmatprep.mubr.msk.bf16.mxu0 %vm75_vm1, %v627_v6  ;;  %615 = vmatprep.mubr.msk.bf16.mxu1 %vm75_vm1, %v629_v7 }
   0xe   :  { %608 = vmatmul.mubr.msk.bf16.gmra.mrb[4].mxu0 %vm75_vm1, %v628_v8  ;;  %616 = vmatmul.mubr.msk.bf16.gmra.mrb[4].mxu1 %vm75_vm1, %v630_v9 }
  0xd9   :  { %v605_v10 = vpop.f32.mrb[0].mxu0  ;;  %v613_v11 = vpop.f32.mrb[0].mxu1 }
  0xda   :  { %v138_v12 = vpop.f32.mrb[1].mxu0  ;;  %v208_v13 = vsel %vm201_vm2, %v605_v10, 0.0  ;;  %v724_v14 = vpop.f32.mrb[1].mxu1  ;;  %v232_v15 = vsel %vm201_vm2, %v613_v11, 0.0 }
  0xdb   :  { %209 = vadd.xlane.f32.xlu1 %v208_v13  ;;  %v606_v16 = vpop.f32.mrb[2].mxu0  ;;  %233 = vadd.xlane.f32.xlu0 %v232_v15  ;;  %v614_v17 = vpop.f32.mrb[2].mxu1  ;;  %v202_v21 = vsel %vm201_vm2, %v138_v12, 0.0  ;;  %v226_v26 = vsel %vm201_vm2, %v724_v14, 0.0 }
  0xdc   :  { %v727_v18 = vpop.f32.mrb[3].mxu0  ;;  %v729_v19 = vpop.f32.mrb[3].mxu1  ;;  %v211_v20 = vsel %vm201_vm2, %v606_v16, 0.0  ;;  %v235_v23 = vsel %vm201_vm2, %v614_v17, 0.0 }
  0xdd   :  { %v229_v32 = vsel %vm201_vm2, %v729_v19, 0.0  ;;  %v205_v33 = vsel %vm201_vm2, %v727_v18, 0.0 }
  0xdf   :  { %212 = vadd.xlane.f32.xlu1 %v211_v20  ;;  %203 = vadd.xlane.f32.xlu0 %v202_v21 }
  0xe1   :  { %v733_v22 = vpop.f32.mrb[4].mxu0  ;;  %v738_v25 = vpop.f32.mrb[4].mxu1 }
  0xe2   :  { %v736_v24 = vpop.f32.mrb[5].mxu0  ;;  %v744_v28 = vpop.f32.mrb[5].mxu1  ;;  %v220_v35 = vsel %vm201_vm2, %v733_v22, 0.0  ;;  %v244_v41 = vsel %vm201_vm2, %v738_v25, 0.0 }
  0xe3   :  { %236 = vadd.xlane.f32.xlu1 %v235_v23  ;;  %v742_v27 = vpop.f32.mrb[6].mxu0  ;;  %227 = vadd.xlane.f32.xlu0 %v226_v26  ;;  %v748_v30 = vpop.f32.mrb[6].mxu1  ;;  %v214_v37 = vsel %vm201_vm2, %v736_v24, 0.0  ;;  %v238_v39 = vsel %vm201_vm2, %v744_v28, 0.0 }
  0xe4   :  { %v746_v29 = vpop.f32.mrb[7].mxu0  ;;  %v750_v31 = vpop.f32.mrb[7].mxu1  ;;  %v223_v34 = vsel %vm201_vm2, %v742_v27, 0.0  ;;  %v247_v40 = vsel %vm201_vm2, %v748_v30, 0.0 }
  0xe5   :  { %v217_v36 = vsel %vm201_vm2, %v746_v29, 0.0  ;;  %v241_v38 = vsel %vm201_vm2, %v750_v31, 0.0 }
  0xe7   :  { %230 = vadd.xlane.f32.xlu1 %v229_v32  ;;  %206 = vadd.xlane.f32.xlu0 %v205_v33 }
  0xeb   :  { %224 = vadd.xlane.f32.xlu1 %v223_v34  ;;  %221 = vadd.xlane.f32.xlu0 %v220_v35 }
  0xef   :  { %218 = vadd.xlane.f32.xlu1 %v217_v36  ;;  %215 = vadd.xlane.f32.xlu0 %v214_v37 }
  0xf3   :  { %242 = vadd.xlane.f32.xlu1 %v241_v38  ;;  %239 = vadd.xlane.f32.xlu0 %v238_v39 }
  0xf7   :  { %248 = vadd.xlane.f32.xlu1 %v247_v40  ;;  %245 = vadd.xlane.f32.xlu0 %v244_v41 }
 0x168   :  { %v210_v42 = vpop.xlane.xlu1 %209  ;;  %v234_v43 = vpop.xlane.xlu0 %233 }
 0x169   :  { %v253_v44 = vmul.f32 0.0625, %v210_v42  ;;  %v261_v45 = vmul.f32 0.0625, %v234_v43 }
 0x16b   :  { %v772_v46 = vsub.f32 %v605_v10, %v253_v44  ;;  %v774_v47 = vsub.f32 %v613_v11, %v261_v45 }
 0x16c   :  { %v213_v48 = vpop.xlane.xlu1 %212  ;;  %v204_v49 = vpop.xlane.xlu0 %203 }
 0x16d   :  { %v254_v50 = vmul.f32 0.0625, %v213_v48  ;;  %v285_v51 = vmul.f32 %v772_v46, %v772_v46  ;;  %v251_v52 = vmul.f32 0.0625, %v204_v49  ;;  %v293_v55 = vmul.f32 %v774_v47, %v774_v47 }
 0x16f   :  { %v778_v53 = vsub.f32 %v606_v16, %v254_v50  ;;  %v305_v54 = vsel %vm201_vm2, %v285_v51, 0.0  ;;  %v783_v56 = vsub.f32 %v138_v12, %v251_v52  ;;  %v329_v63 = vsel %vm201_vm2, %v293_v55, 0.0 }
 0x170   :  { %v237_v57 = vpop.xlane.xlu1 %236  ;;  %306 = vadd.xlane.f32.xlu0 %v305_v54  ;;  %v228_v58 = vpop.xlane.xlu0 %227 }
 0x171   :  { %v262_v59 = vmul.f32 0.0625, %v237_v57  ;;  %v286_v60 = vmul.f32 %v778_v53, %v778_v53  ;;  %v259_v61 = vmul.f32 0.0625, %v228_v58  ;;  %v283_v1 = vmul.f32 %v783_v56, %v783_v56 }
 0x173   :  { %v787_v62 = vsub.f32 %v614_v17, %v262_v59  ;;  %v308_v0 = vsel %vm201_vm2, %v286_v60, 0.0  ;;  %v794_v2 = vsub.f32 %v724_v14, %v259_v61  ;;  %v299_v8 = vsel %vm201_vm2, %v283_v1, 0.0 }
 0x174   :  { %v231_v3 = vpop.xlane.xlu1 %230  ;;  %330 = vadd.xlane.f32.xlu0 %v329_v63  ;;  %309 = vadd.xlane.f32.xlu1 %v308_v0  ;;  %v207_v5 = vpop.xlane.xlu0 %206 }
 0x175   :  { %v260_v4 = vmul.f32 0.0625, %v231_v3  ;;  %v294_v6 = vmul.f32 %v787_v62, %v787_v62  ;;  %v252_v7 = vmul.f32 0.0625, %v207_v5  ;;  %v291_v10 = vmul.f32 %v794_v2, %v794_v2 }
 0x177   :  { %v332_v9 = vsel %vm201_vm2, %v294_v6, 0.0  ;;  %v803_v11 = vsub.f32 %v729_v19, %v260_v4  ;;  %v806_v12 = vsub.f32 %v727_v18, %v252_v7  ;;  %v323_v20 = vsel %vm201_vm2, %v291_v10, 0.0 }
 0x178   :  { %300 = vadd.xlane.f32.xlu0 %v299_v8  ;;  %v225_v13 = vpop.xlane.xlu1 %224  ;;  %333 = vadd.xlane.f32.xlu1 %v332_v9  ;;  %v222_v14 = vpop.xlane.xlu0 %221 }
 0x179   :  { %v258_v15 = vmul.f32 0.0625, %v225_v13  ;;  %v257_v16 = vmul.f32 0.0625, %v222_v14  ;;  %v284_v17 = vmul.f32 %v806_v12, %v806_v12  ;;  %v292_v26 = vmul.f32 %v803_v11, %v803_v11 }
 0x17b   :  { %v812_v21 = vsub.f32 %v733_v22, %v257_v16  ;;  %v815_v19 = vsub.f32 %v742_v27, %v258_v15  ;;  %v302_v18 = vsel %vm201_vm2, %v284_v17, 0.0  ;;  %v326_v37 = vsel %vm201_vm2, %v292_v26, 0.0 }
 0x17c   :  { %324 = vadd.xlane.f32.xlu0 %v323_v20  ;;  %v219_v23 = vpop.xlane.xlu1 %218  ;;  %v216_v32 = vpop.xlane.xlu0 %215  ;;  %303 = vadd.xlane.f32.xlu1 %v302_v18 }
 0x17d   :  { %v256_v33 = vmul.f32 0.0625, %v219_v23  ;;  %v255_v34 = vmul.f32 0.0625, %v216_v32  ;;  %v289_v35 = vmul.f32 %v812_v21, %v812_v21  ;;  %v290_v39 = vmul.f32 %v815_v19, %v815_v19  ;;  %v866_v32 = vld [vmem:[%s987_s2] ss:$0 sm:$0xff] }
 0x17f   :  { %v823_v22 = vsub.f32 %v746_v29, %v256_v33  ;;  %v826_v27 = vsub.f32 %v736_v24, %v255_v34  ;;  %v317_v36 = vsel %vm201_vm2, %v289_v35, 0.0  ;;  %v320_v48 = vsel %vm201_vm2, %v290_v39, 0.0 }
 0x180   :  { %v243_v38 = vpop.xlane.xlu1 %242  ;;  %318 = vadd.xlane.f32.xlu0 %v317_v36  ;;  %v240_v40 = vpop.xlane.xlu0 %239  ;;  %327 = vadd.xlane.f32.xlu1 %v326_v37  ;;  %v872_v36 = vld [vmem:[%s988_s3] ss:$0 sm:$0xff] }
 0x181   :  { %v264_v41 = vmul.f32 0.0625, %v243_v38  ;;  %v263_v42 = vmul.f32 0.0625, %v240_v40  ;;  %v287_v29 = vmul.f32 %v826_v27, %v826_v27  ;;  %v288_v24 = vmul.f32 %v823_v22, %v823_v22 }
 0x183   :  { %v837_v43 = vsub.f32 %v744_v28, %v263_v42  ;;  %v840_v44 = vsub.f32 %v750_v31, %v264_v41  ;;  %v311_v45 = vsel %vm201_vm2, %v287_v29, 0.0  ;;  %v314_v55 = vsel %vm201_vm2, %v288_v24, 0.0 }
 0x184   :  { %v249_v49 = vpop.xlane.xlu1 %248  ;;  %312 = vadd.xlane.f32.xlu0 %v311_v45  ;;  %v246_v50 = vpop.xlane.xlu0 %245  ;;  %321 = vadd.xlane.f32.xlu1 %v320_v48 }
 0x185   :  { %v266_v51 = vmul.f32 0.0625, %v249_v49  ;;  %v265_v52 = vmul.f32 0.0625, %v246_v50  ;;  %v295_v54 = vmul.f32 %v837_v43, %v837_v43  ;;  %v296_v58 = vmul.f32 %v840_v44, %v840_v44 }
 0x187   :  { %v848_v28 = vsub.f32 %v738_v25, %v265_v52  ;;  %v851_v31 = vsub.f32 %v748_v30, %v266_v51  ;;  %v335_v57 = vsel %vm201_vm2, %v295_v54, 0.0  ;;  %v338_v61 = vsel %vm201_vm2, %v296_v58, 0.0 }
 0x188   :  { %336 = vadd.xlane.f32.xlu0 %v335_v57  ;;  %315 = vadd.xlane.f32.xlu1 %v314_v55 }
 0x189   :  { %v297_v59 = vmul.f32 %v848_v28, %v848_v28  ;;  %v298_v25 = vmul.f32 %v851_v31, %v851_v31 }
 0x18b   :  { %v341_v60 = vsel %vm201_vm2, %v297_v59, 0.0  ;;  %v344_v30 = vsel %vm201_vm2, %v298_v25, 0.0 }
 0x18c   :  { %342 = vadd.xlane.f32.xlu0 %v341_v60  ;;  %339 = vadd.xlane.f32.xlu1 %v338_v61 }
 0x190   :  { %345 = vadd.xlane.f32.xlu1 %v344_v30 }
 0x1fd   :  { %v307_v63 = vpop.xlane.xlu0 %306 }
 0x1fe   :  { %v349_v0 = vmul.f32 0.0625, %v307_v63 }
 0x200   :  { %v365_v1 = vadd.f32 1e-06, %v349_v0 }
 0x201   :  { %v331_v3 = vpop.xlane.xlu0 %330  ;;  %v310_v4 = vpop.xlane.xlu1 %309 }
 0x202   :  { %631 = vrsqrt.f32 %v365_v1  ;;  %v357_v5 = vmul.f32 0.0625, %v331_v3  ;;  %v350_v6 = vmul.f32 0.0625, %v310_v4 }
 0x204   :  { %v373_v7 = vadd.f32 1e-06, %v357_v5  ;;  %v366_v8 = vadd.f32 1e-06, %v350_v6 }
 0x205   :  { %v301_v9 = vpop.xlane.xlu0 %300  ;;  %v334_v10 = vpop.xlane.xlu1 %333 }
 0x206   :  { %633 = vrsqrt.f32 %v373_v7  ;;  %v347_v13 = vmul.f32 0.0625, %v301_v9  ;;  %v358_v14 = vmul.f32 0.0625, %v334_v10 }
 0x207   :  { %635 = vrsqrt.f32 %v366_v8 }
 0x208   :  { %v363_v15 = vadd.f32 1e-06, %v347_v13  ;;  %v374_v16 = vadd.f32 1e-06, %v358_v14 }
 0x209   :  { %v325_v17 = vpop.xlane.xlu0 %324  ;;  %v304_v18 = vpop.xlane.xlu1 %303 }
 0x20a   :  { %637 = vrsqrt.f32 %v363_v15  ;;  %v355_v20 = vmul.f32 0.0625, %v325_v17  ;;  %v348_v23 = vmul.f32 0.0625, %v304_v18 }
 0x20b   :  { %639 = vrsqrt.f32 %v374_v16 }
 0x20c   :  { %v632_v26 = vpop.eup %631  ;;  %v371_v33 = vadd.f32 1e-06, %v355_v20  ;;  %v364_v35 = vadd.f32 1e-06, %v348_v23 }
 0x20d   :  { %v397_v34 = vmul.f32 %v632_v26, %v772_v46  ;;  %v319_v37 = vpop.xlane.xlu0 %318  ;;  %v328_v38 = vpop.xlane.xlu1 %327 }
 0x20e   :  { %641 = vrsqrt.f32 %v371_v33  ;;  %v353_v40 = vmul.f32 0.0625, %v319_v37  ;;  %v356_v41 = vmul.f32 0.0625, %v328_v38 }
 0x20f   :  { %v420_v39 = vmul.f32 %v866_v32, %v397_v34  ;;  %643 = vrsqrt.f32 %v364_v35 }
 0x210   :  { %v634_v42 = vpop.eup %633  ;;  %v369_v45 = vadd.f32 1e-06, %v353_v40  ;;  %v372_v48 = vadd.f32 1e-06, %v356_v41 }
 0x211   :  { %v636_v29 = vpop.eup %635  ;;  %v443_v24 = vadd.f32 %v872_v36, %v420_v39  ;;  %v405_v46 = vmul.f32 %v634_v42, %v774_v47  ;;  %v313_v50 = vpop.xlane.xlu0 %312 }
 0x212   :  { %v398_v49 = vmul.f32 %v636_v29, %v778_v53  ;;  %v322_v51 = vpop.xlane.xlu1 %321  ;;  %645 = vrsqrt.f32 %v369_v45  ;;  %v351_v55 = vmul.f32 0.0625, %v313_v50 }
 0x213   :  { %v578_v52 = vpack.c.bf16 %v443_v24, %v443_v24  ;;  %v428_v54 = vmul.f32 %v866_v32, %v405_v46  ;;  %647 = vrsqrt.f32 %v372_v48  ;;  %v354_v59 = vmul.f32 0.0625, %v322_v51 }
 0x214   :  { %v638_v57 = vpop.eup %637  ;;  %v421_v58 = vmul.f32 %v866_v32, %v398_v49  ;;  %v367_v61 = vadd.f32 1e-06, %v351_v55 }
 0x215   :  { %v640_v60 = vpop.eup %639  ;;  %524 = vst.msk [vmem:[%s989_s4 + $0x8] sm:$0xf] %vm521_vm3, %v578_v52  ;;  %v451_v47 = vadd.f32 %v872_v36, %v428_v54  ;;  %v395_v53 = vmul.f32 %v638_v57, %v783_v56  ;;  %v370_v63 = vadd.f32 1e-06, %v354_v59  ;;  %v337_v0 = vpop.xlane.xlu0 %336 }
 0x216   :  { %v444_v25 = vadd.f32 %v872_v36, %v421_v58  ;;  %v406_v30 = vmul.f32 %v640_v60, %v787_v62  ;;  %v316_v1 = vpop.xlane.xlu1 %315  ;;  %649 = vrsqrt.f32 %v367_v61  ;;  %v359_v5 = vmul.f32 0.0625, %v337_v0 }
 0x217   :  { %v586_v3 = vpack.c.bf16 %v451_v47, %v451_v47  ;;  %v418_v4 = vmul.f32 %v866_v32, %v395_v53  ;;  %651 = vrsqrt.f32 %v370_v63  ;;  %v352_v9 = vmul.f32 0.0625, %v316_v1 }
 0x218   :  { %v642_v6 = vpop.eup %641  ;;  %v579_v7 = vpack.c.bf16 %v444_v25, %v444_v25  ;;  %v429_v8 = vmul.f32 %v866_v32, %v406_v30  ;;  %v375_v13 = vadd.f32 1e-06, %v359_v5 }
 0x219   :  { %v644_v56 = vpop.eup %643  ;;  %532 = vst.msk [vmem:[%s989_s4 + $0x28] sm:$0xf] %vm521_vm3, %v586_v3  ;;  %v441_v62 = vadd.f32 %v872_v36, %v418_v4  ;;  %v403_v10 = vmul.f32 %v642_v6, %v794_v2  ;;  %v368_v16 = vadd.f32 1e-06, %v352_v9  ;;  %v343_v17 = vpop.xlane.xlu0 %342 }
 0x21a   :  { %525 = vst.msk [vmem:[%s989_s4 + $0xc] sm:$0xf] %vm521_vm3, %v579_v7  ;;  %v452_v14 = vadd.f32 %v872_v36, %v429_v8  ;;  %v396_v15 = vmul.f32 %v644_v56, %v806_v12  ;;  %v340_v20 = vpop.xlane.xlu1 %339  ;;  %653 = vrsqrt.f32 %v375_v13  ;;  %v361_v26 = vmul.f32 0.0625, %v343_v17 }
 0x21b   :  { %v576_v18 = vpack.c.bf16 %v441_v62, %v441_v62  ;;  %v426_v23 = vmul.f32 %v866_v32, %v403_v10  ;;  %655 = vrsqrt.f32 %v368_v16  ;;  %v360_v34 = vmul.f32 0.0625, %v340_v20 }
 0x21c   :  { %v587_v33 = vpack.c.bf16 %v452_v14, %v452_v14  ;;  %v419_v2 = vmul.f32 %v866_v32, %v396_v15  ;;  %v646_v35 = vpop.eup %645  ;;  %v377_v37 = vadd.f32 1e-06, %v361_v26 }
 0x21d   :  { %522 = vst.msk [vmem:[%s989_s4] sm:$0xf] %vm521_vm3, %v576_v18  ;;  %v449_v12 = vadd.f32 %v872_v36, %v426_v23  ;;  %v648_v38 = vpop.eup %647  ;;  %v401_v40 = vmul.f32 %v646_v35, %v812_v21  ;;  %v376_v41 = vadd.f32 1e-06, %v360_v34 }
 0x21e   :  { %533 = vst.msk [vmem:[%s989_s4 + $0x2c] sm:$0xf] %vm521_vm3, %v587_v33  ;;  %v442_v39 = vadd.f32 %v872_v36, %v419_v2  ;;  %v346_v42 = vpop.xlane.xlu1 %345  ;;  %v404_v24 = vmul.f32 %v648_v38, %v803_v11  ;;  %657 = vrsqrt.f32 %v377_v37 }
 0x21f   :  { %v584_v29 = vpack.c.bf16 %v449_v12, %v449_v12  ;;  %v362_v46 = vmul.f32 0.0625, %v346_v42  ;;  %v424_v48 = vmul.f32 %v866_v32, %v401_v40  ;;  %659 = vrsqrt.f32 %v376_v41 }
 0x220   :  { %v577_v45 = vpack.c.bf16 %v442_v39, %v442_v39  ;;  %v650_v49 = vpop.eup %649  ;;  %v427_v50 = vmul.f32 %v866_v32, %v404_v24 }
 0x221   :  { %530 = vst.msk [vmem:[%s989_s4 + $0x20] sm:$0xf] %vm521_vm3, %v584_v29  ;;  %v378_v21 = vadd.f32 1e-06, %v362_v46  ;;  %v652_v51 = vpop.eup %651  ;;  %v447_v11 = vadd.f32 %v872_v36, %v424_v48  ;;  %v399_v52 = vmul.f32 %v650_v49, %v826_v27 }
 0x222   :  { %523 = vst.msk [vmem:[%s989_s4 + $0x4] sm:$0xf] %vm521_vm3, %v577_v45  ;;  %v450_v54 = vadd.f32 %v872_v36, %v427_v50  ;;  %v402_v55 = vmul.f32 %v652_v51, %v815_v19 }
 0x223   :  { %661 = vrsqrt.f32 %v378_v21  ;;  %v582_v57 = vpack.c.bf16 %v447_v11, %v447_v11  ;;  %v422_v58 = vmul.f32 %v866_v32, %v399_v52 }
 0x224   :  { %v654_v59 = vpop.eup %653  ;;  %v585_v60 = vpack.c.bf16 %v450_v54, %v450_v54  ;;  %v425_v47 = vmul.f32 %v866_v32, %v402_v55 }
 0x225   :  { %v656_v53 = vpop.eup %655  ;;  %528 = vst.msk [vmem:[%s989_s4 + $0x18] sm:$0xf] %vm521_vm3, %v582_v57  ;;  %v445_v27 = vadd.f32 %v872_v36, %v422_v58  ;;  %v407_v61 = vmul.f32 %v654_v59, %v837_v43 }
 0x226   :  { %531 = vst.msk [vmem:[%s989_s4 + $0x24] sm:$0xf] %vm521_vm3, %v585_v60  ;;  %v448_v19 = vadd.f32 %v872_v36, %v425_v47  ;;  %v400_v25 = vmul.f32 %v656_v53, %v823_v22 }
 0x227   :  { %v580_v30 = vpack.c.bf16 %v445_v27, %v445_v27  ;;  %v430_v63 = vmul.f32 %v866_v32, %v407_v61 }
 0x228   :  { %v658_v0 = vpop.eup %657  ;;  %v583_v1 = vpack.c.bf16 %v448_v19, %v448_v19  ;;  %v423_v3 = vmul.f32 %v866_v32, %v400_v25 }
 0x229   :  { %v660_v4 = vpop.eup %659  ;;  %526 = vst.msk [vmem:[%s989_s4 + $0x10] sm:$0xf] %vm521_vm3, %v580_v30  ;;  %v453_v43 = vadd.f32 %v872_v36, %v430_v63  ;;  %v409_v5 = vmul.f32 %v658_v0, %v848_v28 }
 0x22a   :  { %529 = vst.msk [vmem:[%s989_s4 + $0x1c] sm:$0xf] %vm521_vm3, %v583_v1  ;;  %v446_v22 = vadd.f32 %v872_v36, %v423_v3  ;;  %v408_v6 = vmul.f32 %v660_v4, %v840_v44 }
 0x22b   :  { %v588_v7 = vpack.c.bf16 %v453_v43, %v453_v43  ;;  %v432_v8 = vmul.f32 %v866_v32, %v409_v5 }
 0x22c   :  { %v581_v56 = vpack.c.bf16 %v446_v22, %v446_v22  ;;  %v431_v62 = vmul.f32 %v866_v32, %v408_v6 }
 0x22d   :  { %v662_v9 = vpop.eup %661  ;;  %534 = vst.msk [vmem:[%s989_s4 + $0x30] sm:$0xf] %vm521_vm3, %v588_v7  ;;  %v455_v28 = vadd.f32 %v872_v36, %v432_v8 }
 0x22e   :  { %v410_v10 = vmul.f32 %v662_v9, %v851_v31  ;;  %527 = vst.msk [vmem:[%s989_s4 + $0x14] sm:$0xf] %vm521_vm3, %v581_v56  ;;  %v454_v44 = vadd.f32 %v872_v36, %v431_v62 }
 0x22f   :  { %v590_v13 = vpack.c.bf16 %v455_v28, %v455_v28 }
 0x230   :  { %v433_v14 = vmul.f32 %v866_v32, %v410_v10  ;;  %v589_v15 = vpack.c.bf16 %v454_v44, %v454_v44 }
 0x231   :  { %536 = vst.msk [vmem:[%s989_s4 + $0x38] sm:$0xf] %vm521_vm3, %v590_v13 }
 0x232   :  { %v456_v16 = vadd.f32 %v872_v36, %v433_v14  ;;  %535 = vst.msk [vmem:[%s989_s4 + $0x34] sm:$0xf] %vm521_vm3, %v589_v15 }
 0x234   :  { %v591_v31 = vpack.c.bf16 %v456_v16, %v456_v16 }
 0x236   :  { %537 = vst.msk [vmem:[%s989_s4 + $0x3c] sm:$0xf] %vm521_vm3, %v591_v31 }

// kernel: vitsfp_forward.42
= control target key start
LH: loop header
LB: loop body
LE: loop exit
PB: predicated region body
PF: predicated region fallthrough
CT: control target
= control target key end

     0   :  { %vm40_vm0 = vcmask 130048   ;;  %vm187_vm1 = vcmask 125952   ;;  %s297_s1 = inlined_call_operand.vmem [shape: bf16[16,16], index: 1, kind: input, shape index: {}]   ;;  %s298_s0 = inlined_call_operand.vmem [shape: bf16[32,16], index: 0, kind: input, shape index: {}]   ;;  %s299_s2 = inlined_call_operand.vmem [shape: f32[1,16], index: 2, kind: input, shape index: {}]   ;;  %s300_s3 = inlined_call_operand.vmem [shape: f32[1,16], index: 3, kind: input, shape index: {}]   ;;  %s301_s4 = inlined_call_operand.vmem [shape: bf16[32,16], index: 4, kind: output, shape index: {}]  }
   0x1   :  { %v220_v0 = vld [vmem:[%s297_s1] sm:$0xff]   ;;  %v222_v2 = vld [vmem:[%s298_s0 + $0x8] sm:$0xff]  }
   0x2   :  { %v221_v1 = vld [vmem:[%s298_s0] sm:$0xff]   ;;  %214 = vmatprep.subr.bf16.mxu0 %v220_v0 }
   0x3   :  { %215 = vmatpush3.bf16.msra.mxu0 %v220_v0  ;;  %216 = vmatprep.mubr.msk.bf16.mxu0 %vm40_vm0, %v221_v1  ;;  %v201_v44 = vld [vmem:[%s299_s2] ss:$0 sm:$0xff] }
   0x4   :  { %v202_v46 = vld [vmem:[%s300_s3] ss:$0 sm:$0xff] }
   0x6   :  { %217 = vmatmul.mubr.msk.bf16.vlgmr.msra.gmra.mrb[0].mxu0 %vm40_vm0, %v222_v2 }
  0xd9   :  { %v218_v3 = vpop.f32.mrb[0].mxu0 }
  0xda   :  { %v81_v4 = vpop.f32.mrb[1].mxu0  ;;  %v102_v5 = vsel %vm40_vm0, %v218_v3, 0.0 }
  0xdb   :  { %103 = vadd.xlane.f32.xlu1 %v102_v5  ;;  %v219_v6 = vpop.f32.mrb[2].mxu0  ;;  %v96_v7 = vsel %vm40_vm0, %v81_v4, 0.0 }
  0xdc   :  { %97 = vadd.xlane.f32.xlu0 %v96_v7  ;;  %v84_v8 = vpop.f32.mrb[3].mxu0  ;;  %v105_v9 = vsel %vm40_vm0, %v219_v6, 0.0 }
  0xdd   :  { %v99_v10 = vsel %vm40_vm0, %v84_v8, 0.0 }
  0xdf   :  { %106 = vadd.xlane.f32.xlu1 %v105_v9 }
  0xe0   :  { %100 = vadd.xlane.f32.xlu0 %v99_v10 }
 0x168   :  { %v104_v11 = vpop.xlane.xlu1 %103 }
 0x169   :  { %v111_v12 = vmul.f32 0.0625, %v104_v11  ;;  %v98_v13 = vpop.xlane.xlu0 %97 }
 0x16a   :  { %v109_v14 = vmul.f32 0.0625, %v98_v13 }
 0x16b   :  { %v115_v15 = vsub.f32 %v218_v3, %v111_v12 }
 0x16c   :  { %v113_v16 = vsub.f32 %v81_v4, %v109_v14  ;;  %v107_v17 = vpop.xlane.xlu1 %106 }
 0x16d   :  { %v112_v18 = vmul.f32 0.0625, %v107_v17  ;;  %v101_v19 = vpop.xlane.xlu0 %100  ;;  %v119_v25 = vmul.f32 %v115_v15, %v115_v15 }
 0x16e   :  { %v110_v20 = vmul.f32 0.0625, %v101_v19  ;;  %v117_v21 = vmul.f32 %v113_v16, %v113_v16 }
 0x16f   :  { %v116_v22 = vsub.f32 %v219_v6, %v112_v18  ;;  %v127_v27 = vsel %vm40_vm0, %v119_v25, 0.0 }
 0x170   :  { %v114_v23 = vsub.f32 %v84_v8, %v110_v20  ;;  %v121_v24 = vsel %vm40_vm0, %v117_v21, 0.0 }
 0x171   :  { %122 = vadd.xlane.f32.xlu0 %v121_v24  ;;  %v120_v29 = vmul.f32 %v116_v22, %v116_v22 }
 0x172   :  { %v118_v26 = vmul.f32 %v114_v23, %v114_v23 }
 0x173   :  { %v130_v30 = vsel %vm40_vm0, %v120_v29, 0.0 }
 0x174   :  { %v124_v28 = vsel %vm40_vm0, %v118_v26, 0.0 }
 0x175   :  { %128 = vadd.xlane.f32.xlu0 %v127_v27  ;;  %125 = vadd.xlane.f32.xlu1 %v124_v28 }
 0x179   :  { %131 = vadd.xlane.f32.xlu1 %v130_v30 }
 0x1fe   :  { %v123_v31 = vpop.xlane.xlu0 %122 }
 0x1ff   :  { %v133_v32 = vmul.f32 0.0625, %v123_v31 }
 0x201   :  { %v137_v33 = vadd.f32 1e-06, %v133_v32 }
 0x202   :  { %v126_v34 = vpop.xlane.xlu1 %125  ;;  %v129_v35 = vpop.xlane.xlu0 %128 }
 0x203   :  { %223 = vrsqrt.f32 %v137_v33  ;;  %v134_v36 = vmul.f32 0.0625, %v126_v34  ;;  %v135_v37 = vmul.f32 0.0625, %v129_v35 }
 0x205   :  { %v138_v38 = vadd.f32 1e-06, %v134_v36  ;;  %v139_v39 = vadd.f32 1e-06, %v135_v37 }
 0x206   :  { %v132_v40 = vpop.xlane.xlu1 %131 }
 0x207   :  { %225 = vrsqrt.f32 %v138_v38  ;;  %v136_v41 = vmul.f32 0.0625, %v132_v40 }
 0x208   :  { %227 = vrsqrt.f32 %v139_v39 }
 0x209   :  { %v140_v42 = vadd.f32 1e-06, %v136_v41 }
 0x20b   :  { %229 = vrsqrt.f32 %v140_v42 }
 0x20d   :  { %v224_v43 = vpop.eup %223 }
 0x20e   :  { %v145_v45 = vmul.f32 %v224_v43, %v113_v16 }
 0x210   :  { %v156_v47 = vmul.f32 %v201_v44, %v145_v45 }
 0x211   :  { %v226_v48 = vpop.eup %225 }
 0x212   :  { %v228_v49 = vpop.eup %227  ;;  %v167_v50 = vadd.f32 %v202_v46, %v156_v47  ;;  %v146_v51 = vmul.f32 %v226_v48, %v114_v23 }
 0x213   :  { %v147_v52 = vmul.f32 %v228_v49, %v115_v15 }
 0x214   :  { %v207_v53 = vpack.c.bf16 %v167_v50, %v167_v50  ;;  %v157_v54 = vmul.f32 %v201_v44, %v146_v51 }
 0x215   :  { %v230_v55 = vpop.eup %229  ;;  %v158_v56 = vmul.f32 %v201_v44, %v147_v52 }
 0x216   :  { %188 = vst.msk [vmem:[%s301_s4] sm:$0xf] %vm187_vm1, %v207_v53  ;;  %v168_v57 = vadd.f32 %v202_v46, %v157_v54  ;;  %v148_v58 = vmul.f32 %v230_v55, %v116_v22 }
 0x217   :  { %v169_v59 = vadd.f32 %v202_v46, %v158_v56 }
 0x218   :  { %v208_v60 = vpack.c.bf16 %v168_v57, %v168_v57  ;;  %v159_v61 = vmul.f32 %v201_v44, %v148_v58 }
 0x219   :  { %v209_v62 = vpack.c.bf16 %v169_v59, %v169_v59 }
 0x21a   :  { %189 = vst.msk [vmem:[%s301_s4 + $0x4] sm:$0xf] %vm187_vm1, %v208_v60  ;;  %v170_v63 = vadd.f32 %v202_v46, %v159_v61 }
 0x21b   :  { %190 = vst.msk [vmem:[%s301_s4 + $0x8] sm:$0xf] %vm187_vm1, %v209_v62 }
 0x21c   :  { %v210_v0 = vpack.c.bf16 %v170_v63, %v170_v63 }
 0x21e   :  { %191 = vst.msk [vmem:[%s301_s4 + $0xc] sm:$0xf] %vm187_vm1, %v210_v0 }

// kernel: vitsfp_forward.40
= control target key start
LH: loop header
LB: loop body
LE: loop exit
PB: predicated region body
PF: predicated region fallthrough
CT: control target
= control target key end

     0   :  { %s2322_s15 = smov 0   ;;  %s2875_s0 = inlined_call_operand.vmem [shape: bf16[2,102,16], index: 0, kind: input, shape index: {}]   ;;  %s2876_s1 = inlined_call_operand.vmem [shape: bf16[9,16,16], index: 1, kind: input, shape index: {}]   ;;  %s2877_s2 = inlined_call_operand.vmem [shape: f32[1,16], index: 2, kind: input, shape index: {}]   ;;  %s2878_s3 = inlined_call_operand.vmem [shape: f32[1,16], index: 3, kind: input, shape index: {}]   ;;  %s2879_s4 = inlined_call_operand.vmem [shape: f32[2,80,16], index: 4, kind: output, shape index: {}]  }
   0x1 LB: > { %s1715_s16 = sadd.s32 4294967295, %s2293_s15   ;;  %p1719_p0 = scmp.ge.s32.totalorder %s2293_s15, 1  ;;  %s2293_s15 = sphi %s2322_s15, %s14_s15  }
   0x2   : > { %p162_p1 = scmp.lt.s32.totalorder %s2293_s15, 3 }
   0x4   : > { %p163_p2 = pnand %p1719_p0, %p162_p1 }
   0x5   : > { %v2333_v0 = vld [vmem:[%s2876_s1 + $0x20] sm:$0xff] (!%p163_p2)   ;;  %v2295_v1 = vmov (!%p163_p2), 0.0   ;;  %v2236_v2 = vld [vmem:[%s2876_s1 + $0x8] sm:$0xff] (!%p163_p2)   ;;  %vm2296_vm0 = vmmov (!%p163_p2), 0   ;;  %p188_p3 = scmp.lt.s32.totalorder (!%p163_p2), %s1715_s16, 1  ;;  %vm294_vm3 = vcmask (!%p163_p2), 130048  }
   0x6   : > { %166 = sbr.rel (%p163_p2) target bundleno = 735 (0x2df), region = 36  ;;  %1961 = vmatprep.subr.bf16.mxu0 (!%p163_p2), %v2295_v1  ;;  %1873 = vmatprep.subr.bf16.mxu1 (!%p163_p2), %v2295_v1  ;;  %vm243_vm1 = vsmask.f32 (!%p163_p2), 7424  ;;  %vm759_vm2 = vsmask.f32 (!%p163_p2), 6400  ;;  %v2243_v27 = vld [vmem:[%s2876_s1] sm:$0xff] (!%p163_p2)  }
   0x7   : > { %1962 = vmatpush3.bf16.msra.mxu0 (!%p163_p2), %v2333_v0  ;;  %1875 = vmatprep.mubr.msk.bf16.mxu1 (!%p163_p2), %vm2296_vm0, %v2295_v1  ;;  %v2241_v36 = vld [vmem:[%s2876_s1 + $0x28] sm:$0xff] (!%p163_p2)   ;;  %vm924_vm4 = vcmask (!%p163_p2), 1045504   ;;  %vm479_vm5 = vcmask (!%p163_p2), 1046528   ;;  %vm1369_vm6 = vcmask (!%p163_p2), 1044480   ;;  %vm1204_vm7 = vsmask.f32 (!%p163_p2), 5376 }
   0x8   : > { %1874 = vmatpush3.bf16.msra.mxu1 (!%p163_p2), %v2236_v2  ;;  %1963 = vmatprep.mubr.msk.bf16.mxu0 (!%p163_p2), %vm2296_vm0, %v2295_v1 }
   0x9   : > { %1983 = vmatprep.subr.bf16.mxu0 (!%p163_p2), %v2295_v1  ;;  %1895 = vmatprep.subr.bf16.mxu1 (!%p163_p2), %v2295_v1 }
   0xd   : > { %s2881_s16 = smov (!%p188_p3, %s1715_s16), 1 }
   0xe   : > { %s2223_s21 = smul.u32 52, %s2881_s16 }
   0xf   : > { %s2224_s13 = smul.u32 80, %s2881_s16 }
  0x10   : > { %s2353_s24 = scalar_lea.vmem %s2875_s0, %s2223_s21 }
  0x11   : > { %v199_v3 = vld [vmem:[%s2353_s24] sm:$0xf]  ;;  %v2357_v4 = vld [vmem:[%s2353_s24 + $0x4] sm:$0xf]  ;;  %v2363_v6 = vld [vmem:[%s2353_s24 + $0x8] sm:$0xff]   ;;  %s2822_s21 = scalar_lea.vmem %s2879_s4, %s2224_s13 }
  0x12   : > { %v2360_v5 = vcombine.low %v199_v3, %v2357_v4  ;;  %v595_v7 = vld [vmem:[%s2353_s24 + $0x4] sm:$0xe]  ;;  %v2367_v8 = vld [vmem:[%s2353_s24 + $0x8] sm:$0xf]  ;;  %v252_v11 = vshll.u32 %v2363_v6, 16  ;;  %v2376_v13 = vld [vmem:[%s2353_s24 + $0xc] sm:$0xff]  }
  0x13   : > { %v2373_v12 = vcombine.low %v595_v7, %v2367_v8  ;;  %v2379_v14 = vld [vmem:[%s2353_s24 + $0x10] sm:$0xff]   ;;  %v769_v19 = vshrl.u32 %v2376_v13, 16  ;;  %v772_v20 = vshll.u32 %v2376_v13, 16  ;;  %v256_v21 = vshrl.u32 %v2363_v6, 16  ;;  %v2397_v34 = vld [vmem:[%s2353_s24 + $0x1c] sm:$0xff]   ;;  %v2425_v53 = vld [vmem:[%s2353_s24 + $0x28] sm:$0xff]  }
  0x14   : > { %v245_v9 = vshrl.u32 %v2360_v5, 16  ;;  %v247_v10 = vshll.u32 %v2360_v5, 16  ;;  %v254_v16 = vrot.slane %v252_v11, 1  ;;  %v2387_v22 = vld [vmem:[%s2353_s24 + $0x14] sm:$0xff]   ;;  %v260_v26 = vshll.u32 %v2379_v14, 16  ;;  %v2420_v51 = vld [vmem:[%s2353_s24 + $0x20] sm:$0xff]  }
  0x15   : > { %v761_v17 = vshrl.u32 %v2373_v12, 16  ;;  %v764_v18 = vshll.u32 %v2373_v12, 16  ;;  %v771_v28 = vrot.slane %v769_v19, 1  ;;  %v774_v29 = vrot.slane %v772_v20, 2  ;;  %v2406_v41 = vld [vmem:[%s2353_s24 + $0x18] sm:$0xff]   ;;  %v2430_v56 = vld [vmem:[%s2353_s24 + $0x20] sm:$0xff]  }
  0x16   : > { %v249_v15 = vrot.slane %v247_v10, 1  ;;  %v778_v30 = vshrl.u32 %v2387_v22, 16  ;;  %v781_v33 = vshll.u32 %v2387_v22, 16  ;;  %v258_v38 = vor.u32 %v256_v21, %v254_v16  ;;  %v472_v57 = vld [vmem:[%s2353_s24] sm:$0xe] }
  0x17   : > { %v763_v24 = vrot.slane %v761_v17, 1  ;;  %v766_v25 = vrot.slane %v764_v18, 2  ;;  %v775_v35 = vor.u32 %v774_v29, %v771_v28  ;;  %v262_v39 = vrot.slane %v260_v26, 1  ;;  %v917_v62 = vld [vmem:[%s2353_s24 + $0x4] sm:$0xc] }
  0x18   : > { %v250_v23 = vor.u32 %v249_v15, %v245_v9  ;;  %v780_v37 = vrot.slane %v778_v30, 1  ;;  %v783_v40 = vrot.slane %v781_v33, 2  ;;  %v787_v43 = vshrl.u32 %v2397_v34, 16  ;;  %v2262_v15 = vld [vmem:[%s2353_s24 + $0x30] ss:$0 sps:$4 sm:$0x33]  }
  0x19   : > { %v767_v32 = vor.u32 %v766_v25, %v763_v24  ;;  %v790_v44 = vshll.u32 %v2397_v34, 16  ;;  %v263_v46 = vsel %vm243_vm1, %v258_v38, %v262_v39  ;;  %v264_v47 = vshrl.u32 %v2379_v14, 16  ;;  %v2472_v25 = vld [vmem:[%s2353_s24 + $0x28] ss:$0 sps:$4 sm:$0x11]  }
  0x1a   : > { %v255_v31 = vsel %vm243_vm1, %v250_v23, %v254_v16  ;;  %v784_v45 = vor.u32 %v783_v40, %v780_v37  ;;  %v268_v48 = vshll.u32 %v2406_v41, 16  ;;  %v789_v49 = vrot.slane %v787_v43, 1 }
  0x1b   : > { %1876 = vmatmul.mubr.msk.bf16.vlgmr.msra.gmra.mrb[0].mxu1 %vm294_vm3, %v255_v31  ;;  %v776_v42 = vsel %vm759_vm2, %v767_v32, %v775_v35  ;;  %v792_v50 = vrot.slane %v790_v44, 2  ;;  %v266_v54 = vor.u32 %v264_v47, %v262_v39  ;;  %v1744_v58 = vcombine.low %v472_v57, %v2357_v4  ;;  %v2266_v39 = vld [vmem:[%s2353_s24 + $0x2c] ss:$0 sps:$4 sm:$0x11]   ;;  %v2512_v47 = vld [vmem:[%s2353_s24 + $0x10] sm:$0xff]  }
  0x1c   : > { %1879 = vmatprep.mubr.msk.bf16.mxu1 %vm2296_vm0, %v2295_v1  ;;  %1896 = vmatpush3.bf16.msra.mxu1 %v2243_v27  ;;  %v785_v52 = vsel %vm759_vm2, %v775_v35, %v784_v45  ;;  %v270_v55 = vrot.slane %v268_v48, 1  ;;  %v481_v59 = vrot.slane %v2363_v6, 1  ;;  %v272_v61 = vshrl.u32 %v2406_v41, 16  ;;  %v1362_v35 = vld [vmem:[%s2353_s24 + $0x8] sm:$0x8]  ;;  %v2515_v48 = vld [vmem:[%s2353_s24 + $0x18] sm:$0xff]  }
  0x1d   : > { %1917 = vmatprep.subr.bf16.mxu1 %v2295_v1  ;;  %1964 = vmatmul.mubr.msk.bf16.vlgmr.msra.gmra.mrb[0].mxu0 %vm294_vm3, %v776_v42  ;;  %v2436_v60 = vor.u32 %v792_v50, %v789_v49  ;;  %v483_v63 = vrot.slane %v2379_v14, 1  ;;  %v480_v2 = vrot.slane %v1744_v58, 1  ;;  %v1087_v3 = vrot.slane %v2420_v51, 2  ;;  %v2249_v42 = vld [vmem:[%s2876_s1 + $0x30] sm:$0xff]  }
  0x1e   : > { %1984 = vmatpush3.bf16.msra.mxu0 %v2241_v36  ;;  %1967 = vmatprep.mubr.msk.bf16.mxu0 %vm2296_vm0, %v2295_v1  ;;  %v1089_v4 = vrot.slane %v2425_v53, 2  ;;  %v485_v7 = vrot.slane %v2406_v41, 1  ;;  %v271_v9 = vsel %vm243_vm1, %v266_v54, %v270_v55  ;;  %v276_v10 = vshll.u32 %v2430_v56, 16  ;;  %v2492_v36 = vld [vmem:[%s2353_s24 + $0x24] sm:$0xff]  }
  0x1f   : > { %2005 = vmatprep.subr.bf16.mxu0 %v2295_v1  ;;  %v2449_v11 = vsel %vm479_vm5, %v481_v59, %v483_v63  ;;  %v2453_v16 = vsel %vm479_vm5, %v480_v2, %v481_v59  ;;  %v1091_v19 = vrot.slane %v2262_v15, 2  ;;  %v794_v20 = vsel %vm759_vm2, %v784_v45, %v2436_v60 }
  0x20   : > { %v2458_v17 = vsel %vm924_vm4, %v1087_v3, %v1089_v4  ;;  %v2463_v18 = vsel %vm479_vm5, %v483_v63, %v485_v7  ;;  %v1776_v21 = vcombine.low %v917_v62, %v2367_v8  ;;  %v274_v23 = vor.u32 %v272_v61, %v270_v55 }
  0x21   : > { %v278_v24 = vrot.slane %v276_v10, 1  ;;  %v2475_v26 = vsel %vm924_vm4, %v1089_v4, %v1091_v19  ;;  %v637_v27 = vrot.slane %v2373_v12, 1  ;;  %v638_v8 = vrot.slane %v2376_v13, 1 }
  0x22   : > { %v925_v28 = vrot.slane %v1776_v21, 2  ;;  %v926_v29 = vrot.slane %v2376_v13, 2  ;;  %v640_v30 = vrot.slane %v2387_v22, 1  ;;  %v280_v32 = vshrl.u32 %v2430_v56, 16  ;;  %v2498_v13 = vld [vmem:[%s2353_s24 + $0xc] sm:$0xf] }
  0x23   : > { %1880 = vmatmul.mubr.msk.bf16.gmra.mrb[4].mxu1 %vm294_vm3, %v263_v46  ;;  %v279_v31 = vsel %vm243_vm1, %v274_v23, %v278_v24  ;;  %v284_v33 = vshll.u32 %v2472_v25, 16  ;;  %v2488_v12 = vsel %vm479_vm5, %v637_v27, %v638_v8  ;;  %v642_v38 = vrot.slane %v2397_v34, 1 }
  0x24   : > { %1883 = vmatprep.mubr.msk.bf16.mxu1 %vm2296_vm0, %v2295_v1  ;;  %v2495_v37 = vsel %vm479_vm5, %v638_v8, %v640_v30  ;;  %v927_v40 = vsel %vm924_vm4, %v925_v28, %v926_v29  ;;  %v644_v43 = vrot.slane %v2492_v36, 1  ;;  %v1808_v44 = vcombine.low %v1362_v35, %v2498_v13  ;;  %v2251_v28 = vld [vmem:[%s2876_s1 + $0x10] sm:$0xff]  }
  0x25   : > { %1968 = vmatmul.mubr.msk.bf16.gmra.mrb[4].mxu0 %vm294_vm3, %v785_v52  ;;  %v282_v45 = vor.u32 %v280_v32, %v278_v24  ;;  %v286_v46 = vrot.slane %v284_v33, 1  ;;  %v2518_v49 = vsel %vm479_vm5, %v640_v30, %v642_v38  ;;  %v1371_v54 = vrot.slane %v2512_v47, 3 }
  0x26   : > { %1971 = vmatprep.mubr.msk.bf16.mxu0 %vm2296_vm0, %v2295_v1  ;;  %v2521_v50 = vsel %vm479_vm5, %v642_v38, %v644_v43  ;;  %v1370_v52 = vrot.slane %v1808_v44, 3  ;;  %v646_v55 = vrot.slane %v2266_v39, 1  ;;  %v1373_v57 = vrot.slane %v2515_v48, 3 }
  0x27   : > { %v928_v58 = vrot.slane %v2387_v22, 2  ;;  %v796_v59 = vshrl.u32 %v2492_v36, 16  ;;  %v799_v61 = vshll.u32 %v2492_v36, 16  ;;  %v287_v62 = vsel %vm243_vm1, %v282_v45, %v286_v46 }
  0x28   : > { %v2534_v63 = vsel %vm1369_vm6, %v1370_v52, %v1371_v54  ;;  %v2537_v2 = vsel %vm479_vm5, %v644_v43, %v646_v55  ;;  %v2540_v4 = vsel %vm1369_vm6, %v1371_v54, %v1373_v57  ;;  %v1375_v19 = vrot.slane %v2420_v51, 3  ;;  %v2260_v54 = vld [vmem:[%s2876_s1 + $0x18] sm:$0xff]  }
  0x29   : > { %v801_v10 = vrot.slane %v799_v61, 2  ;;  %v929_v22 = vsel %vm924_vm4, %v926_v29, %v928_v58  ;;  %v930_v24 = vrot.slane %v2397_v34, 2  ;;  %v1377_v32 = vrot.slane %v2425_v53, 3  ;;  %v2570_v34 = vld [vmem:[%s2353_s24 + $0x30] ss:$0 sps:$4 sm:$0x77]  }
  0x2a   : > { %v2553_v23 = vsel %vm1369_vm6, %v1373_v57, %v1375_v19  ;;  %v1379_v38 = vrot.slane %v2570_v34, 3  ;;  %v1083_v45 = vrot.slane %v2512_v47, 2  ;;  %v1085_v46 = vrot.slane %v2515_v48, 2 }
  0x2b   : > { %1884 = vmatmul.mubr.msk.bf16.gmra.mrb[8].mxu1 %vm294_vm3, %v271_v9  ;;  %v798_v9 = vrot.slane %v796_v59, 1  ;;  %v931_v30 = vsel %vm924_vm4, %v928_v58, %v930_v24  ;;  %v2576_v35 = vsel %vm1369_vm6, %v1375_v19, %v1377_v32  ;;  %v1214_v57 = vshrl.u32 %v2512_v47, 16 }
  0x2c   : > { %1887 = vmatprep.mubr.msk.bf16.mxu1 %vm2296_vm0, %v2295_v1  ;;  %v2584_v39 = vsel %vm1369_vm6, %v1377_v32, %v1379_v38  ;;  %v1086_v52 = vsel %vm924_vm4, %v1083_v45, %v1085_v46  ;;  %v1088_v55 = vsel %vm924_vm4, %v1085_v46, %v1087_v3  ;;  %v1217_v58 = vshll.u32 %v2512_v47, 16 }
  0x2d   : > { %1972 = vmatmul.mubr.msk.bf16.gmra.mrb[8].mxu0 %vm294_vm3, %v794_v20  ;;  %v802_v15 = vor.u32 %v801_v10, %v798_v9  ;;  %v2253_v20 = vld [vmem:[%s2353_s24 + $0x2c] ss:$0 sps:$4 sm:$0x33]   ;;  %v1216_v61 = vrot.slane %v1214_v57, 2  ;;  %v1223_v10 = vshrl.u32 %v2515_v48, 16 }
  0x2e   : > { %1985 = vmatprep.mubr.msk.bf16.mxu0 %vm2296_vm0, %v2295_v1  ;;  %v805_v27 = vshrl.u32 %v2253_v20, 16  ;;  %v808_v8 = vshll.u32 %v2253_v20, 16 }
  0x2f   : > { %v2550_v21 = vsel %vm759_vm2, %v2436_v60, %v802_v15 }
  0x30   : > { %v807_v29 = vrot.slane %v805_v27, 1  ;;  %v810_v60 = vrot.slane %v808_v8, 2 }
  0x33   : > { %1888 = vmatmul.mubr.msk.bf16.gmra.mrb[12].mxu1 %vm294_vm3, %v279_v31  ;;  %v811_v31 = vor.u32 %v810_v60, %v807_v29  ;;  %v1241_v29 = vshrl.u32 %v2425_v53, 16 }
  0x34   : > { %1891 = vmatprep.mubr.msk.bf16.mxu1 %vm2296_vm0, %v2295_v1 }
  0x35   : > { %1986 = vmatmul.mubr.msk.bf16.vlgmr.msra.gmra.mrb[0].mxu0 %vm294_vm3, %v927_v40  ;;  %v2573_v33 = vsel %vm759_vm2, %v802_v15, %v811_v31  ;;  %v1225_v15 = vrot.slane %v1223_v10, 2 }
  0x36   : > { %2006 = vmatpush3.bf16.msra.mxu0 %v2249_v42  ;;  %1989 = vmatprep.mubr.msk.bf16.mxu0 %vm2296_vm0, %v2295_v1  ;;  %v934_v42 = vrot.slane %v2253_v20, 2  ;;  %v1235_v20 = vshll.u32 %v2420_v51, 16 }
  0x37   : > { %2027 = vmatprep.subr.bf16.mxu0 %v2295_v1 }
  0x3b   : > { %1892 = vmatmul.mubr.msk.bf16.gmra.mrb[16].mxu1 %vm294_vm3, %v287_v62  ;;  %v1219_v62 = vrot.slane %v1217_v58, 3 }
  0x3c   : > { %1897 = vmatprep.mubr.msk.bf16.mxu1 %vm2296_vm0, %v2295_v1 }
  0x3d   : > { %1990 = vmatmul.mubr.msk.bf16.gmra.mrb[4].mxu0 %vm294_vm3, %v929_v22  ;;  %v1220_v47 = vor.u32 %v1219_v62, %v1216_v61 }
  0x3e   : > { %1993 = vmatprep.mubr.msk.bf16.mxu0 %vm2296_vm0, %v2295_v1 }
  0x43   : > { %1898 = vmatmul.mubr.msk.bf16.vlgmr.msra.gmra.mrb[0].mxu1 %vm294_vm3, %v2360_v5  ;;  %v932_v5 = vrot.slane %v2492_v36, 2  ;;  %v1040_v36 = vld [vmem:[%s2353_s24 + $0x8] sm:$0xc] }
  0x44   : > { %1901 = vmatprep.mubr.msk.bf16.mxu1 %vm2296_vm0, %v2295_v1  ;;  %1918 = vmatpush3.bf16.msra.mxu1 %v2251_v28  ;;  %v1785_v44 = vcombine.low %v1040_v36, %v2498_v13  ;;  %v2256_v13 = vld [vmem:[%s2876_s1 + $0x38] sm:$0xff]   ;;  %v1237_v28 = vrot.slane %v1235_v20, 3 }
  0x45   : > { %1939 = vmatprep.subr.bf16.mxu1 %v2295_v1  ;;  %1994 = vmatmul.mubr.msk.bf16.gmra.mrb[8].mxu0 %vm294_vm3, %v931_v30  ;;  %v933_v40 = vsel %vm924_vm4, %v930_v24, %v932_v5  ;;  %v935_v43 = vsel %vm924_vm4, %v932_v5, %v934_v42  ;;  %v1243_v30 = vrot.slane %v1241_v29, 2  ;;  %v1253_v5 = vshll.u32 %v2570_v34, 16 }
  0x46   : > { %1997 = vmatprep.mubr.msk.bf16.mxu0 %vm2296_vm0, %v2295_v1  ;;  %v1206_v3 = vshrl.u32 %v1785_v44, 16 }
  0x48   : > { %v1208_v59 = vrot.slane %v1206_v3, 2 }
  0x4b   : > { %1902 = vmatmul.mubr.msk.bf16.gmra.mrb[4].mxu1 %vm294_vm3, %v2363_v6  ;;  %v1082_v6 = vrot.slane %v1785_v44, 2 }
  0x4c   : > { %1905 = vmatprep.mubr.msk.bf16.mxu1 %vm2296_vm0, %v2295_v1 }
  0x4d   : > { %1998 = vmatmul.mubr.msk.bf16.gmra.mrb[12].mxu0 %vm294_vm3, %v933_v40  ;;  %v1255_v40 = vrot.slane %v1253_v5, 3 }
  0x4e   : > { %2001 = vmatprep.mubr.msk.bf16.mxu0 %vm2296_vm0, %v2295_v1 }
  0x53   : > { %1906 = vmatmul.mubr.msk.bf16.gmra.mrb[8].mxu1 %vm294_vm3, %v2379_v14  ;;  %v1084_v14 = vsel %vm924_vm4, %v1082_v6, %v1083_v45 }
  0x54   : > { %1909 = vmatprep.mubr.msk.bf16.mxu1 %vm2296_vm0, %v2295_v1 }
  0x55   : > { %2002 = vmatmul.mubr.msk.bf16.gmra.mrb[16].mxu0 %vm294_vm3, %v935_v43 }
  0x56   : > { %2007 = vmatprep.mubr.msk.bf16.mxu0 %vm2296_vm0, %v2295_v1 }
  0x5b   : > { %1910 = vmatmul.mubr.msk.bf16.gmra.mrb[12].mxu1 %vm294_vm3, %v2406_v41 }
  0x5c   : > { %1913 = vmatprep.mubr.msk.bf16.mxu1 %vm2296_vm0, %v2295_v1 }
  0x5d   : > { %2008 = vmatmul.mubr.msk.bf16.vlgmr.msra.gmra.mrb[0].mxu0 %vm294_vm3, %v1084_v14 }
  0x5e   : > { %2028 = vmatpush3.bf16.msra.mxu0 %v2256_v13  ;;  %2011 = vmatprep.mubr.msk.bf16.mxu0 %vm2296_vm0, %v2295_v1 }
  0x5f   : > { %2049 = vmatprep.subr.bf16.mxu0 %v2295_v1 }
  0x63   : > { %1914 = vmatmul.mubr.msk.bf16.gmra.mrb[16].mxu1 %vm294_vm3, %v2430_v56 }
  0x64   : > { %1919 = vmatprep.mubr.msk.bf16.mxu1 %vm2296_vm0, %v2295_v1 }
  0x65   : > { %2012 = vmatmul.mubr.msk.bf16.gmra.mrb[4].mxu0 %vm294_vm3, %v1086_v52 }
  0x66   : > { %2015 = vmatprep.mubr.msk.bf16.mxu0 %vm2296_vm0, %v2295_v1 }
  0x6b   : > { %1920 = vmatmul.mubr.msk.bf16.vlgmr.msra.gmra.mrb[0].mxu1 %vm294_vm3, %v2453_v16  ;;  %v1209_v16 = vshll.u32 %v1785_v44, 16 }
  0x6c   : > { %1923 = vmatprep.mubr.msk.bf16.mxu1 %vm2296_vm0, %v2295_v1  ;;  %1940 = vmatpush3.bf16.msra.mxu1 %v2260_v54 }
  0x6d   : > { %2071 = vmatprep.subr.bf16.mxu1 %v2295_v1  ;;  %2016 = vmatmul.mubr.msk.bf16.gmra.mrb[8].mxu0 %vm294_vm3, %v1088_v55 }
  0x6e   : > { %2019 = vmatprep.mubr.msk.bf16.mxu0 %vm2296_vm0, %v2295_v1 }
  0x73   : > { %1924 = vmatmul.mubr.msk.bf16.gmra.mrb[4].mxu1 %vm294_vm3, %v2449_v11  ;;  %v1211_v11 = vrot.slane %v1209_v16, 3 }
  0x74   : > { %1927 = vmatprep.mubr.msk.bf16.mxu1 %vm2296_vm0, %v2295_v1 }
  0x75   : > { %2020 = vmatmul.mubr.msk.bf16.gmra.mrb[12].mxu0 %vm294_vm3, %v2458_v17  ;;  %v487_v17 = vrot.slane %v2430_v56, 1  ;;  %v1212_v9 = vor.u32 %v1211_v11, %v1208_v59 }
  0x76   : > { %2023 = vmatprep.mubr.msk.bf16.mxu0 %vm2296_vm0, %v2295_v1 }
  0x77   : > { %v488_v22 = vsel %vm479_vm5, %v485_v7, %v487_v17  ;;  %v1221_v56 = vsel %vm1204_vm7, %v1212_v9, %v1220_v47  ;;  %v1232_v7 = vshrl.u32 %v2420_v51, 16  ;;  %v1244_v51 = vshll.u32 %v2425_v53, 16 }
  0x78   : > { %v1250_v53 = vshrl.u32 %v2570_v34, 16 }
  0x79   : > { %v1234_v8 = vrot.slane %v1232_v7, 2  ;;  %v1246_v31 = vrot.slane %v1244_v51, 3 }
  0x7a   : > { %v1252_v38 = vrot.slane %v1250_v53, 2 }
  0x7b   : > { %1928 = vmatmul.mubr.msk.bf16.gmra.mrb[8].mxu1 %vm294_vm3, %v2463_v18  ;;  %v1226_v18 = vshll.u32 %v2515_v48, 16  ;;  %v489_v48 = vrot.slane %v2472_v25, 1  ;;  %v1238_v25 = vor.u32 %v1237_v28, %v1234_v8  ;;  %v1247_v32 = vor.u32 %v1246_v31, %v1243_v30 }
  0x7c   : > { %1931 = vmatprep.mubr.msk.bf16.mxu1 %vm2296_vm0, %v2295_v1 }
  0x7d   : > { %2024 = vmatmul.mubr.msk.bf16.gmra.mrb[16].mxu0 %vm294_vm3, %v2475_v26  ;;  %v2263_v26 = vld [vmem:[%s2876_s1 + $0x40] sm:$0xff]   ;;  %v1228_v19 = vrot.slane %v1226_v18, 3  ;;  %v490_v24 = vsel %vm479_vm5, %v487_v17, %v489_v48 }
  0x7e   : > { %2029 = vmatprep.mubr.msk.bf16.mxu0 %vm2296_vm0, %v2295_v1 }
  0x7f   : > { %v1229_v41 = vor.u32 %v1228_v19, %v1225_v15 }
  0x81   : > { %v1230_v27 = vsel %vm1204_vm7, %v1220_v47, %v1229_v41  ;;  %v1239_v60 = vsel %vm1204_vm7, %v1229_v41, %v1238_v25 }
  0x83   : > { %1932 = vmatmul.mubr.msk.bf16.gmra.mrb[12].mxu1 %vm294_vm3, %v488_v22 }
  0x84   : > { %1935 = vmatprep.mubr.msk.bf16.mxu1 %vm2296_vm0, %v2295_v1 }
  0x85   : > { %2030 = vmatmul.mubr.msk.bf16.vlgmr.msra.gmra.mrb[0].mxu0 %vm294_vm3, %v1221_v56 }
  0x86   : > { %2050 = vmatpush3.bf16.msra.mxu0 %v2263_v26  ;;  %2033 = vmatprep.mubr.msk.bf16.mxu0 %vm2296_vm0, %v2295_v1 }
  0x8b   : > { %1936 = vmatmul.mubr.msk.bf16.gmra.mrb[16].mxu1 %vm294_vm3, %v490_v24 }
  0x8c   : > { %1941 = vmatprep.mubr.msk.bf16.mxu1 %vm2296_vm0, %v2295_v1 }
  0x8d   : > { %2034 = vmatmul.mubr.msk.bf16.gmra.mrb[4].mxu0 %vm294_vm3, %v1230_v27 }
  0x8e   : > { %2037 = vmatprep.mubr.msk.bf16.mxu0 %vm2296_vm0, %v2295_v1 }
  0x93   : > { %1942 = vmatmul.mubr.msk.bf16.vlgmr.msra.gmra.mrb[0].mxu1 %vm294_vm3, %v2488_v12  ;;  %v1248_v12 = vsel %vm1204_vm7, %v1238_v25, %v1247_v32 }
  0x94   : > { %1945 = vmatprep.mubr.msk.bf16.mxu1 %vm2296_vm0, %v2295_v1  ;;  %2072 = vmatpush3.bf16.msra.mxu1 %v2333_v0  ;;  %v1256_v0 = vor.u32 %v1255_v40, %v1252_v38 }
  0x95   : > { %2038 = vmatmul.mubr.msk.bf16.gmra.mrb[8].mxu0 %vm294_vm3, %v1239_v60 }
  0x96   : > { %2041 = vmatprep.mubr.msk.bf16.mxu0 %vm2296_vm0, %v2295_v1  ;;  %v1257_v34 = vsel %vm1204_vm7, %v1247_v32, %v1256_v0 }
  0x9b   : > { %1946 = vmatmul.mubr.msk.bf16.gmra.mrb[4].mxu1 %vm294_vm3, %v2495_v37 }
  0x9c   : > { %1949 = vmatprep.mubr.msk.bf16.mxu1 %vm2296_vm0, %v2295_v1 }
  0x9d   : > { %2042 = vmatmul.mubr.msk.bf16.gmra.mrb[12].mxu0 %vm294_vm3, %v1248_v12 }
  0x9e   : > { %2045 = vmatprep.mubr.msk.bf16.mxu0 %vm2296_vm0, %v2295_v1 }
  0xa3   : > { %1950 = vmatmul.mubr.msk.bf16.gmra.mrb[8].mxu1 %vm294_vm3, %v2518_v49 }
  0xa4   : > { %1953 = vmatprep.mubr.msk.bf16.mxu1 %vm2296_vm0, %v2295_v1 }
  0xa5   : > { %2046 = vmatmul.mubr.msk.bf16.gmra.mrb[16].mxu0 %vm294_vm3, %v1257_v34 }
  0xa6   : > { %2051 = vmatprep.mubr.msk.bf16.mxu0 %vm2296_vm0, %v2295_v1 }
  0xab   : > { %1954 = vmatmul.mubr.msk.bf16.gmra.mrb[12].mxu1 %vm294_vm3, %v2521_v50 }
  0xac   : > { %1957 = vmatprep.mubr.msk.bf16.mxu1 %vm2296_vm0, %v2295_v1 }
  0xad   : > { %2052 = vmatmul.mubr.msk.bf16.vlgmr.msra.gmra.mrb[0].mxu0 %vm294_vm3, %v2534_v63 }
  0xae   : > { %2055 = vmatprep.mubr.msk.bf16.mxu0 %vm2296_vm0, %v2295_v1 }
  0xb3   : > { %1958 = vmatmul.mubr.msk.bf16.gmra.mrb[16].mxu1 %vm294_vm3, %v2537_v2 }
  0xb4   : > { %1975 = vmatprep.mubr.msk.bf16.mxu1 %vm2296_vm0, %v2295_v1 }
  0xb5   : > { %2056 = vmatmul.mubr.msk.bf16.gmra.mrb[4].mxu0 %vm294_vm3, %v2540_v4 }
  0xb6   : > { %2059 = vmatprep.mubr.msk.bf16.mxu0 %vm2296_vm0, %v2295_v1 }
  0xbb   : > { %1976 = vmatmul.mubr.msk.bf16.vlgmr.msra.gmra.mrb[12].mxu1 %vm294_vm3, %v2550_v21 }
  0xbc   : > { %1979 = vmatprep.mubr.msk.bf16.mxu1 %vm2296_vm0, %v2295_v1 }
  0xbd   : > { %2060 = vmatmul.mubr.msk.bf16.gmra.mrb[8].mxu0 %vm294_vm3, %v2553_v23 }
  0xbe   : > { %2063 = vmatprep.mubr.msk.bf16.mxu0 %vm2296_vm0, %v2295_v1 }
  0xc3   : > { %1980 = vmatmul.mubr.msk.bf16.gmra.mrb[16].mxu1 %vm294_vm3, %v2573_v33 }
  0xc5   : > { %2064 = vmatmul.mubr.msk.bf16.gmra.mrb[12].mxu0 %vm294_vm3, %v2576_v35 }
  0xc6   : > { %2067 = vmatprep.mubr.msk.bf16.mxu0 %vm2296_vm0, %v2295_v1 }
  0xcd   : > { %2068 = vmatmul.mubr.msk.bf16.gmra.mrb[16].mxu0 %vm294_vm3, %v2584_v39 }
 0x166   : > { %v703_v37 = vpop.f32.mrb[0].mxu1 }
 0x167   : > { %v1943_v49 = vpop.f32.mrb[1].mxu1 }
 0x168   : > { %v706_v50 = vpop.f32.mrb[2].mxu1 }
 0x169   : > { %v1944_v63 = vpop.f32.mrb[3].mxu1 }
 0x16e   : > { %v711_v2 = vpop.f32.mrb[4].mxu1 }
 0x16f   : > { %v1947_v4 = vpop.f32.mrb[5].mxu1 }
 0x170   : > { %v714_v21 = vpop.f32.mrb[6].mxu1 }
 0x171   : > { %v1948_v23 = vpop.f32.mrb[7].mxu1 }
 0x176   : > { %v719_v42 = vpop.f32.mrb[8].mxu1 }
 0x177   : > { %v1951_v36 = vpop.f32.mrb[9].mxu1 }
 0x178   : > { %v722_v33 = vpop.f32.mrb[10].mxu1 }
 0x179   : > { %v1952_v43 = vpop.f32.mrb[11].mxu1 }
 0x180   : > { %v1436_v44 = vpop.f32.mrb[0].mxu0 }
 0x181   : > { %v2073_v35 = vadd.f32 %v1436_v44, %v703_v37  ;;  %v2053_v6 = vpop.f32.mrb[1].mxu0 }
 0x182   : > { %v1439_v45 = vpop.f32.mrb[2].mxu0 }
 0x183   : > { %v2074_v1 = vadd.f32 %v1439_v45, %v706_v50  ;;  %v2054_v14 = vpop.f32.mrb[3].mxu0  ;;  %v1485_v39 = vsel %vm294_vm3, %v2073_v35, 0.0 }
 0x184   : > { %1486 = vadd.xlane.f32.xlu0 %v1485_v39 }
 0x185   : > { %v1488_v13 = vsel %vm294_vm3, %v2074_v1, 0.0 }
 0x188   : > { %v1444_v46 = vpop.f32.mrb[4].mxu0  ;;  %1489 = vadd.xlane.f32.xlu0 %v1488_v13 }
 0x189   : > { %v2075_v52 = vadd.f32 %v1444_v46, %v711_v2  ;;  %v2057_v54 = vpop.f32.mrb[5].mxu0 }
 0x18a   : > { %v1447_v55 = vpop.f32.mrb[6].mxu0 }
 0x18b   : > { %v2076_v3 = vadd.f32 %v1447_v55, %v714_v21  ;;  %v2058_v16 = vpop.f32.mrb[7].mxu0  ;;  %v1491_v57 = vsel %vm294_vm3, %v2075_v52, 0.0 }
 0x18c   : > { %1492 = vadd.xlane.f32.xlu1 %v1491_v57 }
 0x18d   : > { %v1494_v11 = vsel %vm294_vm3, %v2076_v3, 0.0 }
 0x18e   : > { %v892_v58 = vpop.f32.mrb[12].mxu1 }
 0x18f   : > { %v1977_v59 = vpop.f32.mrb[13].mxu1 }
 0x190   : > { %v895_v61 = vpop.f32.mrb[14].mxu1  ;;  %v1452_v62 = vpop.f32.mrb[8].mxu0  ;;  %1495 = vadd.xlane.f32.xlu1 %v1494_v11 }
 0x191   : > { %v1978_v17 = vpop.f32.mrb[15].mxu1  ;;  %v2077_v9 = vadd.f32 %v1452_v62, %v719_v42  ;;  %v2061_v47 = vpop.f32.mrb[9].mxu0 }
 0x192   : > { %v1455_v10 = vpop.f32.mrb[10].mxu0 }
 0x193   : > { %v2078_v18 = vadd.f32 %v1455_v10, %v722_v33  ;;  %v2062_v22 = vpop.f32.mrb[11].mxu0  ;;  %v1497_v56 = vsel %vm294_vm3, %v2077_v9, 0.0 }
 0x194   : > { %1498 = vadd.xlane.f32.xlu0 %v1497_v56 }
 0x195   : > { %v1500_v26 = vsel %vm294_vm3, %v2078_v18, 0.0 }
 0x196   : > { %v900_v15 = vpop.f32.mrb[16].mxu1  ;;  %1501 = vadd.xlane.f32.xlu1 %v1500_v26 }
 0x197   : > { %v1981_v19 = vpop.f32.mrb[17].mxu1 }
 0x198   : > { %v903_v48 = vpop.f32.mrb[18].mxu1  ;;  %v1460_v41 = vpop.f32.mrb[12].mxu0 }
 0x199   : > { %v1982_v7 = vpop.f32.mrb[19].mxu1  ;;  %v2079_v20 = vadd.f32 %v1460_v41, %v892_v58  ;;  %v2065_v24 = vpop.f32.mrb[13].mxu0 }
 0x19a   : > { %v1463_v27 = vpop.f32.mrb[14].mxu0 }
 0x19b   : > { %v2080_v8 = vadd.f32 %v1463_v27, %v895_v61  ;;  %v2066_v28 = vpop.f32.mrb[15].mxu0  ;;  %v1503_v25 = vsel %vm294_vm3, %v2079_v20, 0.0 }
 0x19c   : > { %1504 = vadd.xlane.f32.xlu0 %v1503_v25 }
 0x19d   : > { %v1506_v29 = vsel %vm294_vm3, %v2080_v8, 0.0 }
 0x19e   : > { %1507 = vadd.xlane.f32.xlu1 %v1506_v29 }
 0x1a0   : > { %v1468_v51 = vpop.f32.mrb[16].mxu0 }
 0x1a1   : > { %v2081_v60 = vadd.f32 %v1468_v51, %v900_v15  ;;  %v2069_v30 = vpop.f32.mrb[17].mxu0 }
 0x1a2   : > { %v1471_v31 = vpop.f32.mrb[18].mxu0 }
 0x1a3   : > { %v2082_v32 = vadd.f32 %v1471_v31, %v903_v48  ;;  %v2070_v53 = vpop.f32.mrb[19].mxu0  ;;  %v1509_v5 = vsel %vm294_vm3, %v2081_v60, 0.0 }
 0x1a4   : > { %1510 = vadd.xlane.f32.xlu0 %v1509_v5  ;;  %v2810_v5 = vld [vmem:[%s2877_s2] ss:$0 sm:$0xff] }
 0x1a5   : > { %v1512_v12 = vsel %vm294_vm3, %v2082_v32, 0.0 }
 0x1a6   : > { %1513 = vadd.xlane.f32.xlu1 %v1512_v12 }
 0x211   : > { %v1487_v38 = vpop.xlane.xlu0 %1486 }
 0x212   : > { %v1516_v40 = vmul.f32 0.0625, %v1487_v38 }
 0x214   : > { %v2756_v0 = vsub.f32 %v2073_v35, %v1516_v40 }
 0x215   : > { %v1490_v34 = vpop.xlane.xlu0 %1489 }
 0x216   : > { %v1517_v37 = vmul.f32 0.0625, %v1490_v34  ;;  %v1536_v49 = vmul.f32 %v2756_v0, %v2756_v0  ;;  %v2816_v34 = vld [vmem:[%s2878_s3] ss:$0 sm:$0xff] }
 0x218   : > { %v2760_v50 = vsub.f32 %v2074_v1, %v1517_v37  ;;  %v1546_v63 = vsel %vm294_vm3, %v1536_v49, 0.0 }
 0x219   : > { %v1493_v2 = vpop.xlane.xlu1 %1492  ;;  %1547 = vadd.xlane.f32.xlu0 %v1546_v63 }
 0x21a   : > { %v1518_v4 = vmul.f32 0.0625, %v1493_v2  ;;  %v1537_v21 = vmul.f32 %v2760_v50, %v2760_v50 }
 0x21c   : > { %v2765_v23 = vsub.f32 %v2075_v52, %v1518_v4  ;;  %v1549_v42 = vsel %vm294_vm3, %v1537_v21, 0.0 }
 0x21d   : > { %v1496_v36 = vpop.xlane.xlu1 %1495  ;;  %1550 = vadd.xlane.f32.xlu1 %v1549_v42 }
 0x21e   : > { %v1519_v33 = vmul.f32 0.0625, %v1496_v36  ;;  %v1538_v43 = vmul.f32 %v2765_v23, %v2765_v23 }
 0x220   : > { %v2770_v44 = vsub.f32 %v2076_v3, %v1519_v33  ;;  %v1552_v35 = vsel %vm294_vm3, %v1538_v43, 0.0 }
 0x221   : > { %v1499_v6 = vpop.xlane.xlu0 %1498  ;;  %1553 = vadd.xlane.f32.xlu0 %v1552_v35 }
 0x222   : > { %v1520_v45 = vmul.f32 0.0625, %v1499_v6  ;;  %v1539_v1 = vmul.f32 %v2770_v44, %v2770_v44 }
 0x223   : > { %v1502_v14 = vpop.xlane.xlu1 %1501 }
 0x224   : > { %v2775_v39 = vsub.f32 %v2077_v9, %v1520_v45  ;;  %v1521_v13 = vmul.f32 0.0625, %v1502_v14  ;;  %v1555_v46 = vsel %vm294_vm3, %v1539_v1, 0.0 }
 0x225   : > { %1556 = vadd.xlane.f32.xlu1 %v1555_v46 }
 0x226   : > { %v2778_v52 = vsub.f32 %v2078_v18, %v1521_v13  ;;  %v1540_v54 = vmul.f32 %v2775_v39, %v2775_v39 }
 0x228   : > { %v1558_v55 = vsel %vm294_vm3, %v1540_v54, 0.0  ;;  %v1541_v3 = vmul.f32 %v2778_v52, %v2778_v52 }
 0x229   : > { %v1505_v16 = vpop.xlane.xlu0 %1504  ;;  %1559 = vadd.xlane.f32.xlu0 %v1558_v55 }
 0x22a   : > { %v1522_v57 = vmul.f32 0.0625, %v1505_v16  ;;  %v1561_v58 = vsel %vm294_vm3, %v1541_v3, 0.0 }
 0x22b   : > { %v1508_v59 = vpop.xlane.xlu1 %1507  ;;  %1562 = vadd.xlane.f32.xlu1 %v1561_v58 }
 0x22c   : > { %v2786_v11 = vsub.f32 %v2079_v20, %v1522_v57  ;;  %v1523_v61 = vmul.f32 0.0625, %v1508_v59 }
 0x22e   : > { %v2788_v62 = vsub.f32 %v2080_v8, %v1523_v61  ;;  %v1542_v17 = vmul.f32 %v2786_v11, %v2786_v11 }
 0x230   : > { %v1564_v9 = vsel %vm294_vm3, %v1542_v17, 0.0  ;;  %v1543_v47 = vmul.f32 %v2788_v62, %v2788_v62 }
 0x231   : > { %1565 = vadd.xlane.f32.xlu0 %v1564_v9  ;;  %v1511_v10 = vpop.xlane.xlu0 %1510 }
 0x232   : > { %v1524_v18 = vmul.f32 0.0625, %v1511_v10  ;;  %v1567_v22 = vsel %vm294_vm3, %v1543_v47, 0.0 }
 0x233   : > { %1568 = vadd.xlane.f32.xlu1 %v1567_v22  ;;  %v1514_v56 = vpop.xlane.xlu1 %1513 }
 0x234   : > { %v2796_v26 = vsub.f32 %v2081_v60, %v1524_v18  ;;  %v1525_v15 = vmul.f32 0.0625, %v1514_v56 }
 0x236   : > { %v2798_v19 = vsub.f32 %v2082_v32, %v1525_v15  ;;  %v1544_v48 = vmul.f32 %v2796_v26, %v2796_v26 }
 0x238   : > { %v1570_v41 = vsel %vm294_vm3, %v1544_v48, 0.0  ;;  %v1545_v7 = vmul.f32 %v2798_v19, %v2798_v19 }
 0x239   : > { %1571 = vadd.xlane.f32.xlu0 %v1570_v41 }
 0x23a   : > { %v1573_v20 = vsel %vm294_vm3, %v1545_v7, 0.0 }
 0x23b   : > { %1574 = vadd.xlane.f32.xlu1 %v1573_v20 }
 0x2a6   : > { %v1548_v24 = vpop.xlane.xlu0 %1547 }
 0x2a7   : > { %v1576_v27 = vmul.f32 0.0625, %v1548_v24 }
 0x2a9   : > { %v1586_v8 = vadd.f32 1e-06, %v1576_v27 }
 0x2aa   : > { %v1551_v28 = vpop.xlane.xlu1 %1550 }
 0x2ab   : > { %2267 = vrsqrt.f32 %v1586_v8  ;;  %v1577_v25 = vmul.f32 0.0625, %v1551_v28 }
 0x2ad   : > { %v1587_v29 = vadd.f32 1e-06, %v1577_v25 }
 0x2ae   : > { %v1554_v51 = vpop.xlane.xlu0 %1553 }
 0x2af   : > { %2269 = vrsqrt.f32 %v1587_v29  ;;  %v1578_v60 = vmul.f32 0.0625, %v1554_v51 }
 0x2b1   : > { %v1588_v30 = vadd.f32 1e-06, %v1578_v60 }
 0x2b2   : > { %v1557_v31 = vpop.xlane.xlu1 %1556 }
 0x2b3   : > { %2271 = vrsqrt.f32 %v1588_v30  ;;  %v1579_v32 = vmul.f32 0.0625, %v1557_v31 }
 0x2b5   : > { %v2268_v53 = vpop.eup %2267  ;;  %v1589_v12 = vadd.f32 1e-06, %v1579_v32 }
 0x2b6   : > { %v1606_v38 = vmul.f32 %v2268_v53, %v2756_v0  ;;  %v1560_v40 = vpop.xlane.xlu0 %1559 }
 0x2b7   : > { %2273 = vrsqrt.f32 %v1589_v12  ;;  %v1580_v37 = vmul.f32 0.0625, %v1560_v40 }
 0x2b8   : > { %v1623_v49 = vmul.f32 %v2810_v5, %v1606_v38  ;;  %v1563_v63 = vpop.xlane.xlu1 %1562 }
 0x2b9   : > { %v2270_v2 = vpop.eup %2269  ;;  %v1590_v0 = vadd.f32 1e-06, %v1580_v37  ;;  %v1581_v4 = vmul.f32 0.0625, %v1563_v63 }
 0x2ba   : > { %v1640_v21 = vadd.f32 %v2816_v34, %v1623_v49  ;;  %v1607_v42 = vmul.f32 %v2270_v2, %v2760_v50 }
 0x2bb   : > { %2275 = vrsqrt.f32 %v1590_v0  ;;  %v1591_v36 = vadd.f32 1e-06, %v1581_v4 }
 0x2bc   : > { %1650 = vst.msk [vmem:[%s2822_s21] sm:$0xff] %vm294_vm3, %v1640_v21  ;;  %v1624_v33 = vmul.f32 %v2810_v5, %v1607_v42 }
 0x2bd   : > { %v2272_v43 = vpop.eup %2271  ;;  %2277 = vrsqrt.f32 %v1591_v36 }
 0x2be   : > { %v1641_v35 = vadd.f32 %v2816_v34, %v1624_v33  ;;  %v1608_v6 = vmul.f32 %v2272_v43, %v2765_v23  ;;  %v1566_v45 = vpop.xlane.xlu0 %1565 }
 0x2bf   : > { %v1582_v1 = vmul.f32 0.0625, %v1566_v45 }
 0x2c0   : > { %1651 = vst.msk [vmem:[%s2822_s21 + $0x8] sm:$0xff] %vm294_vm3, %v1641_v35  ;;  %v1625_v14 = vmul.f32 %v2810_v5, %v1608_v6  ;;  %v1569_v50 = vpop.xlane.xlu1 %1568 }
 0x2c1   : > { %v2274_v13 = vpop.eup %2273  ;;  %v1592_v46 = vadd.f32 1e-06, %v1582_v1  ;;  %v1583_v54 = vmul.f32 0.0625, %v1569_v50 }
 0x2c2   : > { %v1642_v55 = vadd.f32 %v2816_v34, %v1625_v14  ;;  %v1609_v3 = vmul.f32 %v2274_v13, %v2770_v44 }
 0x2c3   : > { %2279 = vrsqrt.f32 %v1592_v46  ;;  %v1593_v16 = vadd.f32 1e-06, %v1583_v54 }
 0x2c4   : > { %1652 = vst.msk [vmem:[%s2822_s21 + $0x10] sm:$0xff] %vm294_vm3, %v1642_v55  ;;  %v1626_v23 = vmul.f32 %v2810_v5, %v1609_v3 }
 0x2c5   : > { %v2276_v57 = vpop.eup %2275  ;;  %2281 = vrsqrt.f32 %v1593_v16 }
 0x2c6   : > { %v1643_v58 = vadd.f32 %v2816_v34, %v1626_v23  ;;  %v1610_v59 = vmul.f32 %v2276_v57, %v2775_v39  ;;  %v1572_v61 = vpop.xlane.xlu0 %1571 }
 0x2c7   : > { %v2278_v17 = vpop.eup %2277  ;;  %v1584_v9 = vmul.f32 0.0625, %v1572_v61 }
 0x2c8   : > { %1653 = vst.msk [vmem:[%s2822_s21 + $0x18] sm:$0xff] %vm294_vm3, %v1643_v58  ;;  %v1627_v44 = vmul.f32 %v2810_v5, %v1610_v59  ;;  %v1611_v47 = vmul.f32 %v2278_v17, %v2778_v52  ;;  %v1575_v10 = vpop.xlane.xlu1 %1574 }
 0x2c9   : > { %v1594_v18 = vadd.f32 1e-06, %v1584_v9  ;;  %v1585_v22 = vmul.f32 0.0625, %v1575_v10 }
 0x2ca   : > { %v1644_v56 = vadd.f32 %v2816_v34, %v1627_v44  ;;  %v1628_v15 = vmul.f32 %v2810_v5, %v1611_v47 }
 0x2cb   : > { %2283 = vrsqrt.f32 %v1594_v18  ;;  %v1595_v39 = vadd.f32 1e-06, %v1585_v22 }
 0x2cc   : > { %1654 = vst.msk [vmem:[%s2822_s21 + $0x20] sm:$0xff] %vm294_vm3, %v1644_v56  ;;  %v1645_v48 = vadd.f32 %v2816_v34, %v1628_v15 }
 0x2cd   : > { %v2280_v41 = vpop.eup %2279  ;;  %2285 = vrsqrt.f32 %v1595_v39 }
 0x2ce   : > { %1655 = vst.msk [vmem:[%s2822_s21 + $0x28] sm:$0xff] %vm294_vm3, %v1645_v48  ;;  %v1612_v52 = vmul.f32 %v2280_v41, %v2786_v11 }
 0x2cf   : > { %v2282_v7 = vpop.eup %2281 }
 0x2d0   : > { %v1629_v20 = vmul.f32 %v2810_v5, %v1612_v52  ;;  %v1613_v24 = vmul.f32 %v2282_v7, %v2788_v62 }
 0x2d2   : > { %v1646_v27 = vadd.f32 %v2816_v34, %v1629_v20  ;;  %v1630_v8 = vmul.f32 %v2810_v5, %v1613_v24 }
 0x2d4   : > { %1656 = vst.msk [vmem:[%s2822_s21 + $0x30] sm:$0xff] %vm294_vm3, %v1646_v27  ;;  %v1647_v28 = vadd.f32 %v2816_v34, %v1630_v8 }
 0x2d5   : > { %v2284_v25 = vpop.eup %2283 }
 0x2d6   : > { %1657 = vst.msk [vmem:[%s2822_s21 + $0x38] sm:$0xff] %vm294_vm3, %v1647_v28  ;;  %v1614_v11 = vmul.f32 %v2284_v25, %v2796_v26 }
 0x2d7   : > { %v2286_v29 = vpop.eup %2285 }
 0x2d8   : > { %v1631_v51 = vmul.f32 %v2810_v5, %v1614_v11  ;;  %v1615_v60 = vmul.f32 %v2286_v29, %v2798_v19 }
 0x2da   : > { %v1648_v62 = vadd.f32 %v2816_v34, %v1631_v51  ;;  %v1632_v30 = vmul.f32 %v2810_v5, %v1615_v60 }
 0x2dc   : > { %1658 = vst.msk [vmem:[%s2822_s21 + $0x40] sm:$0xff] %vm294_vm3, %v1648_v62  ;;  %v1649_v31 = vadd.f32 %v2816_v34, %v1632_v30 }
 0x2de   : > { %1659 = vst.msk [vmem:[%s2822_s21 + $0x48] sm:$0xff] %vm294_vm3, %v1649_v31 }
 0x2df PF: > { %s14_s15 = sadd.s32 1, %s2293_s15  }
 0x2e0   : > { %p11_p4 = scmp.ge.s32.totalorder %s14_s15, 4  }
 0x2e2   :  { %13 = sbr.rel (!%p11_p4) target bundleno = 1 (0x1), region = 74 }

// kernel: vitsfp_forward.44
= control target key start
LH: loop header
LB: loop body
LE: loop exit
PB: predicated region body
PF: predicated region fallthrough
CT: control target
= control target key end

     0   :  { %v139_v0 = vmov 0.0   ;;  %vm140_vm0 = vmmov 0   ;;  %vm35_vm1 = vcmask 261120   ;;  %vm79_vm2 = vcmask 130048   ;;  %s184_s1 = inlined_call_operand.vmem [shape: bf16[32,16], index: 1, kind: input, shape index: {}]   ;;  %s185_s0 = inlined_call_operand.vmem [shape: bf16[8,32], index: 0, kind: input, shape index: {}]   ;;  %s186_s2 = inlined_call_operand.vmem [shape: f32[1,16], index: 2, kind: input, shape index: {}]   ;;  %s187_s3 = inlined_call_operand.vmem [shape: f32[1,16], index: 3, kind: input, shape index: {}]   ;;  %s188_s4 = inlined_call_operand.vmem [shape: bf16[8,16], index: 4, kind: output, shape index: {}]  }
   0x1   :  { %125 = vmatprep.subr.bf16.mxu0 %v139_v0  ;;  %v135_v1 = vld [vmem:[%s184_s1] sm:$0xff]   ;;  %129 = vmatprep.mubr.msk.bf16.mxu0 %vm140_vm0, %v139_v0  ;;  %v136_v2 = vld [vmem:[%s184_s1 + $0x8] sm:$0xff]   ;;  %vm111_vm3 = vcmask 125952  }
   0x2   :  { %126 = vmatpush3.bf16.msra.mxu0 %v135_v1  ;;  %v18_v3 = vld [vmem:[%s185_s0] sm:$0xf] }
   0x3   :  { %127 = vmatprep.subr.bf16.mxu0 %v139_v0  ;;  %v120_v18 = vld [vmem:[%s186_s2] ss:$0 sm:$0xff] }
   0x4   :  { %v121_v20 = vld [vmem:[%s187_s3] ss:$0 sm:$0xff] }
   0x6   :  { %128 = vmatpush3.bf16.msra.mxu0 %v136_v2 }
   0x9   :  { %130 = vmatmul.mubr.msk.bf16.vlgmr.msra.gmra.mrb[0].mxu0 %vm35_vm1, %v18_v3 }
  0xdc   :  { %v73_v4 = vpop.f32.mrb[0].mxu0 }
  0xdd   :  { %v131_v5 = vpop.f32.mrb[1].mxu0  ;;  %v80_v6 = vsel %vm79_vm2, %v73_v4, 0.0 }
  0xde   :  { %81 = vadd.xlane.f32.xlu0 %v80_v6  ;;  %v76_v7 = vpop.f32.mrb[2].mxu0 }
  0xdf   :  { %v132_v8 = vpop.f32.mrb[3].mxu0 }
 0x16b   :  { %v82_v9 = vpop.xlane.xlu0 %81 }
 0x16c   :  { %v84_v10 = vmul.f32 0.0625, %v82_v9 }
 0x16e   :  { %v85_v11 = vsub.f32 %v73_v4, %v84_v10 }
 0x170   :  { %v86_v12 = vmul.f32 %v85_v11, %v85_v11 }
 0x172   :  { %v87_v13 = vsel %vm79_vm2, %v86_v12, 0.0 }
 0x173   :  { %88 = vadd.xlane.f32.xlu0 %v87_v13 }
 0x200   :  { %v89_v14 = vpop.xlane.xlu0 %88 }
 0x201   :  { %v90_v15 = vmul.f32 0.0625, %v89_v14 }
 0x203   :  { %v91_v16 = vadd.f32 1e-06, %v90_v15 }
 0x205   :  { %137 = vrsqrt.f32 %v91_v16 }
 0x20f   :  { %v138_v17 = vpop.eup %137 }
 0x210   :  { %v93_v19 = vmul.f32 %v138_v17, %v85_v11 }
 0x212   :  { %v101_v21 = vmul.f32 %v120_v18, %v93_v19 }
 0x214   :  { %v109_v22 = vadd.f32 %v121_v20, %v101_v21 }
 0x216   :  { %v110_v23 = vpack.c.bf16 %v109_v22, %v109_v22 }
 0x218   :  { %112 = vst.msk [vmem:[%s188_s4] sm:$0xf] %vm111_vm3, %v110_v23 }

// kernel: vitsfp_forward.43
= control target key start
LH: loop header
LB: loop body
LE: loop exit
PB: predicated region body
PF: predicated region fallthrough
CT: control target
= control target key end

     0   :  { %s1276_s15 = smov 0   ;;  %s1402_s0 = inlined_call_operand.vmem [shape: bf16[2,38,16], index: 0, kind: input, shape index: {}]   ;;  %s1403_s1 = inlined_call_operand.vmem [shape: bf16[9,16,16], index: 1, kind: input, shape index: {}]   ;;  %s1404_s2 = inlined_call_operand.vmem [shape: f32[1,16], index: 2, kind: input, shape index: {}]   ;;  %s1405_s3 = inlined_call_operand.vmem [shape: f32[1,16], index: 3, kind: input, shape index: {}]   ;;  %s1406_s4 = inlined_call_operand.vmem [shape: f32[2,24,16], index: 4, kind: output, shape index: {}]  }
   0x1 LB: > { %s1026_s16 = sadd.s32 4294967295, %s1249_s15   ;;  %p1030_p0 = scmp.ge.s32.totalorder %s1249_s15, 1  ;;  %s1249_s15 = sphi %s1276_s15, %s14_s15  }
   0x2   : > { %p162_p1 = scmp.lt.s32.totalorder %s1249_s15, 3 }
   0x4   : > { %p163_p2 = pnand %p1030_p0, %p162_p1 }
   0x5   : > { %v1215_v0 = vld [vmem:[%s1403_s1 + $0x20] sm:$0xff] (!%p163_p2)   ;;  %p188_p3 = scmp.lt.s32.totalorder (!%p163_p2), %s1026_s16, 1  ;;  %v1216_v1 = vld [vmem:[%s1403_s1 + $0x8] sm:$0xff] (!%p163_p2)   ;;  %vm240_vm0 = vcmask (!%p163_p2), 130048   ;;  %vm218_vm1 = vsmask.f32 (!%p163_p2), 7424 }
   0x6   : > { %166 = sbr.rel (%p163_p2) target bundleno = 612 (0x264), region = 36  ;;  %1144 = vmatprep.subr.bf16.mxu0 (!%p163_p2), %v1215_v0  ;;  %v1222_v2 = vld [vmem:[%s1403_s1 + $0x28] sm:$0xff] (!%p163_p2)   ;;  %1120 = vmatprep.subr.bf16.mxu1 (!%p163_p2), %v1216_v1  ;;  %v1223_v3 = vld [vmem:[%s1403_s1] sm:$0xff] (!%p163_p2)   ;;  %vm514_vm2 = vsmask.f32 (!%p163_p2), 4352  ;;  %v1225_v33 = vld [vmem:[%s1403_s1 + $0x30] sm:$0xff] (!%p163_p2)  }
   0x7   : > { %1145 = vmatpush3.bf16.msra.mxu0 (!%p163_p2), %v1215_v0  ;;  %1121 = vmatpush3.bf16.msra.mxu1 (!%p163_p2), %v1216_v1  ;;  %v1227_v35 = vld [vmem:[%s1403_s1 + $0x10] sm:$0xff] (!%p163_p2)   ;;  %vm362_vm3 = vcmask (!%p163_p2), 1046528   ;;  %vm680_vm4 = vcmask (!%p163_p2), 1045504   ;;  %v1233_v54 = vld [vmem:[%s1403_s1 + $0x18] sm:$0xff] (!%p163_p2)   ;;  %vm440_vm5 = vcmask (!%p163_p2), 1044480  }
   0x8   : > { %1150 = vmatprep.subr.bf16.mxu0 (!%p163_p2), %v1222_v2  ;;  %1126 = vmatprep.subr.bf16.mxu1 (!%p163_p2), %v1223_v3  ;;  %v1232_v57 = vld [vmem:[%s1403_s1 + $0x38] sm:$0xff] (!%p163_p2)   ;;  %vm754_vm6 = vsmask.f32 (!%p163_p2), 5376 }
   0xd   : > { %s1408_s16 = smov (!%p188_p3, %s1026_s16), 1 }
   0xe   : > { %s1205_s23 = smul.u32 20, %s1408_s16 }
   0xf   : > { %s1206_s13 = smul.u32 24, %s1408_s16 }
  0x10   : > { %s1302_s28 = scalar_lea.vmem %s1402_s0, %s1205_s23 }
  0x11   : > { %v199_v4 = vld [vmem:[%s1302_s28] sm:$0xf]  ;;  %v200_v5 = vld [vmem:[%s1302_s28 + $0x4] sm:$0xf]  ;;  %v1307_v6 = vld [vmem:[%s1302_s28 + $0x8] sm:$0xf]  ;;  %s197_s22 = scalar_lea.vmem %s1406_s4, %s1206_s13 }
  0x12   : > { %v204_v7 = vld [vmem:[%s1302_s28 + $0xc] sm:$0x1]  ;;  %v1035_v8 = vcombine.low %v199_v4, %v200_v5  ;;  %v429_v9 = vld [vmem:[%s1302_s28] sm:$0x8]  ;;  %v1065_v34 = vcombine.low %v200_v5, %v1307_v6  ;;  %v663_v37 = vld [vmem:[%s1302_s28 + $0x4] sm:$0xc]  ;;  %v1040_v50 = vcombine.low %v1307_v6, %v1307_v6 }
  0x13   : > { %v1312_v10 = vld [vmem:[%s1302_s28 + $0xc] sm:$0xf]  ;;  %v1315_v11 = vcombine.low %v1307_v6, %v204_v7  ;;  %v1317_v12 = vcombine.low %v429_v9, %v200_v5  ;;  %v355_v36 = vld [vmem:[%s1302_s28] sm:$0xe]  ;;  %v1337_v39 = vld [vmem:[%s1302_s28 + $0x8] sm:$0xf] }
  0x14   : > { %v1059_v13 = vcombine.low %v1307_v6, %v1312_v10  ;;  %v220_v14 = vshrl.u32 %v1035_v8, 16  ;;  %v222_v15 = vshll.u32 %v1035_v8, 16  ;;  %v665_v40 = vld [vmem:[%s1302_s28 + $0xc] sm:$0xf]  ;;  %v666_v41 = vld [vmem:[%s1302_s28 + $0x10] sm:$0x3]  ;;  %v1046_v42 = vcombine.low %v355_v36, %v200_v5 }
  0x15   : > { %v227_v16 = vshll.u32 %v1315_v11, 16  ;;  %v231_v17 = vshrl.u32 %v1315_v11, 16  ;;  %v516_v18 = vshrl.u32 %v1317_v12, 16  ;;  %v519_v19 = vshll.u32 %v1317_v12, 16  ;;  %v747_v45 = vld [vmem:[%s1302_s28 + $0x10] sm:$0x7] }
  0x16   : > { %v224_v20 = vrot.slane %v222_v15, 1  ;;  %v524_v21 = vshrl.u32 %v1059_v13, 16  ;;  %v527_v22 = vshll.u32 %v1059_v13, 16  ;;  %v1072_v43 = vcombine.low %v663_v37, %v1337_v39  ;;  %v430_v56 = vld [vmem:[%s1302_s28 + $0xc] sm:$0x7]  ;;  %v1235_v9 = vld [vmem:[%s1403_s1 + $0x40] sm:$0xff]  }
  0x17   : > { %v229_v23 = vrot.slane %v227_v16, 1  ;;  %v518_v24 = vrot.slane %v516_v18, 3  ;;  %v521_v25 = vrot.slane %v519_v19, 4  ;;  %v1073_v44 = vcombine.low %v665_v40, %v666_v41 }
  0x18   : > { %v225_v26 = vor.u32 %v224_v20, %v220_v14  ;;  %v526_v27 = vrot.slane %v524_v21, 3  ;;  %v529_v28 = vrot.slane %v527_v22, 4  ;;  %v363_v46 = vrot.slane %v1046_v42, 1 }
  0x19   : > { %v233_v29 = vor.u32 %v231_v17, %v229_v23  ;;  %v522_v30 = vor.u32 %v521_v25, %v518_v24  ;;  %v364_v47 = vrot.slane %v1315_v11, 1  ;;  %v681_v48 = vrot.slane %v1072_v43, 2 }
  0x1a   : > { %v230_v31 = vsel %vm218_vm1, %v225_v26, %v229_v23  ;;  %v530_v32 = vor.u32 %v529_v28, %v526_v27  ;;  %v682_v49 = vrot.slane %v1073_v44, 2  ;;  %v1079_v51 = vcombine.low %v665_v40, %v747_v45 }
  0x1b   : > { %1122 = vmatprep.mubr.msk.bf16.mxu1 %vm240_vm0, %v230_v31  ;;  %v1066_v52 = vcombine.low %v1312_v10, %v1312_v10  ;;  %v365_v53 = vsel %vm362_vm3, %v363_v46, %v364_v47  ;;  %v756_v58 = vshrl.u32 %v1072_v43, 16  ;;  %v759_v59 = vshll.u32 %v1072_v43, 16  ;;  %v835_v10 = vld [vmem:[%s1302_s28 + $0x4] sm:$0x8] }
  0x1c   : > { %v531_v38 = vsel %vm514_vm2, %v522_v30, %v530_v32  ;;  %1123 = vmatmul.mubr.msk.bf16.vlgmr.msra.gmra.mrb[0].mxu1 %vm240_vm0, %v233_v29  ;;  %v683_v55 = vsel %vm680_vm4, %v681_v48, %v682_v49  ;;  %v764_v60 = vshrl.u32 %v1079_v51, 16  ;;  %v767_v61 = vshll.u32 %v1079_v51, 16 }
  0x1d   : > { %1146 = vmatprep.mubr.msk.bf16.mxu0 %vm240_vm0, %v531_v38  ;;  %1127 = vmatpush3.bf16.msra.mxu1 %v1223_v3  ;;  %v1053_v62 = vcombine.low %v1307_v6, %v430_v56  ;;  %v758_v63 = vrot.slane %v756_v58, 2  ;;  %v761_v0 = vrot.slane %v759_v59, 3  ;;  %v441_v3 = vrot.slane %v1317_v12, 3  ;;  %v1090_v56 = vld [vmem:[%s1405_s3] ss:$0 sm:$0xff] }
  0x1e   : > { %1147 = vmatmul.mubr.msk.bf16.vlgmr.msra.gmra.mrb[0].mxu0 %vm240_vm0, %v530_v32  ;;  %1128 = vmatprep.mubr.msk.bf16.mxu1 %vm240_vm0, %v1035_v8  ;;  %v766_v1 = vrot.slane %v764_v60, 2  ;;  %v1085_v11 = vcombine.low %v835_v10, %v1337_v39  ;;  %v843_v13 = vrot.slane %v1079_v51, 3 }
  0x1f   : > { %1151 = vmatpush3.bf16.msra.mxu0 %v1222_v2  ;;  %1152 = vmatprep.mubr.msk.bf16.mxu0 %vm240_vm0, %v1065_v34  ;;  %v769_v2 = vrot.slane %v767_v61, 3  ;;  %v442_v4 = vrot.slane %v1053_v62, 3  ;;  %v762_v5 = vor.u32 %v761_v0, %v758_v63 }
  0x20   : > { %1156 = vmatprep.subr.bf16.mxu0 %v1225_v33  ;;  %1132 = vmatprep.subr.bf16.mxu1 %v1227_v35  ;;  %v842_v12 = vrot.slane %v1085_v11, 3 }
  0x21   : > { %v770_v7 = vor.u32 %v769_v2, %v766_v1  ;;  %v443_v8 = vsel %vm440_vm5, %v441_v3, %v442_v4 }
  0x22   : > { %v844_v14 = vsel %vm440_vm5, %v842_v12, %v843_v13 }
  0x23   : > { %v771_v6 = vsel %vm754_vm6, %v762_v5, %v770_v7 }
  0x28   : > { %1129 = vmatmul.mubr.msk.bf16.vlgmr.msra.gmra.mrb[0].mxu1 %vm240_vm0, %v1040_v50 }
  0x29   : > { %1133 = vmatpush3.bf16.msra.mxu1 %v1227_v35  ;;  %1134 = vmatprep.mubr.msk.bf16.mxu1 %vm240_vm0, %v365_v53 }
  0x2a   : > { %1153 = vmatmul.mubr.msk.bf16.vlgmr.msra.gmra.mrb[0].mxu0 %vm240_vm0, %v1066_v52  ;;  %1138 = vmatprep.subr.bf16.mxu1 %v1233_v54 }
  0x2b   : > { %1157 = vmatpush3.bf16.msra.mxu0 %v1225_v33  ;;  %1158 = vmatprep.mubr.msk.bf16.mxu0 %vm240_vm0, %v683_v55 }
  0x2c   : > { %1162 = vmatprep.subr.bf16.mxu0 %v1232_v57 }
  0x34   : > { %1135 = vmatmul.mubr.msk.bf16.vlgmr.msra.gmra.mrb[0].mxu1 %vm240_vm0, %v364_v47 }
  0x35   : > { %1139 = vmatpush3.bf16.msra.mxu1 %v1233_v54  ;;  %1140 = vmatprep.mubr.msk.bf16.mxu1 %vm240_vm0, %v443_v8  ;;  %v1089_v54 = vld [vmem:[%s1404_s2] ss:$0 sm:$0xff] }
  0x36   : > { %1159 = vmatmul.mubr.msk.bf16.vlgmr.msra.gmra.mrb[0].mxu0 %vm240_vm0, %v682_v49 }
  0x37   : > { %1163 = vmatpush3.bf16.msra.mxu0 %v1232_v57  ;;  %1164 = vmatprep.mubr.msk.bf16.mxu0 %vm240_vm0, %v771_v6 }
  0x38   : > { %1168 = vmatprep.subr.bf16.mxu0 %v1235_v9 }
  0x40   : > { %1141 = vmatmul.mubr.msk.bf16.vlgmr.msra.gmra.mrb[0].mxu1 %vm240_vm0, %v442_v4 }
  0x42   : > { %1165 = vmatmul.mubr.msk.bf16.vlgmr.msra.gmra.mrb[0].mxu0 %vm240_vm0, %v770_v7 }
  0x43   : > { %1169 = vmatpush3.bf16.msra.mxu0 %v1235_v9  ;;  %1170 = vmatprep.mubr.msk.bf16.mxu0 %vm240_vm0, %v844_v14 }
  0x4e   : > { %1171 = vmatmul.mubr.msk.bf16.vlgmr.msra.gmra.mrb[0].mxu0 %vm240_vm0, %v843_v13 }
 0x113   : > { %v1142_v15 = vpop.f32.mrb[0].mxu1 }
 0x114   : > { %v490_v16 = vpop.f32.mrb[1].mxu1 }
 0x115   : > { %v1143_v17 = vpop.f32.mrb[2].mxu1 }
 0x116   : > { %v493_v18 = vpop.f32.mrb[3].mxu1 }
 0x121   : > { %v1172_v19 = vpop.f32.mrb[0].mxu0 }
 0x122   : > { %v1174_v20 = vadd.f32 %v1172_v19, %v1142_v15  ;;  %v891_v21 = vpop.f32.mrb[1].mxu0 }
 0x123   : > { %v1175_v22 = vadd.f32 %v891_v21, %v490_v16  ;;  %v1173_v23 = vpop.f32.mrb[2].mxu0 }
 0x124   : > { %v894_v24 = vpop.f32.mrb[3].mxu0  ;;  %v914_v25 = vsel %vm240_vm0, %v1174_v20, 0.0 }
 0x125   : > { %v1176_v26 = vadd.f32 %v894_v24, %v493_v18  ;;  %915 = vadd.xlane.f32.xlu1 %v914_v25  ;;  %v908_v27 = vsel %vm240_vm0, %v1175_v22, 0.0 }
 0x126   : > { %909 = vadd.xlane.f32.xlu0 %v908_v27 }
 0x127   : > { %v911_v28 = vsel %vm240_vm0, %v1176_v26, 0.0 }
 0x12a   : > { %912 = vadd.xlane.f32.xlu0 %v911_v28 }
 0x1b2   : > { %v916_v29 = vpop.xlane.xlu1 %915 }
 0x1b3   : > { %v920_v30 = vmul.f32 0.0625, %v916_v29  ;;  %v910_v31 = vpop.xlane.xlu0 %909 }
 0x1b4   : > { %v918_v32 = vmul.f32 0.0625, %v910_v31 }
 0x1b5   : > { %v923_v33 = vsub.f32 %v1174_v20, %v920_v30 }
 0x1b6   : > { %v921_v34 = vsub.f32 %v1175_v22, %v918_v32 }
 0x1b7   : > { %v913_v35 = vpop.xlane.xlu0 %912  ;;  %v926_v40 = vmul.f32 %v923_v33, %v923_v33 }
 0x1b8   : > { %v919_v36 = vmul.f32 0.0625, %v913_v35  ;;  %v924_v37 = vmul.f32 %v921_v34, %v921_v34 }
 0x1b9   : > { %v933_v42 = vsel %vm240_vm0, %v926_v40, 0.0 }
 0x1ba   : > { %v922_v38 = vsub.f32 %v1176_v26, %v919_v36  ;;  %v927_v39 = vsel %vm240_vm0, %v924_v37, 0.0 }
 0x1bb   : > { %928 = vadd.xlane.f32.xlu1 %v927_v39 }
 0x1bc   : > { %v925_v41 = vmul.f32 %v922_v38, %v922_v38 }
 0x1be   : > { %v930_v43 = vsel %vm240_vm0, %v925_v41, 0.0 }
 0x1bf   : > { %934 = vadd.xlane.f32.xlu1 %v933_v42  ;;  %931 = vadd.xlane.f32.xlu0 %v930_v43 }
 0x248   : > { %v929_v44 = vpop.xlane.xlu1 %928 }
 0x249   : > { %v936_v45 = vmul.f32 0.0625, %v929_v44 }
 0x24b   : > { %v939_v46 = vadd.f32 1e-06, %v936_v45 }
 0x24c   : > { %v935_v47 = vpop.xlane.xlu1 %934  ;;  %v932_v48 = vpop.xlane.xlu0 %931 }
 0x24d   : > { %1237 = vrsqrt.f32 %v939_v46  ;;  %v938_v49 = vmul.f32 0.0625, %v935_v47  ;;  %v937_v50 = vmul.f32 0.0625, %v932_v48 }
 0x24f   : > { %v941_v51 = vadd.f32 1e-06, %v938_v49  ;;  %v940_v52 = vadd.f32 1e-06, %v937_v50 }
 0x251   : > { %1239 = vrsqrt.f32 %v941_v51 }
 0x252   : > { %1241 = vrsqrt.f32 %v940_v52 }
 0x257   : > { %v1238_v53 = vpop.eup %1237 }
 0x258   : > { %v945_v55 = vmul.f32 %v1238_v53, %v921_v34 }
 0x25a   : > { %v955_v57 = vmul.f32 %v1089_v54, %v945_v55 }
 0x25b   : > { %v1240_v58 = vpop.eup %1239 }
 0x25c   : > { %v1242_v59 = vpop.eup %1241  ;;  %v965_v60 = vadd.f32 %v1090_v56, %v955_v57  ;;  %v947_v61 = vmul.f32 %v1240_v58, %v923_v33 }
 0x25d   : > { %v946_v62 = vmul.f32 %v1242_v59, %v922_v38 }
 0x25e   : > { %968 = vst.msk [vmem:[%s197_s22] sm:$0xff] %vm240_vm0, %v965_v60  ;;  %v957_v63 = vmul.f32 %v1089_v54, %v947_v61 }
 0x25f   : > { %v956_v0 = vmul.f32 %v1089_v54, %v946_v62 }
 0x260   : > { %v967_v1 = vadd.f32 %v1090_v56, %v957_v63 }
 0x261   : > { %v966_v2 = vadd.f32 %v1090_v56, %v956_v0 }
 0x262   : > { %970 = vst.msk [vmem:[%s197_s22 + $0x10] sm:$0xff] %vm240_vm0, %v967_v1 }
 0x263   : > { %969 = vst.msk [vmem:[%s197_s22 + $0x8] sm:$0xff] %vm240_vm0, %v966_v2 }
 0x264 PF: > { %s14_s15 = sadd.s32 1, %s1249_s15  }
 0x265   : > { %p11_p4 = scmp.ge.s32.totalorder %s14_s15, 4  }
 0x267   :  { %13 = sbr.rel (!%p11_p4) target bundleno = 1 (0x1), region = 74 }

// kernel: vitsfp_forward.45
= control target key start
LH: loop header
LB: loop body
LE: loop exit
PB: predicated region body
PF: predicated region fallthrough
CT: control target
= control target key end

     0   :  { %s1037_s15 = smov 0   ;;  %s1143_s0 = inlined_call_operand.vmem [shape: bf16[2,18,16], index: 0, kind: input, shape index: {}]   ;;  %s1144_s1 = inlined_call_operand.vmem [shape: bf16[9,16,16], index: 1, kind: input, shape index: {}]   ;;  %s1145_s2 = inlined_call_operand.vmem [shape: f32[1,16], index: 2, kind: input, shape index: {}]   ;;  %s1146_s3 = inlined_call_operand.vmem [shape: f32[1,16], index: 3, kind: input, shape index: {}]   ;;  %s1147_s4 = inlined_call_operand.vmem [shape: f32[2,8,16], index: 4, kind: output, shape index: {}]  }
   0x1 LB: > { %s820_s16 = sadd.s32 4294967295, %s1008_s15   ;;  %p824_p0 = scmp.ge.s32.totalorder %s1008_s15, 1  ;;  %s1008_s15 = sphi %s1037_s15, %s14_s15  }
   0x2   : > { %p162_p1 = scmp.lt.s32.totalorder %s1008_s15, 3 }
   0x4   : > { %p163_p2 = pnand %p824_p0, %p162_p1 }
   0x5   : > { %v984_v0 = vld [vmem:[%s1144_s1 + $0x20] sm:$0xff] (!%p163_p2)   ;;  %v1010_v1 = vmov (!%p163_p2), 0.0   ;;  %v985_v2 = vld [vmem:[%s1144_s1 + $0x8] sm:$0xff] (!%p163_p2)   ;;  %vm1011_vm0 = vmmov (!%p163_p2), 0   ;;  %p187_p3 = scmp.lt.s32.totalorder (!%p163_p2), %s820_s16, 1  ;;  %vm222_vm1 = vcmask (!%p163_p2), 130048  }
   0x6   : > { %166 = sbr.rel (%p163_p2) target bundleno = 603 (0x25b), region = 36  ;;  %914 = vmatprep.subr.bf16.mxu0 (!%p163_p2), %v1010_v1  ;;  %890 = vmatprep.subr.bf16.mxu1 (!%p163_p2), %v1010_v1  ;;  %v989_v16 = vld [vmem:[%s1144_s1] sm:$0xff] (!%p163_p2)   ;;  %v988_v18 = vld [vmem:[%s1144_s1 + $0x28] sm:$0xff] (!%p163_p2)   ;;  %v992_v23 = vld [vmem:[%s1144_s1 + $0x10] sm:$0xff] (!%p163_p2)  }
   0x7   : > { %915 = vmatpush3.bf16.msra.mxu0 (!%p163_p2), %v984_v0  ;;  %892 = vmatprep.mubr.msk.bf16.mxu1 (!%p163_p2), %vm1011_vm0, %v1010_v1  ;;  %v991_v24 = vld [vmem:[%s1144_s1 + $0x30] sm:$0xff] (!%p163_p2)   ;;  %v995_v30 = vld [vmem:[%s1144_s1 + $0x18] sm:$0xff] (!%p163_p2)   ;;  %v998_v41 = vld [vmem:[%s1144_s1 + $0x40] sm:$0xff] (!%p163_p2)  }
   0x8   : > { %891 = vmatpush3.bf16.msra.mxu1 (!%p163_p2), %v985_v2  ;;  %916 = vmatprep.mubr.msk.bf16.mxu0 (!%p163_p2), %vm1011_vm0, %v1010_v1  ;;  %v994_v33 = vld [vmem:[%s1144_s1 + $0x38] sm:$0xff] (!%p163_p2)   ;;  %v868_v0 = vld [vmem:[%s1145_s2] ss:$0 sm:$0xff] (!%p163_p2) }
   0x9   : > { %920 = vmatprep.subr.bf16.mxu0 (!%p163_p2), %v1010_v1  ;;  %896 = vmatprep.subr.bf16.mxu1 (!%p163_p2), %v1010_v1  ;;  %v869_v2 = vld [vmem:[%s1146_s3] ss:$0 sm:$0xff] (!%p163_p2) }
   0xd   : > { %s1149_s16 = smov (!%p187_p3, %s820_s16), 1 }
   0xe   : > { %s973_s21 = smul.u32 12, %s1149_s16  ;;  %s826_s17 = sshll.u32 %s1149_s16, 3 }
   0xf   : > { %s195_s22 = scalar_lea.vmem %s1147_s4, %s826_s17 }
  0x10   : > { %s1065_s24 = scalar_lea.vmem %s1143_s0, %s973_s21 }
  0x11   : > { %v197_v3 = vld [vmem:[%s1065_s24] sm:$0xf]  ;;  %v200_v4 = vld [vmem:[%s1065_s24 + $0x4] sm:$0x1]  ;;  %v612_v28 = vld [vmem:[%s1065_s24 + $0x8] sm:$0x1] }
  0x12   : > { %v373_v5 = vld [vmem:[%s1065_s24] sm:$0xc]  ;;  %v829_v6 = vcombine.low %v197_v3, %v200_v4  ;;  %v434_v7 = vld [vmem:[%s1065_s24 + $0x4] sm:$0x7] }
  0x13   : > { %v846_v8 = vcombine.low %v373_v5, %v434_v7  ;;  %v499_v20 = vld [vmem:[%s1065_s24] sm:$0x8]  ;;  %v611_v27 = vld [vmem:[%s1065_s24 + $0x4] sm:$0xf] }
  0x14   : > { %v210_v9 = vshrl.u32 %v829_v6, 16  ;;  %v212_v10 = vshll.u32 %v829_v6, 16  ;;  %v851_v21 = vcombine.low %v499_v20, %v434_v7  ;;  %v315_v25 = vld [vmem:[%s1065_s24] sm:$0xe]  ;;  %v860_v31 = vcombine.low %v611_v27, %v612_v28  ;;  %v557_v32 = vld [vmem:[%s1065_s24 + $0x4] sm:$0xf] }
  0x15   : > { %v442_v11 = vshrl.u32 %v846_v8, 16  ;;  %v445_v12 = vshll.u32 %v846_v8, 16  ;;  %v836_v26 = vcombine.low %v315_v25, %v200_v4  ;;  %v374_v34 = vld [vmem:[%s1065_s24 + $0x4] sm:$0x3] }
  0x16   : > { %v214_v13 = vrot.slane %v212_v10, 1  ;;  %v506_v22 = vrot.slane %v851_v21, 3  ;;  %v624_v35 = vshll.u32 %v860_v31, 16  ;;  %v841_v36 = vcombine.low %v373_v5, %v374_v34  ;;  %v678_v42 = vld [vmem:[%s1065_s24 + $0x4] sm:$0xe] }
  0x17   : > { %v444_v14 = vrot.slane %v442_v11, 2  ;;  %v447_v15 = vrot.slane %v445_v12, 3  ;;  %v322_v29 = vrot.slane %v836_v26, 1  ;;  %v622_v37 = vshrl.u32 %v860_v31, 16 }
  0x18   : > { %v215_v17 = vor.u32 %v214_v13, %v210_v9  ;;  %v626_v38 = vrot.slane %v624_v35, 1  ;;  %v383_v39 = vrot.slane %v841_v36, 2  ;;  %v865_v43 = vcombine.low %v678_v42, %v612_v28 }
  0x19   : > { %v448_v19 = vor.u32 %v447_v15, %v444_v14 }
  0x1a   : > { %893 = vmatmul.mubr.msk.bf16.vlgmr.msra.gmra.mrb[0].mxu1 %vm222_vm1, %v215_v17  ;;  %v627_v40 = vor.u32 %v626_v38, %v622_v37  ;;  %v685_v44 = vrot.slane %v865_v43, 1 }
  0x1b   : > { %917 = vmatmul.mubr.msk.bf16.vlgmr.msra.gmra.mrb[0].mxu0 %vm222_vm1, %v448_v19  ;;  %897 = vmatpush3.bf16.msra.mxu1 %v989_v16 }
  0x1c   : > { %921 = vmatpush3.bf16.msra.mxu0 %v988_v18  ;;  %898 = vmatprep.mubr.msk.bf16.mxu1 %vm1011_vm0, %v1010_v1 }
  0x1d   : > { %922 = vmatprep.mubr.msk.bf16.mxu0 %vm1011_vm0, %v1010_v1  ;;  %926 = vmatprep.subr.bf16.mxu0 %v1010_v1 }
  0x1e   : > { %902 = vmatprep.subr.bf16.mxu1 %v1010_v1 }
  0x26   : > { %899 = vmatmul.mubr.msk.bf16.vlgmr.msra.gmra.mrb[0].mxu1 %vm222_vm1, %v197_v3 }
  0x27   : > { %923 = vmatmul.mubr.msk.bf16.vlgmr.msra.gmra.mrb[0].mxu0 %vm222_vm1, %v506_v22  ;;  %903 = vmatpush3.bf16.msra.mxu1 %v992_v23 }
  0x28   : > { %927 = vmatpush3.bf16.msra.mxu0 %v991_v24  ;;  %904 = vmatprep.mubr.msk.bf16.mxu1 %vm1011_vm0, %v1010_v1 }
  0x29   : > { %928 = vmatprep.mubr.msk.bf16.mxu0 %vm1011_vm0, %v1010_v1  ;;  %932 = vmatprep.subr.bf16.mxu0 %v1010_v1 }
  0x2a   : > { %908 = vmatprep.subr.bf16.mxu1 %v1010_v1 }
  0x32   : > { %905 = vmatmul.mubr.msk.bf16.vlgmr.msra.gmra.mrb[0].mxu1 %vm222_vm1, %v322_v29 }
  0x33   : > { %929 = vmatmul.mubr.msk.bf16.vlgmr.msra.gmra.mrb[0].mxu0 %vm222_vm1, %v557_v32  ;;  %909 = vmatpush3.bf16.msra.mxu1 %v995_v30 }
  0x34   : > { %933 = vmatpush3.bf16.msra.mxu0 %v994_v33  ;;  %910 = vmatprep.mubr.msk.bf16.mxu1 %vm1011_vm0, %v1010_v1 }
  0x35   : > { %934 = vmatprep.mubr.msk.bf16.mxu0 %vm1011_vm0, %v1010_v1  ;;  %938 = vmatprep.subr.bf16.mxu0 %v1010_v1 }
  0x3e   : > { %911 = vmatmul.mubr.msk.bf16.vlgmr.msra.gmra.mrb[0].mxu1 %vm222_vm1, %v383_v39 }
  0x3f   : > { %935 = vmatmul.mubr.msk.bf16.vlgmr.msra.gmra.mrb[0].mxu0 %vm222_vm1, %v627_v40 }
  0x40   : > { %939 = vmatpush3.bf16.msra.mxu0 %v998_v41  ;;  %940 = vmatprep.mubr.msk.bf16.mxu0 %vm1011_vm0, %v1010_v1 }
  0x4b   : > { %941 = vmatmul.mubr.msk.bf16.vlgmr.msra.gmra.mrb[0].mxu0 %vm222_vm1, %v685_v44 }
 0x111   : > { %v427_v45 = vpop.f32.mrb[0].mxu1 }
 0x112   : > { %v912_v46 = vpop.f32.mrb[1].mxu1 }
 0x113   : > { %v430_v47 = vpop.f32.mrb[2].mxu1 }
 0x114   : > { %v913_v48 = vpop.f32.mrb[3].mxu1 }
 0x11e   : > { %v729_v49 = vpop.f32.mrb[0].mxu0 }
 0x11f   : > { %v944_v50 = vadd.f32 %v729_v49, %v427_v45  ;;  %v942_v51 = vpop.f32.mrb[1].mxu0 }
 0x120   : > { %v732_v52 = vpop.f32.mrb[2].mxu0 }
 0x121   : > { %v943_v53 = vpop.f32.mrb[3].mxu0  ;;  %v736_v54 = vsel %vm222_vm1, %v944_v50, 0.0 }
 0x122   : > { %737 = vadd.xlane.f32.xlu0 %v736_v54 }
 0x1af   : > { %v738_v55 = vpop.xlane.xlu0 %737 }
 0x1b0   : > { %v740_v56 = vmul.f32 0.0625, %v738_v55 }
 0x1b2   : > { %v741_v57 = vsub.f32 %v944_v50, %v740_v56 }
 0x1b4   : > { %v742_v58 = vmul.f32 %v741_v57, %v741_v57 }
 0x1b6   : > { %v743_v59 = vsel %vm222_vm1, %v742_v58, 0.0 }
 0x1b7   : > { %744 = vadd.xlane.f32.xlu0 %v743_v59 }
 0x244   : > { %v745_v60 = vpop.xlane.xlu0 %744 }
 0x245   : > { %v746_v61 = vmul.f32 0.0625, %v745_v60 }
 0x247   : > { %v747_v62 = vadd.f32 1e-06, %v746_v61 }
 0x249   : > { %1000 = vrsqrt.f32 %v747_v62 }
 0x253   : > { %v1001_v63 = vpop.eup %1000 }
 0x254   : > { %v749_v1 = vmul.f32 %v1001_v63, %v741_v57 }
 0x256   : > { %v757_v3 = vmul.f32 %v868_v0, %v749_v1 }
 0x258   : > { %v765_v4 = vadd.f32 %v869_v2, %v757_v3 }
 0x25a   : > { %766 = vst.msk [vmem:[%s195_s22] sm:$0xff] %vm222_vm1, %v765_v4 }
 0x25b PF: > { %s14_s15 = sadd.s32 1, %s1008_s15  }
 0x25c   : > { %p11_p4 = scmp.ge.s32.totalorder %s14_s15, 4  }
 0x25e   :  { %13 = sbr.rel (!%p11_p4) target bundleno = 1 (0x1), region = 74 }

// kernel: vitsfp_forward.47
= control target key start
LH: loop header
LB: loop body
LE: loop exit
PB: predicated region body
PF: predicated region fallthrough
CT: control target
= control target key end

     0   :  { %s1023_s15 = smov 0   ;;  %s1123_s0 = inlined_call_operand.vmem [shape: bf16[2,11,16], index: 0, kind: input, shape index: {}]   ;;  %s1124_s1 = inlined_call_operand.vmem [shape: bf16[9,16,16], index: 1, kind: input, shape index: {}]   ;;  %s1125_s2 = inlined_call_operand.vmem [shape: f32[1,16], index: 2, kind: input, shape index: {}]   ;;  %s1126_s3 = inlined_call_operand.vmem [shape: f32[1,16], index: 3, kind: input, shape index: {}]   ;;  %s1127_s4 = inlined_call_operand.vmem [shape: f32[2,3,16], index: 4, kind: output, shape index: {}]  }
   0x1 LB: > { %s811_s16 = sadd.s32 4294967295, %s994_s15   ;;  %p815_p0 = scmp.ge.s32.totalorder %s994_s15, 1  ;;  %s994_s15 = sphi %s1023_s15, %s14_s15  }
   0x2   : > { %p162_p1 = scmp.lt.s32.totalorder %s994_s15, 3 }
   0x4   : > { %p163_p2 = pnand %p815_p0, %p162_p1 }
   0x5   : > { %v973_v0 = vld [vmem:[%s1124_s1 + $0x20] sm:$0xff] (!%p163_p2)   ;;  %v996_v1 = vmov (!%p163_p2), 0.0   ;;  %p187_p3 = scmp.lt.s32.totalorder (!%p163_p2), %s811_s16, 1  ;;  %vm997_vm0 = vmmov (!%p163_p2), 0   ;;  %v976_v2 = vld [vmem:[%s1124_s1 + $0x8] sm:$0xff] (!%p163_p2)   ;;  %vm219_vm1 = vcmask (!%p163_p2), 130048  }
   0x6   : > { %166 = sbr.rel (%p163_p2) target bundleno = 595 (0x253), region = 36  ;;  %904 = vmatprep.subr.bf16.mxu0 (!%p163_p2), %v996_v1  ;;  %880 = vmatprep.subr.bf16.mxu1 (!%p163_p2), %v996_v1  ;;  %v975_v4 = vld [vmem:[%s1124_s1 + $0x28] sm:$0xff] (!%p163_p2)   ;;  %v978_v13 = vld [vmem:[%s1124_s1] sm:$0xff] (!%p163_p2)   ;;  %v979_v18 = vld [vmem:[%s1124_s1 + $0x30] sm:$0xff] (!%p163_p2)   ;;  %vm726_vm2 = vcmask (!%p163_p2), 124928  }
   0x7   : > { %905 = vmatpush3.bf16.msra.mxu0 (!%p163_p2), %v973_v0  ;;  %906 = vmatprep.mubr.msk.bf16.mxu0 (!%p163_p2), %vm997_vm0, %v996_v1  ;;  %v980_v19 = vld [vmem:[%s1124_s1 + $0x10] sm:$0xff] (!%p163_p2)   ;;  %v982_v22 = vld [vmem:[%s1124_s1 + $0x38] sm:$0xff] (!%p163_p2)   ;;  %v985_v33 = vld [vmem:[%s1124_s1 + $0x40] sm:$0xff] (!%p163_p2)  }
   0x8   : > { %910 = vmatprep.subr.bf16.mxu0 (!%p163_p2), %v996_v1  ;;  %882 = vmatprep.mubr.msk.bf16.mxu1 (!%p163_p2), %vm997_vm0, %v996_v1  ;;  %v984_v27 = vld [vmem:[%s1124_s1 + $0x18] sm:$0xff] (!%p163_p2)   ;;  %v857_v57 = vld [vmem:[%s1125_s2] ss:$0 sm:$0xff] (!%p163_p2) }
   0x9   : > { %881 = vmatpush3.bf16.msra.mxu1 (!%p163_p2), %v976_v2  ;;  %v858_v59 = vld [vmem:[%s1126_s3] ss:$0 sm:$0xff] (!%p163_p2) }
   0xa   : > { %886 = vmatprep.subr.bf16.mxu1 (!%p163_p2), %v996_v1 }
   0xd   : > { %s1129_s16 = smov (!%p187_p3, %s811_s16), 1 }
   0xe   : > { %s861_s21 = sshll.u32 %s1129_s16, 3  ;;  %s818_s17 = sshll.u32 %s1129_s16, 2 }
   0xf   : > { %s1050_s24 = scalar_lea.vmem %s1123_s0, %s861_s21  ;;  %s195_s22 = scalar_lea.vmem %s1127_s4, %s818_s17 }
  0x10   : > { %v974_v3 = vld [vmem:[%s1050_s24] ss:$0 sps:$4 sm:$0xcc]   ;;  %v981_v20 = vld [vmem:[%s1050_s24] sm:$0x18]  }
  0x11   : > { %v197_v5 = vld [vmem:[%s1050_s24] sm:$0x3]  ;;  %v438_v6 = vrot.slane %v974_v3, 2  ;;  %v493_v10 = vshrl.u32 %v974_v3, 16  ;;  %v496_v11 = vshll.u32 %v974_v3, 16  ;;  %v560_v21 = vrot.slane %v981_v20, 3 }
  0x12   : > { %v821_v7 = vcombine.low %v197_v5, %v197_v5  ;;  %v983_v23 = vld [vmem:[%s1050_s24] ss:$0 sps:$4 sm:$0x66]   ;;  %v615_v24 = vshrl.u32 %v981_v20, 16  ;;  %v618_v25 = vshll.u32 %v981_v20, 16 }
  0x13   : > { %907 = vmatmul.mubr.msk.bf16.vlgmr.msra.gmra.mrb[0].mxu0 %vm219_vm1, %v438_v6  ;;  %v495_v15 = vrot.slane %v493_v10, 2  ;;  %v498_v16 = vrot.slane %v496_v11, 3  ;;  %v319_v26 = vrot.slane %v983_v23, 1  ;;  %v374_v30 = vshrl.u32 %v983_v23, 16  ;;  %v672_v37 = vld [vmem:[%s1050_s24 + $0x4] sm:$0x3] }
  0x14   : > { %v207_v8 = vshrl.u32 %v821_v7, 16  ;;  %v209_v9 = vshll.u32 %v821_v7, 16  ;;  %911 = vmatpush3.bf16.msra.mxu0 %v975_v4  ;;  %912 = vmatprep.mubr.msk.bf16.mxu0 %vm997_vm0, %v996_v1  ;;  %v617_v28 = vrot.slane %v615_v24, 3  ;;  %v620_v29 = vrot.slane %v618_v25, 4 }
  0x15   : > { %916 = vmatprep.subr.bf16.mxu0 %v996_v1  ;;  %v499_v17 = vor.u32 %v498_v16, %v495_v15  ;;  %v377_v31 = vshll.u32 %v983_v23, 16  ;;  %v376_v34 = vrot.slane %v374_v30, 1 }
  0x16   : > { %v211_v12 = vrot.slane %v209_v9, 1  ;;  %v621_v32 = vor.u32 %v620_v29, %v617_v28 }
  0x17   : > { %v379_v35 = vrot.slane %v377_v31, 2 }
  0x18   : > { %v212_v14 = vor.u32 %v211_v12, %v207_v8 }
  0x19   : > { %v380_v36 = vor.u32 %v379_v35, %v376_v34 }
  0x1a   : > { %883 = vmatmul.mubr.msk.bf16.vlgmr.msra.gmra.mrb[0].mxu1 %vm219_vm1, %v212_v14 }
  0x1b   : > { %887 = vmatpush3.bf16.msra.mxu1 %v978_v13  ;;  %888 = vmatprep.mubr.msk.bf16.mxu1 %vm997_vm0, %v996_v1 }
  0x1c   : > { %892 = vmatprep.subr.bf16.mxu1 %v996_v1 }
  0x1f   : > { %913 = vmatmul.mubr.msk.bf16.vlgmr.msra.gmra.mrb[0].mxu0 %vm219_vm1, %v499_v17 }
  0x20   : > { %917 = vmatpush3.bf16.msra.mxu0 %v979_v18  ;;  %918 = vmatprep.mubr.msk.bf16.mxu0 %vm997_vm0, %v996_v1 }
  0x21   : > { %922 = vmatprep.subr.bf16.mxu0 %v996_v1 }
  0x26   : > { %889 = vmatmul.mubr.msk.bf16.vlgmr.msra.gmra.mrb[0].mxu1 %vm219_vm1, %v197_v5 }
  0x27   : > { %893 = vmatpush3.bf16.msra.mxu1 %v980_v19  ;;  %894 = vmatprep.mubr.msk.bf16.mxu1 %vm997_vm0, %v996_v1 }
  0x28   : > { %898 = vmatprep.subr.bf16.mxu1 %v996_v1 }
  0x2b   : > { %919 = vmatmul.mubr.msk.bf16.vlgmr.msra.gmra.mrb[0].mxu0 %vm219_vm1, %v560_v21 }
  0x2c   : > { %923 = vmatpush3.bf16.msra.mxu0 %v982_v22  ;;  %924 = vmatprep.mubr.msk.bf16.mxu0 %vm997_vm0, %v996_v1 }
  0x2d   : > { %928 = vmatprep.subr.bf16.mxu0 %v996_v1 }
  0x32   : > { %895 = vmatmul.mubr.msk.bf16.vlgmr.msra.gmra.mrb[0].mxu1 %vm219_vm1, %v319_v26 }
  0x33   : > { %899 = vmatpush3.bf16.msra.mxu1 %v984_v27  ;;  %900 = vmatprep.mubr.msk.bf16.mxu1 %vm997_vm0, %v996_v1 }
  0x37   : > { %925 = vmatmul.mubr.msk.bf16.vlgmr.msra.gmra.mrb[0].mxu0 %vm219_vm1, %v621_v32 }
  0x38   : > { %929 = vmatpush3.bf16.msra.mxu0 %v985_v33  ;;  %930 = vmatprep.mubr.msk.bf16.mxu0 %vm997_vm0, %v996_v1 }
  0x3e   : > { %901 = vmatmul.mubr.msk.bf16.vlgmr.msra.gmra.mrb[0].mxu1 %vm219_vm1, %v380_v36 }
  0x43   : > { %931 = vmatmul.mubr.msk.bf16.vlgmr.msra.gmra.mrb[0].mxu0 %vm219_vm1, %v672_v37 }
 0x111   : > { %v424_v38 = vpop.f32.mrb[0].mxu1 }
 0x112   : > { %v902_v39 = vpop.f32.mrb[1].mxu1 }
 0x113   : > { %v427_v40 = vpop.f32.mrb[2].mxu1 }
 0x114   : > { %v903_v41 = vpop.f32.mrb[3].mxu1 }
 0x116   : > { %v719_v42 = vpop.f32.mrb[0].mxu0 }
 0x117   : > { %v934_v43 = vadd.f32 %v719_v42, %v424_v38  ;;  %v932_v44 = vpop.f32.mrb[1].mxu0 }
 0x118   : > { %v722_v45 = vpop.f32.mrb[2].mxu0 }
 0x119   : > { %v933_v46 = vpop.f32.mrb[3].mxu0  ;;  %v727_v47 = vsel %vm726_vm2, %v934_v43, 0.0 }
 0x11a   : > { %728 = vadd.xlane.f32.xlu0 %v727_v47 }
 0x1a7   : > { %v729_v48 = vpop.xlane.xlu0 %728 }
 0x1a8   : > { %v731_v49 = vmul.f32 0.0625, %v729_v48 }
 0x1aa   : > { %v732_v50 = vsub.f32 %v934_v43, %v731_v49 }
 0x1ac   : > { %v733_v51 = vmul.f32 %v732_v50, %v732_v50 }
 0x1ae   : > { %v734_v52 = vsel %vm726_vm2, %v733_v51, 0.0 }
 0x1af   : > { %735 = vadd.xlane.f32.xlu0 %v734_v52 }
 0x23c   : > { %v736_v53 = vpop.xlane.xlu0 %735 }
 0x23d   : > { %v737_v54 = vmul.f32 0.0625, %v736_v53 }
 0x23f   : > { %v738_v55 = vadd.f32 1e-06, %v737_v54 }
 0x241   : > { %986 = vrsqrt.f32 %v738_v55 }
 0x24b   : > { %v987_v56 = vpop.eup %986 }
 0x24c   : > { %v740_v58 = vmul.f32 %v987_v56, %v732_v50 }
 0x24e   : > { %v748_v60 = vmul.f32 %v857_v57, %v740_v58 }
 0x250   : > { %v756_v61 = vadd.f32 %v858_v59, %v748_v60 }
 0x252   : > { %757 = vst.msk [vmem:[%s195_s22] sm:$0x7] %vm726_vm2, %v756_v61 }
 0x253 PF: > { %s14_s15 = sadd.s32 1, %s994_s15  }
 0x254   : > { %p11_p4 = scmp.ge.s32.totalorder %s14_s15, 4  }
 0x256   :  { %13 = sbr.rel (!%p11_p4) target bundleno = 1 (0x1), region = 74 }

</bundles_post_ra>
